<compile_context>
chip_gen: v7x
topology: tpu7x:2x2x1
jax: 0.10.0
libtpu: 0.0.40
codegen_flags: <defaults>
</compile_context>

<pallas_src>
import functools

import jax
import jax.numpy as jnp
from jax.experimental import pallas as pl
from jax.experimental.pallas import tpu as pltpu

K = 9                     # kernel_size of NetworkNoise3
MAX_SHIFT = (K - 1) * 8   # = 64, largest causal shift (dilation 8)


def _causal_layer(h, w_ref, b_ref, cin, d, Bb, T_pad):
    """One causal dilated conv layer (cout = 2), vectorized over the packed batch.

    h:      (cin*Bb, T_pad) f32 — channels stacked on the sublane axis, channel ci in
            rows [ci*Bb, (ci+1)*Bb).  Lanes >= T are assumed ZERO (mask-free shifting).
    w_ref:  SMEM (2, cin*K) f32, w_ref[co, ci*K + j] == torch weight[co, ci, j].
    b_ref:  SMEM (2,) f32.
    Returns [acc0, acc1], each (Bb, T_pad) f32 (pre-activation; lanes >= T hold junk).
    """
    # Bias folded into the accumulator init (hoisted broadcast, no zeros+add).
    acc = [jnp.full((Bb, T_pad), b_ref[co], jnp.float32) for co in range(2)]
    for j in range(K):                              # tap-outer: each shifted copy once
        s = (K - 1 - j) * d
        # out[..., t] = h[..., t - s]; wrapped prefix comes from lanes >= T_pad - 64 >= T,
        # which are zero by construction -> no mask/select needed.
        shifted = h if s == 0 else pltpu.roll(h, shift=s, axis=1)
        if cin == 1:
            chans = [shifted]
        else:  # static, sublane-tile-aligned slices (Bb is a multiple of 8) -> views
            chans = [shifted[0:Bb], shifted[Bb:2 * Bb]]
        for ci in range(cin):
            for co in range(2):
                acc[co] = acc[co] + w_ref[co, ci * K + j] * chans[ci]
    return acc


def network_noise3_kernel(w1, b1, w2, b2, w3, b3, w4, b4,
                          x_ref, means_ref, stds_ref, *, t_valid):
    # x_ref: (Bb, T_pad)   means_ref / stds_ref: (Bb, T_pad)   (per-grid-step blocks)
    Bb, T_pad = x_ref.shape

    # One (2*Bb, T_pad) validity mask, reused by the three fused tanh+re-zero steps.
    lane2 = jax.lax.broadcasted_iota(jnp.int32, (2 * Bb, T_pad), 1)
    valid2 = lane2 < t_valid

    x = x_ref[...]                                                    # (Bb, T_pad), 0 past T

    # Layer 1 (cin=1, dilation 1).  Keep per-channel results for the residual add.
    x1 = _causal_layer(x, w1, b1, 1, 1, Bb, T_pad)                    # 2 x (Bb, T_pad)

    # tanh + re-zero lanes >= T, applied on the channel-stacked array (one op each).
    h = jnp.where(valid2, jnp.tanh(jnp.concatenate(x1, axis=0)), 0.0)           # (2Bb, T)
    h = jnp.where(valid2,
                  jnp.tanh(jnp.concatenate(
                      _causal_layer(h, w2, b2, 2, 2, Bb, T_pad), axis=0)), 0.0)  # layer 2
    h = jnp.where(valid2,
                  jnp.tanh(jnp.concatenate(
                      _causal_layer(h, w3, b3, 2, 4, Bb, T_pad), axis=0)), 0.0)  # layer 3
    y = _causal_layer(h, w4, b4, 2, 8, Bb, T_pad)                     # layer 4 (no tanh)

    # Residual add + heads.  Lanes >= T hold junk but are sliced away by the wrapper.
    means_ref[...] = y[0] + x1[0]
    stds_ref[...] = jnp.exp(0.5 * (y[1] + x1[1]))


def _choose_grid(B):
    """Pick (n_blocks, Bb, B_pad): one fat block on single-TC chips, >=2 on multi-TC."""
    kind = ""
    try:
        kind = jax.devices()[0].device_kind.lower()
    except Exception:  # pragma: no cover - device query is best-effort
        pass
    single_tc = any(s in kind for s in ("v5 lite", "v5e", "v6 lite", "v6e"))
    min_blocks = 1 if (single_tc or B <= 8) else 2       # v7x & unknown: feed both TCs
    n_blocks = max(min_blocks, -(-B // 256))             # cap Bb at ~256 sublanes/step
    B_pad = -(-B // (8 * n_blocks)) * (8 * n_blocks)     # multiple of 8 per block
    return n_blocks, B_pad // n_blocks, B_pad


def network_noise3_forward(x, params):
    """x: (B, 1, T). Returns (means (B, T), stds (B, T)) — same as the PyTorch module."""
    B, cin, T = x.shape
    assert cin == 1
    w1, b1, w2, b2, w3, b3, w4, b4 = params

    # Lane-dense time with a >=64-lane zero tail so rolls never wrap onto live data.
    T_pad = ((T + MAX_SHIFT + 127) // 128) * 128
    n_blocks, Bb, B_pad = _choose_grid(B)

    x2 = x[:, 0, :].astype(jnp.float32)
    if (B_pad, T_pad) != (B, T):
        x2 = jnp.pad(x2, ((0, B_pad - B), (0, T_pad - T)))   # fused by XLA; zeros are inert

    smem = pl.BlockSpec(memory_space=pltpu.MemorySpace.SMEM)
    blk = lambda b: (b, 0)
    kernel = functools.partial(network_noise3_kernel, t_valid=T)

    means_p, stds_p = pl.pallas_call(
        kernel,
        out_shape=(jax.ShapeDtypeStruct((B_pad, T_pad), jnp.float32),
                   jax.ShapeDtypeStruct((B_pad, T_pad), jnp.float32)),
        grid=(n_blocks,),
        in_specs=[smem] * 8 + [pl.BlockSpec((Bb, T_pad), blk)],
        out_specs=(pl.BlockSpec((Bb, T_pad), blk),
                   pl.BlockSpec((Bb, T_pad), blk)),
        compiler_params=pltpu.CompilerParams(dimension_semantics=("parallel",)),
    )(
        w1.reshape(2, -1).astype(jnp.float32), b1.astype(jnp.float32),
        w2.reshape(2, -1).astype(jnp.float32), b2.astype(jnp.float32),
        w3.reshape(2, -1).astype(jnp.float32), b3.astype(jnp.float32),
        w4.reshape(2, -1).astype(jnp.float32), b4.astype(jnp.float32),
        x2,
    )
    return means_p[:B, :T], stds_p[:B, :T]


def forward_reference(x, params):
    """Pure-JAX reference (lax.conv_general_dilated) mirroring the PyTorch forward."""
    w1, b1, w2, b2, w3, b3, w4, b4 = params

    def cconv(h, w, b, d):
        pad = (w.shape[-1] - 1) * d
        y = jax.lax.conv_general_dilated(
            h, w, window_strides=(1,), padding=[(pad, 0)], rhs_dilation=(d,),
            dimension_numbers=("NCH", "OIH", "NCH"),
            precision=jax.lax.Precision.HIGHEST)
        return y + b[None, :, None]

    x1 = cconv(x, w1, b1, 1)
    h = jnp.tanh(x1)
    h = jnp.tanh(cconv(h, w2, b2, 2))
    h = jnp.tanh(cconv(h, w3, b3, 4))
    h = cconv(h, w4, b4, 8)
    y = h + x1
    return y[:, 0, :], jnp.exp(0.5 * y[:, 1, :])


def init_params(key):
    """Deterministic init matching the PyTorch layer shapes (uniform, fan-in scaled)."""
    def conv_init(k, cout, cin, ksz):
        kw, kb = jax.random.split(k)
        bound = 1.0 / jnp.sqrt(cin * ksz)
        w = jax.random.uniform(kw, (cout, cin, ksz), jnp.float32, -bound, bound)
        b = jax.random.uniform(kb, (cout,), jnp.float32, -bound, bound)
        return w, b

    k1, k2, k3, k4 = jax.random.split(key, 4)
    w1, b1 = conv_init(k1, 2, 1, K)
    w2, b2 = conv_init(k2, 2, 2, K)
    w3, b3 = conv_init(k3, 2, 2, K)
    w4, b4 = conv_init(k4, 2, 2, K)
    return (w1, b1, w2, b2, w3, b3, w4, b4)


if __name__ == "__main__":
    key = jax.random.PRNGKey(0)
    kp, kx = jax.random.split(key)
    params = init_params(kp)

    # Small but representative: exercises batch packing, the generation-aware grid choice
    # (1 fat block on v5e/v6e, 2 parallel blocks elsewhere) and the mask-free shift
    # padding path (T=500 -> T_pad=640 with a 140-lane zero tail).
    B, T = 16, 500
    x = jax.random.normal(kx, (B, 1, T), dtype=jnp.float32)
    # NOTE: the PyTorch forward takes `cur_gt` but never uses it; it is omitted here.

    means, stds = network_noise3_forward(x, params)
    jax.block_until_ready(means)
    jax.block_until_ready(stds)

    means_ref, stds_ref = forward_reference(x, params)
    assert means.shape == (B, T) and stds.shape == (B, T)
    assert jnp.allclose(means, means_ref, atol=2e-3, rtol=2e-3), "means mismatch"
    assert jnp.allclose(stds, stds_ref, atol=2e-3, rtol=2e-3), "stds mismatch"

    print("KERNEL_OK")
</pallas_src>

<mosaic_0001>
module attributes {stable_mosaic.version = 11 : i64} {
  func.func @network_noise3_kernel(%arg0: i32, %arg1: memref<2x9xf32, #tpu.memory_space<smem>>, %arg2: memref<2xf32, #tpu.memory_space<smem>>, %arg3: memref<2x18xf32, #tpu.memory_space<smem>>, %arg4: memref<2xf32, #tpu.memory_space<smem>>, %arg5: memref<2x18xf32, #tpu.memory_space<smem>>, %arg6: memref<2xf32, #tpu.memory_space<smem>>, %arg7: memref<2x18xf32, #tpu.memory_space<smem>>, %arg8: memref<2xf32, #tpu.memory_space<smem>>, %arg9: memref<8x640xf32, #tpu.memory_space<vmem>>, %arg10: memref<8x640xf32, #tpu.memory_space<vmem>>, %arg11: memref<8x640xf32, #tpu.memory_space<vmem>>) attributes {dimension_semantics = [#tpu.dimension_semantics<parallel>], iteration_bounds = array<i64: 2>, scalar_prefetch = 0 : i64, scratch_operands = 0 : i64, tpu.core_type = #tpu.core_type<tc>, window_params = [{transform_indices = @transform_0, window_bounds = array<i64: 2, 9>}, {transform_indices = @transform_1, window_bounds = array<i64: 2>}, {transform_indices = @transform_2, window_bounds = array<i64: 2, 18>}, {transform_indices = @transform_3, window_bounds = array<i64: 2>}, {transform_indices = @transform_4, window_bounds = array<i64: 2, 18>}, {transform_indices = @transform_5, window_bounds = array<i64: 2>}, {transform_indices = @transform_6, window_bounds = array<i64: 2, 18>}, {transform_indices = @transform_7, window_bounds = array<i64: 2>}, {transform_indices = @transform_8, window_bounds = array<i64: 8, 640>}, {transform_indices = @transform_9, window_bounds = array<i64: 8, 640>}, {transform_indices = @transform_10, window_bounds = array<i64: 8, 640>}]} {
    %0 = tpu.iota {dimensions = array<i32: 1>} : vector<16x640xi32>
    %c500_i32 = arith.constant 500 : i32
    %1 = vector.broadcast %c500_i32 : i32 to vector<16x640xi32>
    %2 = arith.cmpi slt, %0, %1 : vector<16x640xi32>
    %c0 = arith.constant 0 : index
    %c0_0 = arith.constant 0 : index
    %3 = vector.load %arg9[%c0, %c0_0] : memref<8x640xf32, #tpu.memory_space<vmem>>, vector<8x640xf32>
    %c0_1 = arith.constant 0 : index
    %4 = memref.load %arg2[%c0_1] : memref<2xf32, #tpu.memory_space<smem>>
    %5 = vector.broadcast %4 : f32 to vector<8x640xf32>
    %c1 = arith.constant 1 : index
    %6 = memref.load %arg2[%c1] : memref<2xf32, #tpu.memory_space<smem>>
    %7 = vector.broadcast %6 : f32 to vector<8x640xf32>
    %c8_i32 = arith.constant 8 : i32
    %8 = tpu.dynamic_rotate %3 by %c8_i32 dim 1 : vector<8x640xf32>, i32 -> vector<8x640xf32>
    %c0_2 = arith.constant 0 : index
    %c0_3 = arith.constant 0 : index
    %9 = memref.load %arg1[%c0_2, %c0_3] : memref<2x9xf32, #tpu.memory_space<smem>>
    %10 = vector.broadcast %9 : f32 to vector<8x640xf32>
    %11 = arith.mulf %10, %8 : vector<8x640xf32>
    %12 = arith.addf %5, %11 : vector<8x640xf32>
    %c1_4 = arith.constant 1 : index
    %c0_5 = arith.constant 0 : index
    %13 = memref.load %arg1[%c1_4, %c0_5] : memref<2x9xf32, #tpu.memory_space<smem>>
    %14 = vector.broadcast %13 : f32 to vector<8x640xf32>
    %15 = arith.mulf %14, %8 : vector<8x640xf32>
    %16 = arith.addf %7, %15 : vector<8x640xf32>
    %c7_i32 = arith.constant 7 : i32
    %17 = tpu.dynamic_rotate %3 by %c7_i32 dim 1 : vector<8x640xf32>, i32 -> vector<8x640xf32>
    %c0_6 = arith.constant 0 : index
    %c1_7 = arith.constant 1 : index
    %18 = memref.load %arg1[%c0_6, %c1_7] : memref<2x9xf32, #tpu.memory_space<smem>>
    %19 = vector.broadcast %18 : f32 to vector<8x640xf32>
    %20 = arith.mulf %19, %17 : vector<8x640xf32>
    %21 = arith.addf %12, %20 : vector<8x640xf32>
    %c1_8 = arith.constant 1 : index
    %c1_9 = arith.constant 1 : index
    %22 = memref.load %arg1[%c1_8, %c1_9] : memref<2x9xf32, #tpu.memory_space<smem>>
    %23 = vector.broadcast %22 : f32 to vector<8x640xf32>
    %24 = arith.mulf %23, %17 : vector<8x640xf32>
    %25 = arith.addf %16, %24 : vector<8x640xf32>
    %c6_i32 = arith.constant 6 : i32
    %26 = tpu.dynamic_rotate %3 by %c6_i32 dim 1 : vector<8x640xf32>, i32 -> vector<8x640xf32>
    %c0_10 = arith.constant 0 : index
    %c2 = arith.constant 2 : index
    %27 = memref.load %arg1[%c0_10, %c2] : memref<2x9xf32, #tpu.memory_space<smem>>
    %28 = vector.broadcast %27 : f32 to vector<8x640xf32>
    %29 = arith.mulf %28, %26 : vector<8x640xf32>
    %30 = arith.addf %21, %29 : vector<8x640xf32>
    %c1_11 = arith.constant 1 : index
    %c2_12 = arith.constant 2 : index
    %31 = memref.load %arg1[%c1_11, %c2_12] : memref<2x9xf32, #tpu.memory_space<smem>>
    %32 = vector.broadcast %31 : f32 to vector<8x640xf32>
    %33 = arith.mulf %32, %26 : vector<8x640xf32>
    %34 = arith.addf %25, %33 : vector<8x640xf32>
    %c5_i32 = arith.constant 5 : i32
    %35 = tpu.dynamic_rotate %3 by %c5_i32 dim 1 : vector<8x640xf32>, i32 -> vector<8x640xf32>
    %c0_13 = arith.constant 0 : index
    %c3 = arith.constant 3 : index
    %36 = memref.load %arg1[%c0_13, %c3] : memref<2x9xf32, #tpu.memory_space<smem>>
    %37 = vector.broadcast %36 : f32 to vector<8x640xf32>
    %38 = arith.mulf %37, %35 : vector<8x640xf32>
    %39 = arith.addf %30, %38 : vector<8x640xf32>
    %c1_14 = arith.constant 1 : index
    %c3_15 = arith.constant 3 : index
    %40 = memref.load %arg1[%c1_14, %c3_15] : memref<2x9xf32, #tpu.memory_space<smem>>
    %41 = vector.broadcast %40 : f32 to vector<8x640xf32>
    %42 = arith.mulf %41, %35 : vector<8x640xf32>
    %43 = arith.addf %34, %42 : vector<8x640xf32>
    %c4_i32 = arith.constant 4 : i32
    %44 = tpu.dynamic_rotate %3 by %c4_i32 dim 1 : vector<8x640xf32>, i32 -> vector<8x640xf32>
    %c0_16 = arith.constant 0 : index
    %c4 = arith.constant 4 : index
    %45 = memref.load %arg1[%c0_16, %c4] : memref<2x9xf32, #tpu.memory_space<smem>>
    %46 = vector.broadcast %45 : f32 to vector<8x640xf32>
    %47 = arith.mulf %46, %44 : vector<8x640xf32>
    %48 = arith.addf %39, %47 : vector<8x640xf32>
    %c1_17 = arith.constant 1 : index
    %c4_18 = arith.constant 4 : index
    %49 = memref.load %arg1[%c1_17, %c4_18] : memref<2x9xf32, #tpu.memory_space<smem>>
    %50 = vector.broadcast %49 : f32 to vector<8x640xf32>
    %51 = arith.mulf %50, %44 : vector<8x640xf32>
    %52 = arith.addf %43, %51 : vector<8x640xf32>
    %c3_i32 = arith.constant 3 : i32
    %53 = tpu.dynamic_rotate %3 by %c3_i32 dim 1 : vector<8x640xf32>, i32 -> vector<8x640xf32>
    %c0_19 = arith.constant 0 : index
    %c5 = arith.constant 5 : index
    %54 = memref.load %arg1[%c0_19, %c5] : memref<2x9xf32, #tpu.memory_space<smem>>
    %55 = vector.broadcast %54 : f32 to vector<8x640xf32>
    %56 = arith.mulf %55, %53 : vector<8x640xf32>
    %57 = arith.addf %48, %56 : vector<8x640xf32>
    %c1_20 = arith.constant 1 : index
    %c5_21 = arith.constant 5 : index
    %58 = memref.load %arg1[%c1_20, %c5_21] : memref<2x9xf32, #tpu.memory_space<smem>>
    %59 = vector.broadcast %58 : f32 to vector<8x640xf32>
    %60 = arith.mulf %59, %53 : vector<8x640xf32>
    %61 = arith.addf %52, %60 : vector<8x640xf32>
    %c2_i32 = arith.constant 2 : i32
    %62 = tpu.dynamic_rotate %3 by %c2_i32 dim 1 : vector<8x640xf32>, i32 -> vector<8x640xf32>
    %c0_22 = arith.constant 0 : index
    %c6 = arith.constant 6 : index
    %63 = memref.load %arg1[%c0_22, %c6] : memref<2x9xf32, #tpu.memory_space<smem>>
    %64 = vector.broadcast %63 : f32 to vector<8x640xf32>
    %65 = arith.mulf %64, %62 : vector<8x640xf32>
    %66 = arith.addf %57, %65 : vector<8x640xf32>
    %c1_23 = arith.constant 1 : index
    %c6_24 = arith.constant 6 : index
    %67 = memref.load %arg1[%c1_23, %c6_24] : memref<2x9xf32, #tpu.memory_space<smem>>
    %68 = vector.broadcast %67 : f32 to vector<8x640xf32>
    %69 = arith.mulf %68, %62 : vector<8x640xf32>
    %70 = arith.addf %61, %69 : vector<8x640xf32>
    %c1_i32 = arith.constant 1 : i32
    %71 = tpu.dynamic_rotate %3 by %c1_i32 dim 1 : vector<8x640xf32>, i32 -> vector<8x640xf32>
    %c0_25 = arith.constant 0 : index
    %c7 = arith.constant 7 : index
    %72 = memref.load %arg1[%c0_25, %c7] : memref<2x9xf32, #tpu.memory_space<smem>>
    %73 = vector.broadcast %72 : f32 to vector<8x640xf32>
    %74 = arith.mulf %73, %71 : vector<8x640xf32>
    %75 = arith.addf %66, %74 : vector<8x640xf32>
    %c1_26 = arith.constant 1 : index
    %c7_27 = arith.constant 7 : index
    %76 = memref.load %arg1[%c1_26, %c7_27] : memref<2x9xf32, #tpu.memory_space<smem>>
    %77 = vector.broadcast %76 : f32 to vector<8x640xf32>
    %78 = arith.mulf %77, %71 : vector<8x640xf32>
    %79 = arith.addf %70, %78 : vector<8x640xf32>
    %c0_28 = arith.constant 0 : index
    %c8 = arith.constant 8 : index
    %80 = memref.load %arg1[%c0_28, %c8] : memref<2x9xf32, #tpu.memory_space<smem>>
    %81 = vector.broadcast %80 : f32 to vector<8x640xf32>
    %82 = arith.mulf %81, %3 : vector<8x640xf32>
    %83 = arith.addf %75, %82 : vector<8x640xf32>
    %c1_29 = arith.constant 1 : index
    %c8_30 = arith.constant 8 : index
    %84 = memref.load %arg1[%c1_29, %c8_30] : memref<2x9xf32, #tpu.memory_space<smem>>
    %85 = vector.broadcast %84 : f32 to vector<8x640xf32>
    %86 = arith.mulf %85, %3 : vector<8x640xf32>
    %87 = arith.addf %79, %86 : vector<8x640xf32>
    %88 = tpu.concatenate %83, %87 in 0 : vector<8x640xf32>, vector<8x640xf32> -> vector<16x640xf32>
    %89 = math.tanh %88 : vector<16x640xf32>
    %cst = arith.constant 0.000000e+00 : f32
    %90 = vector.broadcast %cst : f32 to vector<16x640xf32>
    %91 = arith.select %2, %89, %90 : vector<16x640xi1>, vector<16x640xf32>
    %c0_31 = arith.constant 0 : index
    %92 = memref.load %arg4[%c0_31] : memref<2xf32, #tpu.memory_space<smem>>
    %93 = vector.broadcast %92 : f32 to vector<8x640xf32>
    %c1_32 = arith.constant 1 : index
    %94 = memref.load %arg4[%c1_32] : memref<2xf32, #tpu.memory_space<smem>>
    %95 = vector.broadcast %94 : f32 to vector<8x640xf32>
    %c16_i32 = arith.constant 16 : i32
    %96 = tpu.dynamic_rotate %91 by %c16_i32 dim 1 : vector<16x640xf32>, i32 -> vector<16x640xf32>
    %97 = vector.extract_strided_slice %96 {offsets = [0, 0], sizes = [8, 640], strides = [1, 1]} : vector<16x640xf32> to vector<8x640xf32>
    %98 = vector.extract_strided_slice %96 {offsets = [8, 0], sizes = [8, 640], strides = [1, 1]} : vector<16x640xf32> to vector<8x640xf32>
    %c0_33 = arith.constant 0 : index
    %c0_34 = arith.constant 0 : index
    %99 = memref.load %arg3[%c0_33, %c0_34] : memref<2x18xf32, #tpu.memory_space<smem>>
    %100 = vector.broadcast %99 : f32 to vector<8x640xf32>
    %101 = arith.mulf %100, %97 : vector<8x640xf32>
    %102 = arith.addf %93, %101 : vector<8x640xf32>
    %c1_35 = arith.constant 1 : index
    %c0_36 = arith.constant 0 : index
    %103 = memref.load %arg3[%c1_35, %c0_36] : memref<2x18xf32, #tpu.memory_space<smem>>
    %104 = vector.broadcast %103 : f32 to vector<8x640xf32>
    %105 = arith.mulf %104, %97 : vector<8x640xf32>
    %106 = arith.addf %95, %105 : vector<8x640xf32>
    %c0_37 = arith.constant 0 : index
    %c9 = arith.constant 9 : index
    %107 = memref.load %arg3[%c0_37, %c9] : memref<2x18xf32, #tpu.memory_space<smem>>
    %108 = vector.broadcast %107 : f32 to vector<8x640xf32>
    %109 = arith.mulf %108, %98 : vector<8x640xf32>
    %110 = arith.addf %102, %109 : vector<8x640xf32>
    %c1_38 = arith.constant 1 : index
    %c9_39 = arith.constant 9 : index
    %111 = memref.load %arg3[%c1_38, %c9_39] : memref<2x18xf32, #tpu.memory_space<smem>>
    %112 = vector.broadcast %111 : f32 to vector<8x640xf32>
    %113 = arith.mulf %112, %98 : vector<8x640xf32>
    %114 = arith.addf %106, %113 : vector<8x640xf32>
    %c14_i32 = arith.constant 14 : i32
    %115 = tpu.dynamic_rotate %91 by %c14_i32 dim 1 : vector<16x640xf32>, i32 -> vector<16x640xf32>
    %116 = vector.extract_strided_slice %115 {offsets = [0, 0], sizes = [8, 640], strides = [1, 1]} : vector<16x640xf32> to vector<8x640xf32>
    %117 = vector.extract_strided_slice %115 {offsets = [8, 0], sizes = [8, 640], strides = [1, 1]} : vector<16x640xf32> to vector<8x640xf32>
    %c0_40 = arith.constant 0 : index
    %c1_41 = arith.constant 1 : index
    %118 = memref.load %arg3[%c0_40, %c1_41] : memref<2x18xf32, #tpu.memory_space<smem>>
    %119 = vector.broadcast %118 : f32 to vector<8x640xf32>
    %120 = arith.mulf %119, %116 : vector<8x640xf32>
    %121 = arith.addf %110, %120 : vector<8x640xf32>
    %c1_42 = arith.constant 1 : index
    %c1_43 = arith.constant 1 : index
    %122 = memref.load %arg3[%c1_42, %c1_43] : memref<2x18xf32, #tpu.memory_space<smem>>
    %123 = vector.broadcast %122 : f32 to vector<8x640xf32>
    %124 = arith.mulf %123, %116 : vector<8x640xf32>
    %125 = arith.addf %114, %124 : vector<8x640xf32>
    %c0_44 = arith.constant 0 : index
    %c10 = arith.constant 10 : index
    %126 = memref.load %arg3[%c0_44, %c10] : memref<2x18xf32, #tpu.memory_space<smem>>
    %127 = vector.broadcast %126 : f32 to vector<8x640xf32>
    %128 = arith.mulf %127, %117 : vector<8x640xf32>
    %129 = arith.addf %121, %128 : vector<8x640xf32>
    %c1_45 = arith.constant 1 : index
    %c10_46 = arith.constant 10 : index
    %130 = memref.load %arg3[%c1_45, %c10_46] : memref<2x18xf32, #tpu.memory_space<smem>>
    %131 = vector.broadcast %130 : f32 to vector<8x640xf32>
    %132 = arith.mulf %131, %117 : vector<8x640xf32>
    %133 = arith.addf %125, %132 : vector<8x640xf32>
    %c12_i32 = arith.constant 12 : i32
    %134 = tpu.dynamic_rotate %91 by %c12_i32 dim 1 : vector<16x640xf32>, i32 -> vector<16x640xf32>
    %135 = vector.extract_strided_slice %134 {offsets = [0, 0], sizes = [8, 640], strides = [1, 1]} : vector<16x640xf32> to vector<8x640xf32>
    %136 = vector.extract_strided_slice %134 {offsets = [8, 0], sizes = [8, 640], strides = [1, 1]} : vector<16x640xf32> to vector<8x640xf32>
    %c0_47 = arith.constant 0 : index
    %c2_48 = arith.constant 2 : index
    %137 = memref.load %arg3[%c0_47, %c2_48] : memref<2x18xf32, #tpu.memory_space<smem>>
    %138 = vector.broadcast %137 : f32 to vector<8x640xf32>
    %139 = arith.mulf %138, %135 : vector<8x640xf32>
    %140 = arith.addf %129, %139 : vector<8x640xf32>
    %c1_49 = arith.constant 1 : index
    %c2_50 = arith.constant 2 : index
    %141 = memref.load %arg3[%c1_49, %c2_50] : memref<2x18xf32, #tpu.memory_space<smem>>
    %142 = vector.broadcast %141 : f32 to vector<8x640xf32>
    %143 = arith.mulf %142, %135 : vector<8x640xf32>
    %144 = arith.addf %133, %143 : vector<8x640xf32>
    %c0_51 = arith.constant 0 : index
    %c11 = arith.constant 11 : index
    %145 = memref.load %arg3[%c0_51, %c11] : memref<2x18xf32, #tpu.memory_space<smem>>
    %146 = vector.broadcast %145 : f32 to vector<8x640xf32>
    %147 = arith.mulf %146, %136 : vector<8x640xf32>
    %148 = arith.addf %140, %147 : vector<8x640xf32>
    %c1_52 = arith.constant 1 : index
    %c11_53 = arith.constant 11 : index
    %149 = memref.load %arg3[%c1_52, %c11_53] : memref<2x18xf32, #tpu.memory_space<smem>>
    %150 = vector.broadcast %149 : f32 to vector<8x640xf32>
    %151 = arith.mulf %150, %136 : vector<8x640xf32>
    %152 = arith.addf %144, %151 : vector<8x640xf32>
    %c10_i32 = arith.constant 10 : i32
    %153 = tpu.dynamic_rotate %91 by %c10_i32 dim 1 : vector<16x640xf32>, i32 -> vector<16x640xf32>
    %154 = vector.extract_strided_slice %153 {offsets = [0, 0], sizes = [8, 640], strides = [1, 1]} : vector<16x640xf32> to vector<8x640xf32>
    %155 = vector.extract_strided_slice %153 {offsets = [8, 0], sizes = [8, 640], strides = [1, 1]} : vector<16x640xf32> to vector<8x640xf32>
    %c0_54 = arith.constant 0 : index
    %c3_55 = arith.constant 3 : index
    %156 = memref.load %arg3[%c0_54, %c3_55] : memref<2x18xf32, #tpu.memory_space<smem>>
    %157 = vector.broadcast %156 : f32 to vector<8x640xf32>
    %158 = arith.mulf %157, %154 : vector<8x640xf32>
    %159 = arith.addf %148, %158 : vector<8x640xf32>
    %c1_56 = arith.constant 1 : index
    %c3_57 = arith.constant 3 : index
    %160 = memref.load %arg3[%c1_56, %c3_57] : memref<2x18xf32, #tpu.memory_space<smem>>
    %161 = vector.broadcast %160 : f32 to vector<8x640xf32>
    %162 = arith.mulf %161, %154 : vector<8x640xf32>
    %163 = arith.addf %152, %162 : vector<8x640xf32>
    %c0_58 = arith.constant 0 : index
    %c12 = arith.constant 12 : index
    %164 = memref.load %arg3[%c0_58, %c12] : memref<2x18xf32, #tpu.memory_space<smem>>
    %165 = vector.broadcast %164 : f32 to vector<8x640xf32>
    %166 = arith.mulf %165, %155 : vector<8x640xf32>
    %167 = arith.addf %159, %166 : vector<8x640xf32>
    %c1_59 = arith.constant 1 : index
    %c12_60 = arith.constant 12 : index
    %168 = memref.load %arg3[%c1_59, %c12_60] : memref<2x18xf32, #tpu.memory_space<smem>>
    %169 = vector.broadcast %168 : f32 to vector<8x640xf32>
    %170 = arith.mulf %169, %155 : vector<8x640xf32>
    %171 = arith.addf %163, %170 : vector<8x640xf32>
    %c8_i32_61 = arith.constant 8 : i32
    %172 = tpu.dynamic_rotate %91 by %c8_i32_61 dim 1 : vector<16x640xf32>, i32 -> vector<16x640xf32>
    %173 = vector.extract_strided_slice %172 {offsets = [0, 0], sizes = [8, 640], strides = [1, 1]} : vector<16x640xf32> to vector<8x640xf32>
    %174 = vector.extract_strided_slice %172 {offsets = [8, 0], sizes = [8, 640], strides = [1, 1]} : vector<16x640xf32> to vector<8x640xf32>
    %c0_62 = arith.constant 0 : index
    %c4_63 = arith.constant 4 : index
    %175 = memref.load %arg3[%c0_62, %c4_63] : memref<2x18xf32, #tpu.memory_space<smem>>
    %176 = vector.broadcast %175 : f32 to vector<8x640xf32>
    %177 = arith.mulf %176, %173 : vector<8x640xf32>
    %178 = arith.addf %167, %177 : vector<8x640xf32>
    %c1_64 = arith.constant 1 : index
    %c4_65 = arith.constant 4 : index
    %179 = memref.load %arg3[%c1_64, %c4_65] : memref<2x18xf32, #tpu.memory_space<smem>>
    %180 = vector.broadcast %179 : f32 to vector<8x640xf32>
    %181 = arith.mulf %180, %173 : vector<8x640xf32>
    %182 = arith.addf %171, %181 : vector<8x640xf32>
    %c0_66 = arith.constant 0 : index
    %c13 = arith.constant 13 : index
    %183 = memref.load %arg3[%c0_66, %c13] : memref<2x18xf32, #tpu.memory_space<smem>>
    %184 = vector.broadcast %183 : f32 to vector<8x640xf32>
    %185 = arith.mulf %184, %174 : vector<8x640xf32>
    %186 = arith.addf %178, %185 : vector<8x640xf32>
    %c1_67 = arith.constant 1 : index
    %c13_68 = arith.constant 13 : index
    %187 = memref.load %arg3[%c1_67, %c13_68] : memref<2x18xf32, #tpu.memory_space<smem>>
    %188 = vector.broadcast %187 : f32 to vector<8x640xf32>
    %189 = arith.mulf %188, %174 : vector<8x640xf32>
    %190 = arith.addf %182, %189 : vector<8x640xf32>
    %c6_i32_69 = arith.constant 6 : i32
    %191 = tpu.dynamic_rotate %91 by %c6_i32_69 dim 1 : vector<16x640xf32>, i32 -> vector<16x640xf32>
    %192 = vector.extract_strided_slice %191 {offsets = [0, 0], sizes = [8, 640], strides = [1, 1]} : vector<16x640xf32> to vector<8x640xf32>
    %193 = vector.extract_strided_slice %191 {offsets = [8, 0], sizes = [8, 640], strides = [1, 1]} : vector<16x640xf32> to vector<8x640xf32>
    %c0_70 = arith.constant 0 : index
    %c5_71 = arith.constant 5 : index
    %194 = memref.load %arg3[%c0_70, %c5_71] : memref<2x18xf32, #tpu.memory_space<smem>>
    %195 = vector.broadcast %194 : f32 to vector<8x640xf32>
    %196 = arith.mulf %195, %192 : vector<8x640xf32>
    %197 = arith.addf %186, %196 : vector<8x640xf32>
    %c1_72 = arith.constant 1 : index
    %c5_73 = arith.constant 5 : index
    %198 = memref.load %arg3[%c1_72, %c5_73] : memref<2x18xf32, #tpu.memory_space<smem>>
    %199 = vector.broadcast %198 : f32 to vector<8x640xf32>
    %200 = arith.mulf %199, %192 : vector<8x640xf32>
    %201 = arith.addf %190, %200 : vector<8x640xf32>
    %c0_74 = arith.constant 0 : index
    %c14 = arith.constant 14 : index
    %202 = memref.load %arg3[%c0_74, %c14] : memref<2x18xf32, #tpu.memory_space<smem>>
    %203 = vector.broadcast %202 : f32 to vector<8x640xf32>
    %204 = arith.mulf %203, %193 : vector<8x640xf32>
    %205 = arith.addf %197, %204 : vector<8x640xf32>
    %c1_75 = arith.constant 1 : index
    %c14_76 = arith.constant 14 : index
    %206 = memref.load %arg3[%c1_75, %c14_76] : memref<2x18xf32, #tpu.memory_space<smem>>
    %207 = vector.broadcast %206 : f32 to vector<8x640xf32>
    %208 = arith.mulf %207, %193 : vector<8x640xf32>
    %209 = arith.addf %201, %208 : vector<8x640xf32>
    %c4_i32_77 = arith.constant 4 : i32
    %210 = tpu.dynamic_rotate %91 by %c4_i32_77 dim 1 : vector<16x640xf32>, i32 -> vector<16x640xf32>
    %211 = vector.extract_strided_slice %210 {offsets = [0, 0], sizes = [8, 640], strides = [1, 1]} : vector<16x640xf32> to vector<8x640xf32>
    %212 = vector.extract_strided_slice %210 {offsets = [8, 0], sizes = [8, 640], strides = [1, 1]} : vector<16x640xf32> to vector<8x640xf32>
    %c0_78 = arith.constant 0 : index
    %c6_79 = arith.constant 6 : index
    %213 = memref.load %arg3[%c0_78, %c6_79] : memref<2x18xf32, #tpu.memory_space<smem>>
    %214 = vector.broadcast %213 : f32 to vector<8x640xf32>
    %215 = arith.mulf %214, %211 : vector<8x640xf32>
    %216 = arith.addf %205, %215 : vector<8x640xf32>
    %c1_80 = arith.constant 1 : index
    %c6_81 = arith.constant 6 : index
    %217 = memref.load %arg3[%c1_80, %c6_81] : memref<2x18xf32, #tpu.memory_space<smem>>
    %218 = vector.broadcast %217 : f32 to vector<8x640xf32>
    %219 = arith.mulf %218, %211 : vector<8x640xf32>
    %220 = arith.addf %209, %219 : vector<8x640xf32>
    %c0_82 = arith.constant 0 : index
    %c15 = arith.constant 15 : index
    %221 = memref.load %arg3[%c0_82, %c15] : memref<2x18xf32, #tpu.memory_space<smem>>
    %222 = vector.broadcast %221 : f32 to vector<8x640xf32>
    %223 = arith.mulf %222, %212 : vector<8x640xf32>
    %224 = arith.addf %216, %223 : vector<8x640xf32>
    %c1_83 = arith.constant 1 : index
    %c15_84 = arith.constant 15 : index
    %225 = memref.load %arg3[%c1_83, %c15_84] : memref<2x18xf32, #tpu.memory_space<smem>>
    %226 = vector.broadcast %225 : f32 to vector<8x640xf32>
    %227 = arith.mulf %226, %212 : vector<8x640xf32>
    %228 = arith.addf %220, %227 : vector<8x640xf32>
    %c2_i32_85 = arith.constant 2 : i32
    %229 = tpu.dynamic_rotate %91 by %c2_i32_85 dim 1 : vector<16x640xf32>, i32 -> vector<16x640xf32>
    %230 = vector.extract_strided_slice %229 {offsets = [0, 0], sizes = [8, 640], strides = [1, 1]} : vector<16x640xf32> to vector<8x640xf32>
    %231 = vector.extract_strided_slice %229 {offsets = [8, 0], sizes = [8, 640], strides = [1, 1]} : vector<16x640xf32> to vector<8x640xf32>
    %c0_86 = arith.constant 0 : index
    %c7_87 = arith.constant 7 : index
    %232 = memref.load %arg3[%c0_86, %c7_87] : memref<2x18xf32, #tpu.memory_space<smem>>
    %233 = vector.broadcast %232 : f32 to vector<8x640xf32>
    %234 = arith.mulf %233, %230 : vector<8x640xf32>
    %235 = arith.addf %224, %234 : vector<8x640xf32>
    %c1_88 = arith.constant 1 : index
    %c7_89 = arith.constant 7 : index
    %236 = memref.load %arg3[%c1_88, %c7_89] : memref<2x18xf32, #tpu.memory_space<smem>>
    %237 = vector.broadcast %236 : f32 to vector<8x640xf32>
    %238 = arith.mulf %237, %230 : vector<8x640xf32>
    %239 = arith.addf %228, %238 : vector<8x640xf32>
    %c0_90 = arith.constant 0 : index
    %c16 = arith.constant 16 : index
    %240 = memref.load %arg3[%c0_90, %c16] : memref<2x18xf32, #tpu.memory_space<smem>>
    %241 = vector.broadcast %240 : f32 to vector<8x640xf32>
    %242 = arith.mulf %241, %231 : vector<8x640xf32>
    %243 = arith.addf %235, %242 : vector<8x640xf32>
    %c1_91 = arith.constant 1 : index
    %c16_92 = arith.constant 16 : index
    %244 = memref.load %arg3[%c1_91, %c16_92] : memref<2x18xf32, #tpu.memory_space<smem>>
    %245 = vector.broadcast %244 : f32 to vector<8x640xf32>
    %246 = arith.mulf %245, %231 : vector<8x640xf32>
    %247 = arith.addf %239, %246 : vector<8x640xf32>
    %248 = vector.extract_strided_slice %91 {offsets = [0, 0], sizes = [8, 640], strides = [1, 1]} : vector<16x640xf32> to vector<8x640xf32>
    %249 = vector.extract_strided_slice %91 {offsets = [8, 0], sizes = [8, 640], strides = [1, 1]} : vector<16x640xf32> to vector<8x640xf32>
    %c0_93 = arith.constant 0 : index
    %c8_94 = arith.constant 8 : index
    %250 = memref.load %arg3[%c0_93, %c8_94] : memref<2x18xf32, #tpu.memory_space<smem>>
    %251 = vector.broadcast %250 : f32 to vector<8x640xf32>
    %252 = arith.mulf %251, %248 : vector<8x640xf32>
    %253 = arith.addf %243, %252 : vector<8x640xf32>
    %c1_95 = arith.constant 1 : index
    %c8_96 = arith.constant 8 : index
    %254 = memref.load %arg3[%c1_95, %c8_96] : memref<2x18xf32, #tpu.memory_space<smem>>
    %255 = vector.broadcast %254 : f32 to vector<8x640xf32>
    %256 = arith.mulf %255, %248 : vector<8x640xf32>
    %257 = arith.addf %247, %256 : vector<8x640xf32>
    %c0_97 = arith.constant 0 : index
    %c17 = arith.constant 17 : index
    %258 = memref.load %arg3[%c0_97, %c17] : memref<2x18xf32, #tpu.memory_space<smem>>
    %259 = vector.broadcast %258 : f32 to vector<8x640xf32>
    %260 = arith.mulf %259, %249 : vector<8x640xf32>
    %261 = arith.addf %253, %260 : vector<8x640xf32>
    %c1_98 = arith.constant 1 : index
    %c17_99 = arith.constant 17 : index
    %262 = memref.load %arg3[%c1_98, %c17_99] : memref<2x18xf32, #tpu.memory_space<smem>>
    %263 = vector.broadcast %262 : f32 to vector<8x640xf32>
    %264 = arith.mulf %263, %249 : vector<8x640xf32>
    %265 = arith.addf %257, %264 : vector<8x640xf32>
    %266 = tpu.concatenate %261, %265 in 0 : vector<8x640xf32>, vector<8x640xf32> -> vector<16x640xf32>
    %267 = math.tanh %266 : vector<16x640xf32>
    %cst_100 = arith.constant 0.000000e+00 : f32
    %268 = vector.broadcast %cst_100 : f32 to vector<16x640xf32>
    %269 = arith.select %2, %267, %268 : vector<16x640xi1>, vector<16x640xf32>
    %c0_101 = arith.constant 0 : index
    %270 = memref.load %arg6[%c0_101] : memref<2xf32, #tpu.memory_space<smem>>
    %271 = vector.broadcast %270 : f32 to vector<8x640xf32>
    %c1_102 = arith.constant 1 : index
    %272 = memref.load %arg6[%c1_102] : memref<2xf32, #tpu.memory_space<smem>>
    %273 = vector.broadcast %272 : f32 to vector<8x640xf32>
    %c32_i32 = arith.constant 32 : i32
    %274 = tpu.dynamic_rotate %269 by %c32_i32 dim 1 : vector<16x640xf32>, i32 -> vector<16x640xf32>
    %275 = vector.extract_strided_slice %274 {offsets = [0, 0], sizes = [8, 640], strides = [1, 1]} : vector<16x640xf32> to vector<8x640xf32>
    %276 = vector.extract_strided_slice %274 {offsets = [8, 0], sizes = [8, 640], strides = [1, 1]} : vector<16x640xf32> to vector<8x640xf32>
    %c0_103 = arith.constant 0 : index
    %c0_104 = arith.constant 0 : index
    %277 = memref.load %arg5[%c0_103, %c0_104] : memref<2x18xf32, #tpu.memory_space<smem>>
    %278 = vector.broadcast %277 : f32 to vector<8x640xf32>
    %279 = arith.mulf %278, %275 : vector<8x640xf32>
    %280 = arith.addf %271, %279 : vector<8x640xf32>
    %c1_105 = arith.constant 1 : index
    %c0_106 = arith.constant 0 : index
    %281 = memref.load %arg5[%c1_105, %c0_106] : memref<2x18xf32, #tpu.memory_space<smem>>
    %282 = vector.broadcast %281 : f32 to vector<8x640xf32>
    %283 = arith.mulf %282, %275 : vector<8x640xf32>
    %284 = arith.addf %273, %283 : vector<8x640xf32>
    %c0_107 = arith.constant 0 : index
    %c9_108 = arith.constant 9 : index
    %285 = memref.load %arg5[%c0_107, %c9_108] : memref<2x18xf32, #tpu.memory_space<smem>>
    %286 = vector.broadcast %285 : f32 to vector<8x640xf32>
    %287 = arith.mulf %286, %276 : vector<8x640xf32>
    %288 = arith.addf %280, %287 : vector<8x640xf32>
    %c1_109 = arith.constant 1 : index
    %c9_110 = arith.constant 9 : index
    %289 = memref.load %arg5[%c1_109, %c9_110] : memref<2x18xf32, #tpu.memory_space<smem>>
    %290 = vector.broadcast %289 : f32 to vector<8x640xf32>
    %291 = arith.mulf %290, %276 : vector<8x640xf32>
    %292 = arith.addf %284, %291 : vector<8x640xf32>
    %c28_i32 = arith.constant 28 : i32
    %293 = tpu.dynamic_rotate %269 by %c28_i32 dim 1 : vector<16x640xf32>, i32 -> vector<16x640xf32>
    %294 = vector.extract_strided_slice %293 {offsets = [0, 0], sizes = [8, 640], strides = [1, 1]} : vector<16x640xf32> to vector<8x640xf32>
    %295 = vector.extract_strided_slice %293 {offsets = [8, 0], sizes = [8, 640], strides = [1, 1]} : vector<16x640xf32> to vector<8x640xf32>
    %c0_111 = arith.constant 0 : index
    %c1_112 = arith.constant 1 : index
    %296 = memref.load %arg5[%c0_111, %c1_112] : memref<2x18xf32, #tpu.memory_space<smem>>
    %297 = vector.broadcast %296 : f32 to vector<8x640xf32>
    %298 = arith.mulf %297, %294 : vector<8x640xf32>
    %299 = arith.addf %288, %298 : vector<8x640xf32>
    %c1_113 = arith.constant 1 : index
    %c1_114 = arith.constant 1 : index
    %300 = memref.load %arg5[%c1_113, %c1_114] : memref<2x18xf32, #tpu.memory_space<smem>>
    %301 = vector.broadcast %300 : f32 to vector<8x640xf32>
    %302 = arith.mulf %301, %294 : vector<8x640xf32>
    %303 = arith.addf %292, %302 : vector<8x640xf32>
    %c0_115 = arith.constant 0 : index
    %c10_116 = arith.constant 10 : index
    %304 = memref.load %arg5[%c0_115, %c10_116] : memref<2x18xf32, #tpu.memory_space<smem>>
    %305 = vector.broadcast %304 : f32 to vector<8x640xf32>
    %306 = arith.mulf %305, %295 : vector<8x640xf32>
    %307 = arith.addf %299, %306 : vector<8x640xf32>
    %c1_117 = arith.constant 1 : index
    %c10_118 = arith.constant 10 : index
    %308 = memref.load %arg5[%c1_117, %c10_118] : memref<2x18xf32, #tpu.memory_space<smem>>
    %309 = vector.broadcast %308 : f32 to vector<8x640xf32>
    %310 = arith.mulf %309, %295 : vector<8x640xf32>
    %311 = arith.addf %303, %310 : vector<8x640xf32>
    %c24_i32 = arith.constant 24 : i32
    %312 = tpu.dynamic_rotate %269 by %c24_i32 dim 1 : vector<16x640xf32>, i32 -> vector<16x640xf32>
    %313 = vector.extract_strided_slice %312 {offsets = [0, 0], sizes = [8, 640], strides = [1, 1]} : vector<16x640xf32> to vector<8x640xf32>
    %314 = vector.extract_strided_slice %312 {offsets = [8, 0], sizes = [8, 640], strides = [1, 1]} : vector<16x640xf32> to vector<8x640xf32>
    %c0_119 = arith.constant 0 : index
    %c2_120 = arith.constant 2 : index
    %315 = memref.load %arg5[%c0_119, %c2_120] : memref<2x18xf32, #tpu.memory_space<smem>>
    %316 = vector.broadcast %315 : f32 to vector<8x640xf32>
    %317 = arith.mulf %316, %313 : vector<8x640xf32>
    %318 = arith.addf %307, %317 : vector<8x640xf32>
    %c1_121 = arith.constant 1 : index
    %c2_122 = arith.constant 2 : index
    %319 = memref.load %arg5[%c1_121, %c2_122] : memref<2x18xf32, #tpu.memory_space<smem>>
    %320 = vector.broadcast %319 : f32 to vector<8x640xf32>
    %321 = arith.mulf %320, %313 : vector<8x640xf32>
    %322 = arith.addf %311, %321 : vector<8x640xf32>
    %c0_123 = arith.constant 0 : index
    %c11_124 = arith.constant 11 : index
    %323 = memref.load %arg5[%c0_123, %c11_124] : memref<2x18xf32, #tpu.memory_space<smem>>
    %324 = vector.broadcast %323 : f32 to vector<8x640xf32>
    %325 = arith.mulf %324, %314 : vector<8x640xf32>
    %326 = arith.addf %318, %325 : vector<8x640xf32>
    %c1_125 = arith.constant 1 : index
    %c11_126 = arith.constant 11 : index
    %327 = memref.load %arg5[%c1_125, %c11_126] : memref<2x18xf32, #tpu.memory_space<smem>>
    %328 = vector.broadcast %327 : f32 to vector<8x640xf32>
    %329 = arith.mulf %328, %314 : vector<8x640xf32>
    %330 = arith.addf %322, %329 : vector<8x640xf32>
    %c20_i32 = arith.constant 20 : i32
    %331 = tpu.dynamic_rotate %269 by %c20_i32 dim 1 : vector<16x640xf32>, i32 -> vector<16x640xf32>
    %332 = vector.extract_strided_slice %331 {offsets = [0, 0], sizes = [8, 640], strides = [1, 1]} : vector<16x640xf32> to vector<8x640xf32>
    %333 = vector.extract_strided_slice %331 {offsets = [8, 0], sizes = [8, 640], strides = [1, 1]} : vector<16x640xf32> to vector<8x640xf32>
    %c0_127 = arith.constant 0 : index
    %c3_128 = arith.constant 3 : index
    %334 = memref.load %arg5[%c0_127, %c3_128] : memref<2x18xf32, #tpu.memory_space<smem>>
    %335 = vector.broadcast %334 : f32 to vector<8x640xf32>
    %336 = arith.mulf %335, %332 : vector<8x640xf32>
    %337 = arith.addf %326, %336 : vector<8x640xf32>
    %c1_129 = arith.constant 1 : index
    %c3_130 = arith.constant 3 : index
    %338 = memref.load %arg5[%c1_129, %c3_130] : memref<2x18xf32, #tpu.memory_space<smem>>
    %339 = vector.broadcast %338 : f32 to vector<8x640xf32>
    %340 = arith.mulf %339, %332 : vector<8x640xf32>
    %341 = arith.addf %330, %340 : vector<8x640xf32>
    %c0_131 = arith.constant 0 : index
    %c12_132 = arith.constant 12 : index
    %342 = memref.load %arg5[%c0_131, %c12_132] : memref<2x18xf32, #tpu.memory_space<smem>>
    %343 = vector.broadcast %342 : f32 to vector<8x640xf32>
    %344 = arith.mulf %343, %333 : vector<8x640xf32>
    %345 = arith.addf %337, %344 : vector<8x640xf32>
    %c1_133 = arith.constant 1 : index
    %c12_134 = arith.constant 12 : index
    %346 = memref.load %arg5[%c1_133, %c12_134] : memref<2x18xf32, #tpu.memory_space<smem>>
    %347 = vector.broadcast %346 : f32 to vector<8x640xf32>
    %348 = arith.mulf %347, %333 : vector<8x640xf32>
    %349 = arith.addf %341, %348 : vector<8x640xf32>
    %c16_i32_135 = arith.constant 16 : i32
    %350 = tpu.dynamic_rotate %269 by %c16_i32_135 dim 1 : vector<16x640xf32>, i32 -> vector<16x640xf32>
    %351 = vector.extract_strided_slice %350 {offsets = [0, 0], sizes = [8, 640], strides = [1, 1]} : vector<16x640xf32> to vector<8x640xf32>
    %352 = vector.extract_strided_slice %350 {offsets = [8, 0], sizes = [8, 640], strides = [1, 1]} : vector<16x640xf32> to vector<8x640xf32>
    %c0_136 = arith.constant 0 : index
    %c4_137 = arith.constant 4 : index
    %353 = memref.load %arg5[%c0_136, %c4_137] : memref<2x18xf32, #tpu.memory_space<smem>>
    %354 = vector.broadcast %353 : f32 to vector<8x640xf32>
    %355 = arith.mulf %354, %351 : vector<8x640xf32>
    %356 = arith.addf %345, %355 : vector<8x640xf32>
    %c1_138 = arith.constant 1 : index
    %c4_139 = arith.constant 4 : index
    %357 = memref.load %arg5[%c1_138, %c4_139] : memref<2x18xf32, #tpu.memory_space<smem>>
    %358 = vector.broadcast %357 : f32 to vector<8x640xf32>
    %359 = arith.mulf %358, %351 : vector<8x640xf32>
    %360 = arith.addf %349, %359 : vector<8x640xf32>
    %c0_140 = arith.constant 0 : index
    %c13_141 = arith.constant 13 : index
    %361 = memref.load %arg5[%c0_140, %c13_141] : memref<2x18xf32, #tpu.memory_space<smem>>
    %362 = vector.broadcast %361 : f32 to vector<8x640xf32>
    %363 = arith.mulf %362, %352 : vector<8x640xf32>
    %364 = arith.addf %356, %363 : vector<8x640xf32>
    %c1_142 = arith.constant 1 : index
    %c13_143 = arith.constant 13 : index
    %365 = memref.load %arg5[%c1_142, %c13_143] : memref<2x18xf32, #tpu.memory_space<smem>>
    %366 = vector.broadcast %365 : f32 to vector<8x640xf32>
    %367 = arith.mulf %366, %352 : vector<8x640xf32>
    %368 = arith.addf %360, %367 : vector<8x640xf32>
    %c12_i32_144 = arith.constant 12 : i32
    %369 = tpu.dynamic_rotate %269 by %c12_i32_144 dim 1 : vector<16x640xf32>, i32 -> vector<16x640xf32>
    %370 = vector.extract_strided_slice %369 {offsets = [0, 0], sizes = [8, 640], strides = [1, 1]} : vector<16x640xf32> to vector<8x640xf32>
    %371 = vector.extract_strided_slice %369 {offsets = [8, 0], sizes = [8, 640], strides = [1, 1]} : vector<16x640xf32> to vector<8x640xf32>
    %c0_145 = arith.constant 0 : index
    %c5_146 = arith.constant 5 : index
    %372 = memref.load %arg5[%c0_145, %c5_146] : memref<2x18xf32, #tpu.memory_space<smem>>
    %373 = vector.broadcast %372 : f32 to vector<8x640xf32>
    %374 = arith.mulf %373, %370 : vector<8x640xf32>
    %375 = arith.addf %364, %374 : vector<8x640xf32>
    %c1_147 = arith.constant 1 : index
    %c5_148 = arith.constant 5 : index
    %376 = memref.load %arg5[%c1_147, %c5_148] : memref<2x18xf32, #tpu.memory_space<smem>>
    %377 = vector.broadcast %376 : f32 to vector<8x640xf32>
    %378 = arith.mulf %377, %370 : vector<8x640xf32>
    %379 = arith.addf %368, %378 : vector<8x640xf32>
    %c0_149 = arith.constant 0 : index
    %c14_150 = arith.constant 14 : index
    %380 = memref.load %arg5[%c0_149, %c14_150] : memref<2x18xf32, #tpu.memory_space<smem>>
    %381 = vector.broadcast %380 : f32 to vector<8x640xf32>
    %382 = arith.mulf %381, %371 : vector<8x640xf32>
    %383 = arith.addf %375, %382 : vector<8x640xf32>
    %c1_151 = arith.constant 1 : index
    %c14_152 = arith.constant 14 : index
    %384 = memref.load %arg5[%c1_151, %c14_152] : memref<2x18xf32, #tpu.memory_space<smem>>
    %385 = vector.broadcast %384 : f32 to vector<8x640xf32>
    %386 = arith.mulf %385, %371 : vector<8x640xf32>
    %387 = arith.addf %379, %386 : vector<8x640xf32>
    %c8_i32_153 = arith.constant 8 : i32
    %388 = tpu.dynamic_rotate %269 by %c8_i32_153 dim 1 : vector<16x640xf32>, i32 -> vector<16x640xf32>
    %389 = vector.extract_strided_slice %388 {offsets = [0, 0], sizes = [8, 640], strides = [1, 1]} : vector<16x640xf32> to vector<8x640xf32>
    %390 = vector.extract_strided_slice %388 {offsets = [8, 0], sizes = [8, 640], strides = [1, 1]} : vector<16x640xf32> to vector<8x640xf32>
    %c0_154 = arith.constant 0 : index
    %c6_155 = arith.constant 6 : index
    %391 = memref.load %arg5[%c0_154, %c6_155] : memref<2x18xf32, #tpu.memory_space<smem>>
    %392 = vector.broadcast %391 : f32 to vector<8x640xf32>
    %393 = arith.mulf %392, %389 : vector<8x640xf32>
    %394 = arith.addf %383, %393 : vector<8x640xf32>
    %c1_156 = arith.constant 1 : index
    %c6_157 = arith.constant 6 : index
    %395 = memref.load %arg5[%c1_156, %c6_157] : memref<2x18xf32, #tpu.memory_space<smem>>
    %396 = vector.broadcast %395 : f32 to vector<8x640xf32>
    %397 = arith.mulf %396, %389 : vector<8x640xf32>
    %398 = arith.addf %387, %397 : vector<8x640xf32>
    %c0_158 = arith.constant 0 : index
    %c15_159 = arith.constant 15 : index
    %399 = memref.load %arg5[%c0_158, %c15_159] : memref<2x18xf32, #tpu.memory_space<smem>>
    %400 = vector.broadcast %399 : f32 to vector<8x640xf32>
    %401 = arith.mulf %400, %390 : vector<8x640xf32>
    %402 = arith.addf %394, %401 : vector<8x640xf32>
    %c1_160 = arith.constant 1 : index
    %c15_161 = arith.constant 15 : index
    %403 = memref.load %arg5[%c1_160, %c15_161] : memref<2x18xf32, #tpu.memory_space<smem>>
    %404 = vector.broadcast %403 : f32 to vector<8x640xf32>
    %405 = arith.mulf %404, %390 : vector<8x640xf32>
    %406 = arith.addf %398, %405 : vector<8x640xf32>
    %c4_i32_162 = arith.constant 4 : i32
    %407 = tpu.dynamic_rotate %269 by %c4_i32_162 dim 1 : vector<16x640xf32>, i32 -> vector<16x640xf32>
    %408 = vector.extract_strided_slice %407 {offsets = [0, 0], sizes = [8, 640], strides = [1, 1]} : vector<16x640xf32> to vector<8x640xf32>
    %409 = vector.extract_strided_slice %407 {offsets = [8, 0], sizes = [8, 640], strides = [1, 1]} : vector<16x640xf32> to vector<8x640xf32>
    %c0_163 = arith.constant 0 : index
    %c7_164 = arith.constant 7 : index
    %410 = memref.load %arg5[%c0_163, %c7_164] : memref<2x18xf32, #tpu.memory_space<smem>>
    %411 = vector.broadcast %410 : f32 to vector<8x640xf32>
    %412 = arith.mulf %411, %408 : vector<8x640xf32>
    %413 = arith.addf %402, %412 : vector<8x640xf32>
    %c1_165 = arith.constant 1 : index
    %c7_166 = arith.constant 7 : index
    %414 = memref.load %arg5[%c1_165, %c7_166] : memref<2x18xf32, #tpu.memory_space<smem>>
    %415 = vector.broadcast %414 : f32 to vector<8x640xf32>
    %416 = arith.mulf %415, %408 : vector<8x640xf32>
    %417 = arith.addf %406, %416 : vector<8x640xf32>
    %c0_167 = arith.constant 0 : index
    %c16_168 = arith.constant 16 : index
    %418 = memref.load %arg5[%c0_167, %c16_168] : memref<2x18xf32, #tpu.memory_space<smem>>
    %419 = vector.broadcast %418 : f32 to vector<8x640xf32>
    %420 = arith.mulf %419, %409 : vector<8x640xf32>
    %421 = arith.addf %413, %420 : vector<8x640xf32>
    %c1_169 = arith.constant 1 : index
    %c16_170 = arith.constant 16 : index
    %422 = memref.load %arg5[%c1_169, %c16_170] : memref<2x18xf32, #tpu.memory_space<smem>>
    %423 = vector.broadcast %422 : f32 to vector<8x640xf32>
    %424 = arith.mulf %423, %409 : vector<8x640xf32>
    %425 = arith.addf %417, %424 : vector<8x640xf32>
    %426 = vector.extract_strided_slice %269 {offsets = [0, 0], sizes = [8, 640], strides = [1, 1]} : vector<16x640xf32> to vector<8x640xf32>
    %427 = vector.extract_strided_slice %269 {offsets = [8, 0], sizes = [8, 640], strides = [1, 1]} : vector<16x640xf32> to vector<8x640xf32>
    %c0_171 = arith.constant 0 : index
    %c8_172 = arith.constant 8 : index
    %428 = memref.load %arg5[%c0_171, %c8_172] : memref<2x18xf32, #tpu.memory_space<smem>>
    %429 = vector.broadcast %428 : f32 to vector<8x640xf32>
    %430 = arith.mulf %429, %426 : vector<8x640xf32>
    %431 = arith.addf %421, %430 : vector<8x640xf32>
    %c1_173 = arith.constant 1 : index
    %c8_174 = arith.constant 8 : index
    %432 = memref.load %arg5[%c1_173, %c8_174] : memref<2x18xf32, #tpu.memory_space<smem>>
    %433 = vector.broadcast %432 : f32 to vector<8x640xf32>
    %434 = arith.mulf %433, %426 : vector<8x640xf32>
    %435 = arith.addf %425, %434 : vector<8x640xf32>
    %c0_175 = arith.constant 0 : index
    %c17_176 = arith.constant 17 : index
    %436 = memref.load %arg5[%c0_175, %c17_176] : memref<2x18xf32, #tpu.memory_space<smem>>
    %437 = vector.broadcast %436 : f32 to vector<8x640xf32>
    %438 = arith.mulf %437, %427 : vector<8x640xf32>
    %439 = arith.addf %431, %438 : vector<8x640xf32>
    %c1_177 = arith.constant 1 : index
    %c17_178 = arith.constant 17 : index
    %440 = memref.load %arg5[%c1_177, %c17_178] : memref<2x18xf32, #tpu.memory_space<smem>>
    %441 = vector.broadcast %440 : f32 to vector<8x640xf32>
    %442 = arith.mulf %441, %427 : vector<8x640xf32>
    %443 = arith.addf %435, %442 : vector<8x640xf32>
    %444 = tpu.concatenate %439, %443 in 0 : vector<8x640xf32>, vector<8x640xf32> -> vector<16x640xf32>
    %445 = math.tanh %444 : vector<16x640xf32>
    %cst_179 = arith.constant 0.000000e+00 : f32
    %446 = vector.broadcast %cst_179 : f32 to vector<16x640xf32>
    %447 = arith.select %2, %445, %446 : vector<16x640xi1>, vector<16x640xf32>
    %c0_180 = arith.constant 0 : index
    %448 = memref.load %arg8[%c0_180] : memref<2xf32, #tpu.memory_space<smem>>
    %449 = vector.broadcast %448 : f32 to vector<8x640xf32>
    %c1_181 = arith.constant 1 : index
    %450 = memref.load %arg8[%c1_181] : memref<2xf32, #tpu.memory_space<smem>>
    %451 = vector.broadcast %450 : f32 to vector<8x640xf32>
    %c64_i32 = arith.constant 64 : i32
    %452 = tpu.dynamic_rotate %447 by %c64_i32 dim 1 : vector<16x640xf32>, i32 -> vector<16x640xf32>
    %453 = vector.extract_strided_slice %452 {offsets = [0, 0], sizes = [8, 640], strides = [1, 1]} : vector<16x640xf32> to vector<8x640xf32>
    %454 = vector.extract_strided_slice %452 {offsets = [8, 0], sizes = [8, 640], strides = [1, 1]} : vector<16x640xf32> to vector<8x640xf32>
    %c0_182 = arith.constant 0 : index
    %c0_183 = arith.constant 0 : index
    %455 = memref.load %arg7[%c0_182, %c0_183] : memref<2x18xf32, #tpu.memory_space<smem>>
    %456 = vector.broadcast %455 : f32 to vector<8x640xf32>
    %457 = arith.mulf %456, %453 : vector<8x640xf32>
    %458 = arith.addf %449, %457 : vector<8x640xf32>
    %c1_184 = arith.constant 1 : index
    %c0_185 = arith.constant 0 : index
    %459 = memref.load %arg7[%c1_184, %c0_185] : memref<2x18xf32, #tpu.memory_space<smem>>
    %460 = vector.broadcast %459 : f32 to vector<8x640xf32>
    %461 = arith.mulf %460, %453 : vector<8x640xf32>
    %462 = arith.addf %451, %461 : vector<8x640xf32>
    %c0_186 = arith.constant 0 : index
    %c9_187 = arith.constant 9 : index
    %463 = memref.load %arg7[%c0_186, %c9_187] : memref<2x18xf32, #tpu.memory_space<smem>>
    %464 = vector.broadcast %463 : f32 to vector<8x640xf32>
    %465 = arith.mulf %464, %454 : vector<8x640xf32>
    %466 = arith.addf %458, %465 : vector<8x640xf32>
    %c1_188 = arith.constant 1 : index
    %c9_189 = arith.constant 9 : index
    %467 = memref.load %arg7[%c1_188, %c9_189] : memref<2x18xf32, #tpu.memory_space<smem>>
    %468 = vector.broadcast %467 : f32 to vector<8x640xf32>
    %469 = arith.mulf %468, %454 : vector<8x640xf32>
    %470 = arith.addf %462, %469 : vector<8x640xf32>
    %c56_i32 = arith.constant 56 : i32
    %471 = tpu.dynamic_rotate %447 by %c56_i32 dim 1 : vector<16x640xf32>, i32 -> vector<16x640xf32>
    %472 = vector.extract_strided_slice %471 {offsets = [0, 0], sizes = [8, 640], strides = [1, 1]} : vector<16x640xf32> to vector<8x640xf32>
    %473 = vector.extract_strided_slice %471 {offsets = [8, 0], sizes = [8, 640], strides = [1, 1]} : vector<16x640xf32> to vector<8x640xf32>
    %c0_190 = arith.constant 0 : index
    %c1_191 = arith.constant 1 : index
    %474 = memref.load %arg7[%c0_190, %c1_191] : memref<2x18xf32, #tpu.memory_space<smem>>
    %475 = vector.broadcast %474 : f32 to vector<8x640xf32>
    %476 = arith.mulf %475, %472 : vector<8x640xf32>
    %477 = arith.addf %466, %476 : vector<8x640xf32>
    %c1_192 = arith.constant 1 : index
    %c1_193 = arith.constant 1 : index
    %478 = memref.load %arg7[%c1_192, %c1_193] : memref<2x18xf32, #tpu.memory_space<smem>>
    %479 = vector.broadcast %478 : f32 to vector<8x640xf32>
    %480 = arith.mulf %479, %472 : vector<8x640xf32>
    %481 = arith.addf %470, %480 : vector<8x640xf32>
    %c0_194 = arith.constant 0 : index
    %c10_195 = arith.constant 10 : index
    %482 = memref.load %arg7[%c0_194, %c10_195] : memref<2x18xf32, #tpu.memory_space<smem>>
    %483 = vector.broadcast %482 : f32 to vector<8x640xf32>
    %484 = arith.mulf %483, %473 : vector<8x640xf32>
    %485 = arith.addf %477, %484 : vector<8x640xf32>
    %c1_196 = arith.constant 1 : index
    %c10_197 = arith.constant 10 : index
    %486 = memref.load %arg7[%c1_196, %c10_197] : memref<2x18xf32, #tpu.memory_space<smem>>
    %487 = vector.broadcast %486 : f32 to vector<8x640xf32>
    %488 = arith.mulf %487, %473 : vector<8x640xf32>
    %489 = arith.addf %481, %488 : vector<8x640xf32>
    %c48_i32 = arith.constant 48 : i32
    %490 = tpu.dynamic_rotate %447 by %c48_i32 dim 1 : vector<16x640xf32>, i32 -> vector<16x640xf32>
    %491 = vector.extract_strided_slice %490 {offsets = [0, 0], sizes = [8, 640], strides = [1, 1]} : vector<16x640xf32> to vector<8x640xf32>
    %492 = vector.extract_strided_slice %490 {offsets = [8, 0], sizes = [8, 640], strides = [1, 1]} : vector<16x640xf32> to vector<8x640xf32>
    %c0_198 = arith.constant 0 : index
    %c2_199 = arith.constant 2 : index
    %493 = memref.load %arg7[%c0_198, %c2_199] : memref<2x18xf32, #tpu.memory_space<smem>>
    %494 = vector.broadcast %493 : f32 to vector<8x640xf32>
    %495 = arith.mulf %494, %491 : vector<8x640xf32>
    %496 = arith.addf %485, %495 : vector<8x640xf32>
    %c1_200 = arith.constant 1 : index
    %c2_201 = arith.constant 2 : index
    %497 = memref.load %arg7[%c1_200, %c2_201] : memref<2x18xf32, #tpu.memory_space<smem>>
    %498 = vector.broadcast %497 : f32 to vector<8x640xf32>
    %499 = arith.mulf %498, %491 : vector<8x640xf32>
    %500 = arith.addf %489, %499 : vector<8x640xf32>
    %c0_202 = arith.constant 0 : index
    %c11_203 = arith.constant 11 : index
    %501 = memref.load %arg7[%c0_202, %c11_203] : memref<2x18xf32, #tpu.memory_space<smem>>
    %502 = vector.broadcast %501 : f32 to vector<8x640xf32>
    %503 = arith.mulf %502, %492 : vector<8x640xf32>
    %504 = arith.addf %496, %503 : vector<8x640xf32>
    %c1_204 = arith.constant 1 : index
    %c11_205 = arith.constant 11 : index
    %505 = memref.load %arg7[%c1_204, %c11_205] : memref<2x18xf32, #tpu.memory_space<smem>>
    %506 = vector.broadcast %505 : f32 to vector<8x640xf32>
    %507 = arith.mulf %506, %492 : vector<8x640xf32>
    %508 = arith.addf %500, %507 : vector<8x640xf32>
    %c40_i32 = arith.constant 40 : i32
    %509 = tpu.dynamic_rotate %447 by %c40_i32 dim 1 : vector<16x640xf32>, i32 -> vector<16x640xf32>
    %510 = vector.extract_strided_slice %509 {offsets = [0, 0], sizes = [8, 640], strides = [1, 1]} : vector<16x640xf32> to vector<8x640xf32>
    %511 = vector.extract_strided_slice %509 {offsets = [8, 0], sizes = [8, 640], strides = [1, 1]} : vector<16x640xf32> to vector<8x640xf32>
    %c0_206 = arith.constant 0 : index
    %c3_207 = arith.constant 3 : index
    %512 = memref.load %arg7[%c0_206, %c3_207] : memref<2x18xf32, #tpu.memory_space<smem>>
    %513 = vector.broadcast %512 : f32 to vector<8x640xf32>
    %514 = arith.mulf %513, %510 : vector<8x640xf32>
    %515 = arith.addf %504, %514 : vector<8x640xf32>
    %c1_208 = arith.constant 1 : index
    %c3_209 = arith.constant 3 : index
    %516 = memref.load %arg7[%c1_208, %c3_209] : memref<2x18xf32, #tpu.memory_space<smem>>
    %517 = vector.broadcast %516 : f32 to vector<8x640xf32>
    %518 = arith.mulf %517, %510 : vector<8x640xf32>
    %519 = arith.addf %508, %518 : vector<8x640xf32>
    %c0_210 = arith.constant 0 : index
    %c12_211 = arith.constant 12 : index
    %520 = memref.load %arg7[%c0_210, %c12_211] : memref<2x18xf32, #tpu.memory_space<smem>>
    %521 = vector.broadcast %520 : f32 to vector<8x640xf32>
    %522 = arith.mulf %521, %511 : vector<8x640xf32>
    %523 = arith.addf %515, %522 : vector<8x640xf32>
    %c1_212 = arith.constant 1 : index
    %c12_213 = arith.constant 12 : index
    %524 = memref.load %arg7[%c1_212, %c12_213] : memref<2x18xf32, #tpu.memory_space<smem>>
    %525 = vector.broadcast %524 : f32 to vector<8x640xf32>
    %526 = arith.mulf %525, %511 : vector<8x640xf32>
    %527 = arith.addf %519, %526 : vector<8x640xf32>
    %c32_i32_214 = arith.constant 32 : i32
    %528 = tpu.dynamic_rotate %447 by %c32_i32_214 dim 1 : vector<16x640xf32>, i32 -> vector<16x640xf32>
    %529 = vector.extract_strided_slice %528 {offsets = [0, 0], sizes = [8, 640], strides = [1, 1]} : vector<16x640xf32> to vector<8x640xf32>
    %530 = vector.extract_strided_slice %528 {offsets = [8, 0], sizes = [8, 640], strides = [1, 1]} : vector<16x640xf32> to vector<8x640xf32>
    %c0_215 = arith.constant 0 : index
    %c4_216 = arith.constant 4 : index
    %531 = memref.load %arg7[%c0_215, %c4_216] : memref<2x18xf32, #tpu.memory_space<smem>>
    %532 = vector.broadcast %531 : f32 to vector<8x640xf32>
    %533 = arith.mulf %532, %529 : vector<8x640xf32>
    %534 = arith.addf %523, %533 : vector<8x640xf32>
    %c1_217 = arith.constant 1 : index
    %c4_218 = arith.constant 4 : index
    %535 = memref.load %arg7[%c1_217, %c4_218] : memref<2x18xf32, #tpu.memory_space<smem>>
    %536 = vector.broadcast %535 : f32 to vector<8x640xf32>
    %537 = arith.mulf %536, %529 : vector<8x640xf32>
    %538 = arith.addf %527, %537 : vector<8x640xf32>
    %c0_219 = arith.constant 0 : index
    %c13_220 = arith.constant 13 : index
    %539 = memref.load %arg7[%c0_219, %c13_220] : memref<2x18xf32, #tpu.memory_space<smem>>
    %540 = vector.broadcast %539 : f32 to vector<8x640xf32>
    %541 = arith.mulf %540, %530 : vector<8x640xf32>
    %542 = arith.addf %534, %541 : vector<8x640xf32>
    %c1_221 = arith.constant 1 : index
    %c13_222 = arith.constant 13 : index
    %543 = memref.load %arg7[%c1_221, %c13_222] : memref<2x18xf32, #tpu.memory_space<smem>>
    %544 = vector.broadcast %543 : f32 to vector<8x640xf32>
    %545 = arith.mulf %544, %530 : vector<8x640xf32>
    %546 = arith.addf %538, %545 : vector<8x640xf32>
    %c24_i32_223 = arith.constant 24 : i32
    %547 = tpu.dynamic_rotate %447 by %c24_i32_223 dim 1 : vector<16x640xf32>, i32 -> vector<16x640xf32>
    %548 = vector.extract_strided_slice %547 {offsets = [0, 0], sizes = [8, 640], strides = [1, 1]} : vector<16x640xf32> to vector<8x640xf32>
    %549 = vector.extract_strided_slice %547 {offsets = [8, 0], sizes = [8, 640], strides = [1, 1]} : vector<16x640xf32> to vector<8x640xf32>
    %c0_224 = arith.constant 0 : index
    %c5_225 = arith.constant 5 : index
    %550 = memref.load %arg7[%c0_224, %c5_225] : memref<2x18xf32, #tpu.memory_space<smem>>
    %551 = vector.broadcast %550 : f32 to vector<8x640xf32>
    %552 = arith.mulf %551, %548 : vector<8x640xf32>
    %553 = arith.addf %542, %552 : vector<8x640xf32>
    %c1_226 = arith.constant 1 : index
    %c5_227 = arith.constant 5 : index
    %554 = memref.load %arg7[%c1_226, %c5_227] : memref<2x18xf32, #tpu.memory_space<smem>>
    %555 = vector.broadcast %554 : f32 to vector<8x640xf32>
    %556 = arith.mulf %555, %548 : vector<8x640xf32>
    %557 = arith.addf %546, %556 : vector<8x640xf32>
    %c0_228 = arith.constant 0 : index
    %c14_229 = arith.constant 14 : index
    %558 = memref.load %arg7[%c0_228, %c14_229] : memref<2x18xf32, #tpu.memory_space<smem>>
    %559 = vector.broadcast %558 : f32 to vector<8x640xf32>
    %560 = arith.mulf %559, %549 : vector<8x640xf32>
    %561 = arith.addf %553, %560 : vector<8x640xf32>
    %c1_230 = arith.constant 1 : index
    %c14_231 = arith.constant 14 : index
    %562 = memref.load %arg7[%c1_230, %c14_231] : memref<2x18xf32, #tpu.memory_space<smem>>
    %563 = vector.broadcast %562 : f32 to vector<8x640xf32>
    %564 = arith.mulf %563, %549 : vector<8x640xf32>
    %565 = arith.addf %557, %564 : vector<8x640xf32>
    %c16_i32_232 = arith.constant 16 : i32
    %566 = tpu.dynamic_rotate %447 by %c16_i32_232 dim 1 : vector<16x640xf32>, i32 -> vector<16x640xf32>
    %567 = vector.extract_strided_slice %566 {offsets = [0, 0], sizes = [8, 640], strides = [1, 1]} : vector<16x640xf32> to vector<8x640xf32>
    %568 = vector.extract_strided_slice %566 {offsets = [8, 0], sizes = [8, 640], strides = [1, 1]} : vector<16x640xf32> to vector<8x640xf32>
    %c0_233 = arith.constant 0 : index
    %c6_234 = arith.constant 6 : index
    %569 = memref.load %arg7[%c0_233, %c6_234] : memref<2x18xf32, #tpu.memory_space<smem>>
    %570 = vector.broadcast %569 : f32 to vector<8x640xf32>
    %571 = arith.mulf %570, %567 : vector<8x640xf32>
    %572 = arith.addf %561, %571 : vector<8x640xf32>
    %c1_235 = arith.constant 1 : index
    %c6_236 = arith.constant 6 : index
    %573 = memref.load %arg7[%c1_235, %c6_236] : memref<2x18xf32, #tpu.memory_space<smem>>
    %574 = vector.broadcast %573 : f32 to vector<8x640xf32>
    %575 = arith.mulf %574, %567 : vector<8x640xf32>
    %576 = arith.addf %565, %575 : vector<8x640xf32>
    %c0_237 = arith.constant 0 : index
    %c15_238 = arith.constant 15 : index
    %577 = memref.load %arg7[%c0_237, %c15_238] : memref<2x18xf32, #tpu.memory_space<smem>>
    %578 = vector.broadcast %577 : f32 to vector<8x640xf32>
    %579 = arith.mulf %578, %568 : vector<8x640xf32>
    %580 = arith.addf %572, %579 : vector<8x640xf32>
    %c1_239 = arith.constant 1 : index
    %c15_240 = arith.constant 15 : index
    %581 = memref.load %arg7[%c1_239, %c15_240] : memref<2x18xf32, #tpu.memory_space<smem>>
    %582 = vector.broadcast %581 : f32 to vector<8x640xf32>
    %583 = arith.mulf %582, %568 : vector<8x640xf32>
    %584 = arith.addf %576, %583 : vector<8x640xf32>
    %c8_i32_241 = arith.constant 8 : i32
    %585 = tpu.dynamic_rotate %447 by %c8_i32_241 dim 1 : vector<16x640xf32>, i32 -> vector<16x640xf32>
    %586 = vector.extract_strided_slice %585 {offsets = [0, 0], sizes = [8, 640], strides = [1, 1]} : vector<16x640xf32> to vector<8x640xf32>
    %587 = vector.extract_strided_slice %585 {offsets = [8, 0], sizes = [8, 640], strides = [1, 1]} : vector<16x640xf32> to vector<8x640xf32>
    %c0_242 = arith.constant 0 : index
    %c7_243 = arith.constant 7 : index
    %588 = memref.load %arg7[%c0_242, %c7_243] : memref<2x18xf32, #tpu.memory_space<smem>>
    %589 = vector.broadcast %588 : f32 to vector<8x640xf32>
    %590 = arith.mulf %589, %586 : vector<8x640xf32>
    %591 = arith.addf %580, %590 : vector<8x640xf32>
    %c1_244 = arith.constant 1 : index
    %c7_245 = arith.constant 7 : index
    %592 = memref.load %arg7[%c1_244, %c7_245] : memref<2x18xf32, #tpu.memory_space<smem>>
    %593 = vector.broadcast %592 : f32 to vector<8x640xf32>
    %594 = arith.mulf %593, %586 : vector<8x640xf32>
    %595 = arith.addf %584, %594 : vector<8x640xf32>
    %c0_246 = arith.constant 0 : index
    %c16_247 = arith.constant 16 : index
    %596 = memref.load %arg7[%c0_246, %c16_247] : memref<2x18xf32, #tpu.memory_space<smem>>
    %597 = vector.broadcast %596 : f32 to vector<8x640xf32>
    %598 = arith.mulf %597, %587 : vector<8x640xf32>
    %599 = arith.addf %591, %598 : vector<8x640xf32>
    %c1_248 = arith.constant 1 : index
    %c16_249 = arith.constant 16 : index
    %600 = memref.load %arg7[%c1_248, %c16_249] : memref<2x18xf32, #tpu.memory_space<smem>>
    %601 = vector.broadcast %600 : f32 to vector<8x640xf32>
    %602 = arith.mulf %601, %587 : vector<8x640xf32>
    %603 = arith.addf %595, %602 : vector<8x640xf32>
    %604 = vector.extract_strided_slice %447 {offsets = [0, 0], sizes = [8, 640], strides = [1, 1]} : vector<16x640xf32> to vector<8x640xf32>
    %605 = vector.extract_strided_slice %447 {offsets = [8, 0], sizes = [8, 640], strides = [1, 1]} : vector<16x640xf32> to vector<8x640xf32>
    %c0_250 = arith.constant 0 : index
    %c8_251 = arith.constant 8 : index
    %606 = memref.load %arg7[%c0_250, %c8_251] : memref<2x18xf32, #tpu.memory_space<smem>>
    %607 = vector.broadcast %606 : f32 to vector<8x640xf32>
    %608 = arith.mulf %607, %604 : vector<8x640xf32>
    %609 = arith.addf %599, %608 : vector<8x640xf32>
    %c1_252 = arith.constant 1 : index
    %c8_253 = arith.constant 8 : index
    %610 = memref.load %arg7[%c1_252, %c8_253] : memref<2x18xf32, #tpu.memory_space<smem>>
    %611 = vector.broadcast %610 : f32 to vector<8x640xf32>
    %612 = arith.mulf %611, %604 : vector<8x640xf32>
    %613 = arith.addf %603, %612 : vector<8x640xf32>
    %c0_254 = arith.constant 0 : index
    %c17_255 = arith.constant 17 : index
    %614 = memref.load %arg7[%c0_254, %c17_255] : memref<2x18xf32, #tpu.memory_space<smem>>
    %615 = vector.broadcast %614 : f32 to vector<8x640xf32>
    %616 = arith.mulf %615, %605 : vector<8x640xf32>
    %617 = arith.addf %609, %616 : vector<8x640xf32>
    %c1_256 = arith.constant 1 : index
    %c17_257 = arith.constant 17 : index
    %618 = memref.load %arg7[%c1_256, %c17_257] : memref<2x18xf32, #tpu.memory_space<smem>>
    %619 = vector.broadcast %618 : f32 to vector<8x640xf32>
    %620 = arith.mulf %619, %605 : vector<8x640xf32>
    %621 = arith.addf %613, %620 : vector<8x640xf32>
    %622 = arith.addf %617, %83 : vector<8x640xf32>
    %c0_258 = arith.constant 0 : index
    %c0_259 = arith.constant 0 : index
    %623 = vector.load %arg10[%c0_258, %c0_259] : memref<8x640xf32, #tpu.memory_space<vmem>>, vector<8x640xf32>
    tpu.vector_store %arg10[%c0_258, %c0_259], %622 {strides = array<i32>} : memref<8x640xf32, #tpu.memory_space<vmem>>, vector<8x640xf32>,
    %624 = arith.addf %621, %87 : vector<8x640xf32>
    %cst_260 = arith.constant 5.000000e-01 : f32
    %625 = vector.broadcast %cst_260 : f32 to vector<8x640xf32>
    %626 = arith.mulf %625, %624 : vector<8x640xf32>
    %627 = math.exp %626 : vector<8x640xf32>
    %c0_261 = arith.constant 0 : index
    %c0_262 = arith.constant 0 : index
    %628 = vector.load %arg11[%c0_261, %c0_262] : memref<8x640xf32, #tpu.memory_space<vmem>>, vector<8x640xf32>
    tpu.vector_store %arg11[%c0_261, %c0_262], %627 {strides = array<i32>} : memref<8x640xf32, #tpu.memory_space<vmem>>, vector<8x640xf32>,
    return
  }
  func.func @transform_0(%arg0: i32) -> (i32, i32) {
    %c0_i32 = arith.constant 0 : i32
    %c0_i32_0 = arith.constant 0 : i32
    %c0_i32_1 = arith.constant 0 : i32
    return %c0_i32, %c0_i32_0 : i32, i32
  }
  func.func @transform_1(%arg0: i32) -> i32 {
    %c0_i32 = arith.constant 0 : i32
    %c0_i32_0 = arith.constant 0 : i32
    return %c0_i32 : i32
  }
  func.func @transform_2(%arg0: i32) -> (i32, i32) {
    %c0_i32 = arith.constant 0 : i32
    %c0_i32_0 = arith.constant 0 : i32
    %c0_i32_1 = arith.constant 0 : i32
    return %c0_i32, %c0_i32_0 : i32, i32
  }
  func.func @transform_3(%arg0: i32) -> i32 {
    %c0_i32 = arith.constant 0 : i32
    %c0_i32_0 = arith.constant 0 : i32
    return %c0_i32 : i32
  }
  func.func @transform_4(%arg0: i32) -> (i32, i32) {
    %c0_i32 = arith.constant 0 : i32
    %c0_i32_0 = arith.constant 0 : i32
    %c0_i32_1 = arith.constant 0 : i32
    return %c0_i32, %c0_i32_0 : i32, i32
  }
  func.func @transform_5(%arg0: i32) -> i32 {
    %c0_i32 = arith.constant 0 : i32
    %c0_i32_0 = arith.constant 0 : i32
    return %c0_i32 : i32
  }
  func.func @transform_6(%arg0: i32) -> (i32, i32) {
    %c0_i32 = arith.constant 0 : i32
    %c0_i32_0 = arith.constant 0 : i32
    %c0_i32_1 = arith.constant 0 : i32
    return %c0_i32, %c0_i32_0 : i32, i32
  }
  func.func @transform_7(%arg0: i32) -> i32 {
    %c0_i32 = arith.constant 0 : i32
    %c0_i32_0 = arith.constant 0 : i32
    return %c0_i32 : i32
  }
  func.func @transform_8(%arg0: i32) -> (i32, i32) {
    %c0_i32 = arith.constant 0 : i32
    %c0_i32_0 = arith.constant 0 : i32
    return %arg0, %c0_i32 : i32, i32
  }
  func.func @transform_9(%arg0: i32) -> (i32, i32) {
    %c0_i32 = arith.constant 0 : i32
    %c0_i32_0 = arith.constant 0 : i32
    return %arg0, %c0_i32 : i32, i32
  }
  func.func @transform_10(%arg0: i32) -> (i32, i32) {
    %c0_i32 = arith.constant 0 : i32
    %c0_i32_0 = arith.constant 0 : i32
    return %arg0, %c0_i32 : i32, i32
  }
}

</mosaic_0001>

<bundles_post_ra>
// kernel: tpu_custom_call.1
= control target key start
LH: loop header
LB: loop body
LE: loop exit
PB: predicated region body
PF: predicated region fallthrough
CT: control target
= control target key end

     0   :  { %s7592_s0 = inlined_call_operand.hbm [shape: f32[2,9], index: 0, kind: input, shape index: {}]   ;;  %s7593_s1 = inlined_call_operand.vmem [shape: f32[2], index: 1, kind: input, shape index: {}]   ;;  %s7594_s2 = inlined_call_operand.vmem [shape: f32[2,18], index: 2, kind: input, shape index: {}]   ;;  %s7595_s3 = inlined_call_operand.vmem [shape: f32[2], index: 3, kind: input, shape index: {}]   ;;  %s7596_s4 = inlined_call_operand.vmem [shape: f32[2,18], index: 4, kind: input, shape index: {}]   ;;  %s7597_s5 = inlined_call_operand.vmem [shape: f32[2], index: 5, kind: input, shape index: {}]   ;;  %s7598_s6 = inlined_call_operand.vmem [shape: f32[2,18], index: 6, kind: input, shape index: {}]   ;;  %s7599_s7 = inlined_call_operand.vmem [shape: f32[2], index: 7, kind: input, shape index: {}]   ;;  %s7600_s8 = inlined_call_operand.hbm [shape: f32[16,640], index: 8, kind: input, shape index: {}]   ;;  %s7601_s9 = inlined_call_operand.hbm [shape: f32[16,640], index: 9, kind: output, shape index: {0}]   ;;  %s7602_s10 = inlined_call_operand.hbm [shape: f32[16,640], index: 10, kind: output, shape index: {1}]  }
   0x1   :  { %7823 = sst [smem:[#allocation111_spill]] %s7592_s0 }
   0x2   :  { %7824 = sst [smem:[#allocation112_spill]] %s7593_s1 }
   0x3   :  { %7825 = sst [smem:[#allocation113_spill]] %s7594_s2 }
   0x4   :  { %7826 = sst [smem:[#allocation114_spill]] %s7595_s3 }
   0x5   :  { %7827 = sst [smem:[#allocation115_spill]] %s7596_s4 }
   0x6   :  { %7828 = sst [smem:[#allocation116_spill]] %s7597_s5 }
   0x7   :  { %7829 = sst [smem:[#allocation117_spill]] %s7598_s6 }
   0x8   :  { %7830 = sst [smem:[#allocation118_spill]] %s7599_s7 }
   0x9   :  { %7831 = sst [smem:[#allocation119_spill]] %s7600_s8 }
   0xa   :  { %7832 = sst [smem:[#allocation120_spill]] %s7601_s9 }
   0xb   :  { %7833 = sst [smem:[#allocation121_spill]] %s7602_s10 }
   0xc   :  { %16 = vsyncpa [#allocation5], 0 }
   0xd   :  { %17 = vsyncpa [#allocation6], 0 }
   0xe   :  { %18 = vsyncpa [#allocation9], 0 }
   0xf   :  { %19 = vsyncpa [#allocation12], 0 }
  0x10   :  { %20 = vsyncpa [#allocation15], 0 }
  0x11   :  { %21 = vsyncpa [#allocation3], 0 }
  0x12   :  { %23 = vsyncpa [#allocation3 + $0x1], 0 }
  0x13   :  { %24 = vsyncpa [#allocation4], 0 }
  0x14   :  { %26 = vsyncpa [#allocation4 + $0x1], 0 }
  0x15   :  { %27 = vsyncpa [#allocation20], 0 }
  0x16   :  { %29 = vsyncpa [#allocation20 + $0x1], 0  ;;  %s4040_s13 = smov 0   ;;  %s4042_s14 = smov 0  }
  0x17   :  { %s4044_s15 = smov 0   ;;  %s4046_s16 = smov 0  }
  0x18 LB: > { %7834 = sst [smem:[#allocation29_spill]] %s3939_s13  ;;  %s7838_s2 = sld [smem:[#allocation113_spill]]  ;;  %s3951_s16 = sphi %s4046_s16, %s8278_s16   ;;  %s3947_s15 = sphi %s4044_s15, %s8281_s15   ;;  %s3943_s14 = sphi %s4042_s14, %s8280_s14   ;;  %s3939_s13 = sphi %s4040_s13, %s8279_s13  }
  0x19   : > { %7835 = sst [smem:[#allocation30_spill]] %s3943_s14  ;;  %s4064_s20 = sadd.s32 4294967295, %s3951_s16  }
  0x1a   : > { %7836 = sst [smem:[#allocation31_spill]] %s3947_s15  ;;  %p3204_p0 = scmp.ge.s32.totalorder %s3951_s16, 1 }
  0x1b   : > { %7837 = sst [smem:[#allocation32_spill]] %s3951_s16  ;;  %p7603_p1 = scmp.eq.s32.totalorder %s4064_s20, 0 }
  0x1c   : > { %7839 = sst [smem:[#allocation33_spill]] %s4064_s20  ;;  %p286_p2 = scmp.lt.s32.totalorder %s3951_s16, 3 }
  0x1d   : > { %s7841_s4 = sld [smem:[#allocation115_spill]]  ;;  %s7842_s6 = sld [smem:[#allocation117_spill]] }
  0x1e   : > { %s319_s19 = sshll.u32 %s7838_s2, 4  ;;  %p4069_p3 = pnand %p3204_p0, %p286_p2  ;;  %s320_s19 = int_to_ptr.vmem [resolvable:$true] %s319_s19 }
  0x1f   : > { %s7844_s1 = sld [smem:[#allocation112_spill]]  ;;  %s3685_s12 = scalar_lea.vmem %s320_s19, 32 }
  0x20   : > { %s7840_s21 = scalar_select %p4069_p3, 1, 0 }
  0x21   : > { %p3397_p5 = pneg %p4069_p3  ;;  %p3686_p7 = scmp.ne.s32.totalorder %s320_s19, %s3685_s12 }
  0x22   : > { %p3693_p11 = scmp.lt.s32.totalorder %s320_s19, %s320_s19  ;;  %p3694_p12 = scmp.lt.s32.totalorder %s3685_s12, %s3685_s12 }
  0x23   : > { %s341_s24 = sshll.u32 %s7841_s4, 4  ;;  %s363_s27 = sshll.u32 %s7842_s6, 4  ;;  %s342_s24 = int_to_ptr.vmem [resolvable:$true] %s341_s24  ;;  %s4088_s27 = int_to_ptr.vmem [resolvable:$true] %s363_s27 }
  0x24   : > { %p4084_p6 = pnand %p3397_p5, %p7603_p1  ;;  %p3695_p13 = por %p3694_p12, %p3693_p11 }
  0x25   : > { %s308_s11 = sshll.u32 %s7844_s1, 4  ;;  %s4093_s11 = int_to_ptr.vmem [resolvable:$true] %s308_s11 }
  0x26   : > { %p4097_p8 = pneg %p4084_p6 }
  0x28   : > { %p3688_p9 = pnand %p4097_p8, %p3686_p7 }
  0x2a   : > { %p3689_p10 = pneg %p3688_p9 }
  0x2c   : > { %p3696_p0 = pnand %p3695_p13, %p3689_p10 }
  0x2e   : > { %3699 = shalt.err (!%p3696_p0)
}
  0x2f   : > { %s3953_s18 = smov [#allocation8]   ;;  %s3700_s22 = scalar_lea.vmem %s342_s24, 32 }
  0x30   : > { %3406 = dma.vmem_to_smem (!%p4084_p6), %s320_s19, 32, %s3953_s18, [#allocation9]  }
  0x31   : > { %p3701_p2 = scmp.ne.s32.totalorder %s342_s24, %s3700_s22  ;;  %p3708_p1 = scmp.lt.s32.totalorder %s342_s24, %s342_s24 }
  0x32   : > { %p3709_p3 = scmp.lt.s32.totalorder %s3700_s22, %s3700_s22 }
  0x33   : > { %p3703_p5 = pnand %p3701_p2, %p4097_p8 }
  0x34   : > { %p3710_p7 = por %p3709_p3, %p3708_p1 }
  0x35   : > { %p3704_p4 = pneg %p3703_p5 }
  0x37   : > { %p3711_p9 = pnand %p3710_p7, %p3704_p4 }
  0x39   : > { %3714 = shalt.err (!%p3711_p9)
}
  0x3a   : > { %s3954_s23 = smov [#allocation11]   ;;  %s3715_s25 = scalar_lea.vmem %s4088_s27, 32 }
  0x3b   : > { %3412 = dma.vmem_to_smem (!%p4084_p6), %s342_s24, 32, %s3954_s23, [#allocation12]  }
  0x3c   : > { %p3716_p10 = scmp.ne.s32.totalorder %s4088_s27, %s3715_s25  ;;  %p3723_p13 = scmp.lt.s32.totalorder %s4088_s27, %s4088_s27 }
  0x3d   : > { %p3724_p0 = scmp.lt.s32.totalorder %s3715_s25, %s3715_s25 }
  0x3e   : > { %p3718_p11 = pnand %p3716_p10, %p4097_p8 }
  0x3f   : > { %p3725_p2 = por %p3724_p0, %p3723_p13 }
  0x40   : > { %p3719_p12 = pneg %p3718_p11 }
  0x42   : > { %p3726_p1 = pnand %p3725_p2, %p3719_p12 }
  0x44   : > { %3729 = shalt.err (!%p3726_p1)
}
  0x45   : > { %s3955_s19 = smov [#allocation14]   ;;  %s7846_s0 = sld [smem:[#allocation111_spill]] }
  0x46   : > { %3418 = dma.vmem_to_smem (!%p4084_p6), %s4088_s27, 32, %s3955_s19, [#allocation15]  }
  0x4b   : > { %s3730_s24 = scalar_lea.hbm %s7846_s0, 32 }
  0x4c   : > { %p3731_p3 = scmp.ne.s32.totalorder %s7846_s0, %s3730_s24  ;;  %p3737_p7 = scmp.lt.u32.totalorder %s3730_s24, %s7846_s0 }
  0x4e   : > { %p3733_p4 = pnand %p3731_p3, %p4097_p8 }
  0x50   : > { %p3734_p5 = pneg %p3733_p4 }
  0x52   : > { %p3739_p9 = pnand %p3737_p7, %p3734_p5 }
  0x54   : > { %3742 = shalt.err (!%p3739_p9)
}
  0x55   : > { %s3956_s23 = smov [#allocation2]   ;;  %s7847_s3 = sld [smem:[#allocation114_spill]] }
  0x56   : > { %3400 = dma.hbm_to_smem (!%p4084_p6), %s7846_s0, 32, %s3956_s23, [#allocation5]  }
  0x57   : > { %s3743_s30 = scalar_lea.vmem %s4093_s11, 16  ;;  %p3751_p13 = scmp.lt.s32.totalorder %s4093_s11, %s4093_s11 }
  0x58   : > { %p3744_p10 = scmp.ne.s32.totalorder %s4093_s11, %s3743_s30  ;;  %p3752_p0 = scmp.lt.s32.totalorder %s3743_s30, %s3743_s30 }
  0x5a   : > { %p3746_p11 = pnand %p3744_p10, %p4097_p8  ;;  %p3753_p2 = por %p3752_p0, %p3751_p13 }
  0x5b   : > { %s330_s29 = sshll.u32 %s7847_s3, 4  ;;  %s331_s29 = int_to_ptr.vmem [resolvable:$true] %s330_s29 }
  0x5c   : > { %p3747_p12 = pneg %p3746_p11 }
  0x5e   : > { %p3754_p1 = pnand %p3753_p2, %p3747_p12 }
  0x60   : > { %3757 = shalt.err (!%p3754_p1)
}
  0x61   : > { %s3957_s24 = smov [#allocation7]   ;;  %s3758_s12 = scalar_lea.vmem %s331_s29, 16 }
  0x62   : > { %3403 = dma.vmem_to_smem (!%p4084_p6), %s4093_s11, 16, %s3957_s24, [#allocation6]  }
  0x63   : > { %p3759_p3 = scmp.ne.s32.totalorder %s331_s29, %s3758_s12  ;;  %p3766_p7 = scmp.lt.s32.totalorder %s331_s29, %s331_s29 }
  0x64   : > { %p3767_p9 = scmp.lt.s32.totalorder %s3758_s12, %s3758_s12 }
  0x65   : > { %p3761_p4 = pnand %p3759_p3, %p4097_p8 }
  0x66   : > { %p3768_p10 = por %p3767_p9, %p3766_p7 }
  0x67   : > { %p3762_p5 = pneg %p3761_p4 }
  0x69   : > { %p3769_p11 = pnand %p3768_p10, %p3762_p5 }
  0x6b   : > { %3772 = shalt.err (!%p3769_p11)
}
  0x6c   : > { %s3958_s18 = smov [#allocation10]   ;;  %s7848_s5 = sld [smem:[#allocation116_spill]] }
  0x6d   : > { %3409 = dma.vmem_to_smem (!%p4084_p6), %s331_s29, 16, %s3958_s18, [#allocation9]  }
  0x6e   : > { %s7849_s7 = sld [smem:[#allocation118_spill]] }
  0x72   : > { %s352_s11 = sshll.u32 %s7848_s5, 4  ;;  %s353_s11 = int_to_ptr.vmem [resolvable:$true] %s352_s11 }
  0x73   : > { %s3773_s26 = scalar_lea.vmem %s353_s11, 16  ;;  %p3781_p2 = scmp.lt.s32.totalorder %s353_s11, %s353_s11 }
  0x74   : > { %s374_s19 = sshll.u32 %s7849_s7, 4  ;;  %p3774_p12 = scmp.ne.s32.totalorder %s353_s11, %s3773_s26  ;;  %s375_s19 = int_to_ptr.vmem [resolvable:$true] %s374_s19 }
  0x75   : > { %p3782_p1 = scmp.lt.s32.totalorder %s3773_s26, %s3773_s26 }
  0x76   : > { %p3776_p13 = pnand %p3774_p12, %p4097_p8 }
  0x77   : > { %p3783_p3 = por %p3782_p1, %p3781_p2 }
  0x78   : > { %p3777_p0 = pneg %p3776_p13 }
  0x7a   : > { %p3784_p4 = pnand %p3783_p3, %p3777_p0 }
  0x7c   : > { %3787 = shalt.err (!%p3784_p4)
}
  0x7d   : > { %s3959_s29 = smov [#allocation13]   ;;  %s3788_s30 = scalar_lea.vmem %s375_s19, 16 }
  0x7e   : > { %3415 = dma.vmem_to_smem (!%p4084_p6), %s353_s11, 16, %s3959_s29, [#allocation12]  }
  0x7f   : > { %p3789_p5 = scmp.ne.s32.totalorder %s375_s19, %s3788_s30  ;;  %p3796_p10 = scmp.lt.s32.totalorder %s375_s19, %s375_s19 }
  0x80   : > { %p3797_p11 = scmp.lt.s32.totalorder %s3788_s30, %s3788_s30 }
  0x81   : > { %p3791_p7 = pnand %p3789_p5, %p4097_p8 }
  0x82   : > { %p3798_p12 = por %p3797_p11, %p3796_p10 }
  0x83   : > { %p3792_p9 = pneg %p3791_p7 }
  0x85   : > { %p3799_p13 = pnand %p3798_p12, %p3792_p9 }
  0x87   : > { %3802 = shalt.err (!%p3799_p13)
}
  0x88   : > { %s3960_s24 = smov [#allocation16]   ;;  %s3203_s17 = sadd.s32 4294967294, %s3951_s16  }
  0x89   : > { %3421 = dma.vmem_to_smem (!%p4084_p6), %s375_s19, 16, %s3960_s24, [#allocation15]  }
  0x8a   : > { %s4166_s12 = sadd.s32 1, %s3951_s16   ;;  %s210_s18 = sadd.s32 1, %s3947_s15 }
  0x8b   : > { %7850 = sst [smem:[#allocation34_spill]] %s4166_s12  ;;  %s207_s28 = ssub.s32 %s3951_s16, %s4166_s12 }
  0x8c   : > { %p208_p8 = scmp.eq.s32.totalorder %s207_s28, 0  ;;  %p217_p0 = scmp.ne.s32.totalorder %s3947_s15, %s3943_s14 }
  0x8d   : > { %p218_p2 = scmp.eq.s32.totalorder %s3951_s16, 0  ;;  %p223_p1 = scmp.ne.s32.totalorder %s3943_s14, %s3939_s13 }
  0x8e   : > { %s4177_s22 = scalar_select %p208_p8, %s3947_s15, %s210_s18  }
  0x8f   : > { %p219_p3 = por %p218_p2, %p217_p0  ;;  %p7852_p4 = scmp.eq.s32.totalorder %s4064_s20, 0 }
  0x90   : > { %7851 = sst [smem:[#allocation35_spill]] %s4177_s22  ;;  %p247_p6 = scmp.eq.s32.totalorder %s4064_s20, 1 }
  0x91   : > { %p4181_p5 = por %p7852_p4, %p223_p1  ;;  %p253_p7 = scmp.eq.s32.totalorder %s3203_s17, 1 }
  0x92   : > { %p3441_p9 = scmp.lt.s32.totalorder %s3951_s16, 2  ;;  %s385_s11 = sand.u32 1, %s3947_s15  }
  0x93   : > { %p4188_p10 = por %p247_p6, %p217_p0  ;;  %p4192_p11 = por %p253_p7, %p223_p1 }
  0x94   : > { %s3354_s19 = smul.u32 40, %s385_s11  ;;  %p4197_p12 = pnand %p3441_p9, %p219_p3 }
  0x95   : > { %s7854_s27 = scalar_select %p4188_p10, 1, 0 }
  0x96   : > { %s7856_s25 = scalar_select %p4192_p11, 1, 0 }
  0x97   : > { %7855 = sst [smem:[#allocation36_spill]] %s7854_s27  ;;  %s3355_s26 = smul.u32 640, %s3951_s16 }
  0x98   : > { %7857 = sst [smem:[#allocation37_spill]] %s7856_s25  ;;  %s7859_s8 = sld [smem:[#allocation119_spill]] }
  0x99   : > { %s389_s28 = scalar_lea.vmem [#allocation17], %s3354_s19  ;;  %s386_s0 = scalar_lea.sflag [#allocation3], %s385_s11 }
  0x9a   : > { %s397_s18 = sshll.u32 %s389_s28, 4  ;;  %p3805_p8 = pneg %p4197_p12  ;;  %s4206_s18 = int_to_ptr.vmem [resolvable:$true] %s397_s18 }
  0x9e   : > { %s4204_s17 = scalar_lea.hbm %s7859_s8, %s3355_s26  ;;  %s3808_s24 = scalar_lea.hbm %s7859_s8, 1280 }
  0x9f   : > { %s3803_s1 = scalar_lea.hbm %s4204_s17, 640  ;;  %p3809_p1 = scmp.lt.u32.totalorder %s4204_s17, %s7859_s8 }
  0xa0   : > { %p3804_p13 = scmp.ne.s32.totalorder %s4204_s17, %s3803_s1  ;;  %p3810_p3 = scmp.lt.u32.totalorder %s3808_s24, %s3803_s1 }
  0xa1   : > { %p3812_p6 = scmp.lt.u32.totalorder %s3803_s1, %s4204_s17 }
  0xa2   : > { %p3806_p0 = pnand %p3805_p8, %p3804_p13  ;;  %p3811_p4 = por %p3810_p3, %p3809_p1 }
  0xa4   : > { %p3807_p2 = pneg %p3806_p0  ;;  %p3813_p7 = por %p3812_p6, %p3811_p4 }
  0xa6   : > { %p3814_p9 = pnand %p3813_p7, %p3807_p2 }
  0xa8   : > { %3817 = shalt.err (!%p3814_p9)
}
  0xa9   : > { %s3818_s11 = scalar_lea.vmem %s4206_s18, 640  ;;  %s3961_s19 = smov [#allocation17]  }
  0xaa   : > { %p3819_p13 = scmp.ne.s32.totalorder %s4206_s18, %s3818_s11  ;;  %s3823_s28 = sshll.u32 %s3961_s19, 4  ;;  %s3824_s28 = int_to_ptr.vmem [resolvable:$false] %s3823_s28 }
  0xab   : > { %s3825_s2 = scalar_lea.vmem %s3824_s28, 1280  ;;  %p3826_p10 = scmp.lt.s32.totalorder %s4206_s18, %s3824_s28 }
  0xac   : > { %p3821_p0 = pnand %p3819_p13, %p3805_p8  ;;  %p3827_p1 = scmp.lt.s32.totalorder %s3825_s2, %s3818_s11 }
  0xae   : > { %p3822_p11 = pneg %p3821_p0  ;;  %p3828_p3 = por %p3827_p1, %p3826_p10 }
  0xb0   : > { %p3829_p4 = pnand %p3828_p3, %p3822_p11 }
  0xb2   : > { %3832 = shalt.err (!%p3829_p4)
}
  0xb3   : > { %3425 = dma.hbm_to_vmem [thread:$0]  (!%p4197_p12), %s4204_s17, 640, %s4206_s18, %s386_s0  }
  0xb4   : > { %p7860_p2 = scmp.ne.s32.totalorder %s7840_s21, 0 }
  0xb6   : > { %406 = sbr.rel (%p7860_p2) target bundleno = 1267 (0x4f3), region = 56 }
  0xbd   : > { %p7861_p8 = scmp.eq.s32.totalorder %s4064_s20, 0 }
  0xbf   : > { %3906 = dma.done.wait (%p7861_p8), [#allocation5], 32   ;;  %p7862_p6 = pmov %p7861_p8 }
  0xc1   : > { %3908 = vsyncadd (%p7862_p6), [#allocation5], 4294967264  ;;  %p7863_p7 = pmov %p7862_p6 }
  0xc2   : > { %p7864_p10 = pmov %p7862_p6 }
  0xc3   : > { %3910 = dma.done.wait (%p7863_p7), [#allocation6], 16  }
  0xc4   : > { %3912 = vsyncadd (%p7864_p10), [#allocation6], 4294967280  ;;  %p7865_p11 = pmov %p7862_p6 }
  0xc5   : > { %p7866_p12 = pmov %p7862_p6 }
  0xc6   : > { %3914 = dma.done.wait (%p7865_p11), [#allocation9], 48  }
  0xc7   : > { %3916 = vsyncadd (%p7866_p12), [#allocation9], 4294967248  ;;  %p7867_p9 = pmov %p7862_p6 }
  0xc8   : > { %p7868_p13 = pmov %p7862_p6 }
  0xc9   : > { %3918 = dma.done.wait (%p7867_p9), [#allocation12], 48  }
  0xca   : > { %3920 = vsyncadd (%p7868_p13), [#allocation12], 4294967248  ;;  %p7869_p0 = pmov %p7862_p6 }
  0xcc   : > { %3922 = dma.done.wait (%p7869_p0), [#allocation15], 48   ;;  %p7870_p1 = pmov %p7869_p0 }
  0xcd   : > { %s4256_s0 = sand.u32 1, %s3943_s14  }
  0xce   : > { %3924 = vsyncadd (%p7870_p1), [#allocation15], 4294967248  ;;  %7871 = sst [smem:[#allocation38_spill]] %s4256_s0  ;;  %s4259_s1 = smul.u32 40, %s4256_s0 }
  0xcf   : > { %s441_s3 = scalar_lea.sflag [#allocation3], %s4256_s0 }
  0xd0   : > { %7872 = sst [smem:[#allocation39_spill]] %s4259_s1  ;;  %s444_s21 = scalar_lea.vmem [#allocation17], %s4259_s1 }
  0xd1   : > { %3926 = dma.done.wait (%p4181_p5), %s441_s3, 640  }
  0xd2   : > { %3928 = vsyncadd (%p4181_p5), %s441_s3, 4294966656 }
  0xd3   : > { %449 = sfence }
  0xd4   : > { %v4267_v0 = vld [vmem:[%s444_s21 + $0x10] sm:$0xff]  ;;  %v4269_v1 = vld [vmem:[%s444_s21] sm:$0xff]  ;;  %s7612_s29 = smov 8   ;;  %v4275_v2 = vld [vmem:[%s444_s21 + $0x18] sm:$0xff]  ;;  %s3963_s23 = smov 7   ;;  %v7620_v5 = vmov 0.0   ;;  %v487_v8 = vlaneseq }
  0xd5   : > { %511 = vrot.lane.b32.xlu1 %v4267_v0, %s7612_s29  ;;  %507 = vrot.lane.b32.xlu0 %v4269_v1, %s7612_s29  ;;  %7873 = vst [vmem:[#allocation40_spill] sm:$0xff] %v4275_v2  ;;  %v4277_v3 = vld [vmem:[%s444_s21 + $0x8] sm:$0xff]  ;;  %v4283_v4 = vld [vmem:[%s444_s21 + $0x20] sm:$0xff]  ;;  %s7610_s17 = smov 6   ;;  %s3965_s18 = smov 5  }
  0xd6   : > { %s7608_s30 = smov 4   ;;  %s3967_s26 = smov 3   ;;  %v4351_v10 = vand.u32 127, %v487_v8 }
  0xd7   : > { %s7606_s24 = smov 2   ;;  %s3969_s11 = smov 1  }
  0xd8   : > { %s7618_s19 = smov 14   ;;  %s7641_s28 = smov 16   ;;  %vm517_vm0 = vcmp.lt.s32.totalorder %v4351_v10, 8  ;;  %vm557_vm1 = vcmp.lt.s32.totalorder %v4351_v10, 7  ;;  %vm597_vm2 = vcmp.lt.s32.totalorder %v4351_v10, 6  ;;  %vm637_vm3 = vcmp.lt.s32.totalorder %v4351_v10, 5 }
  0xd9   : > { %513 = vrot.lane.b32.xlu1 %v4275_v2, %s7612_s29  ;;  %509 = vrot.lane.b32.xlu0 %v4277_v3, %s7612_s29  ;;  %s7614_s2 = smov 10   ;;  %s7616_s3 = smov 12   ;;  %vm677_vm4 = vcmp.lt.s32.totalorder %v4351_v10, 4  ;;  %vm717_vm5 = vcmp.lt.s32.totalorder %v4351_v10, 3  ;;  %vm757_vm6 = vcmp.lt.s32.totalorder %v4351_v10, 2  ;;  %vm797_vm7 = vcmp.lt.s32.totalorder %v4351_v10, 1 }
  0xda   : > { %s523_s21 = sld [smem:[#allocation2]]  ;;  %s5021_s4 = sld [smem:[#allocation8 + $0x1]]  ;;  %vm895_vm9 = vcmp.lt.s32.totalorder %v4351_v10, 16  ;;  %vm974_vm10 = vcmp.lt.s32.totalorder %v4351_v10, 14  ;;  %vm1053_vm11 = vcmp.lt.s32.totalorder %v4351_v10, 12  ;;  %vm1132_vm12 = vcmp.lt.s32.totalorder %v4351_v10, 10 }
  0xdb   : > { %s5025_s5 = sld [smem:[#allocation8 + $0x81]]  ;;  %s5027_s6 = sld [smem:[#allocation8 + $0xa]]  ;;  %vm1595_vm13 = vcmp.lt.s32.totalorder %v4351_v10, 32  ;;  %vm1674_vm14 = vcmp.lt.s32.totalorder %v4351_v10, 28  ;;  %vm1753_vm15 = vcmp.lt.s32.totalorder %v4351_v10, 24 }
  0xdc   : > { %s5031_s7 = sld [smem:[#allocation8 + $0x8a]]  ;;  %s5033_s8 = sld [smem:[#allocation8 + $0xb]] }
  0xdd   : > { %547 = vrot.lane.b32.xlu1 %v4269_v1, %s3963_s23  ;;  %515 = vrot.lane.b32.xlu0 %v4283_v4, %s7612_s29  ;;  %s3236_s29 = sld [smem:[#allocation2 + $0x6]]  ;;  %s5035_s22 = sld [smem:[#allocation8 + $0x8b]] }
  0xde   : > { %s5037_s15 = sld [smem:[#allocation8 + $0x2]]  ;;  %s5041_s12 = sld [smem:[#allocation8 + $0x3]] }
  0xdf   : > { %s5039_s14 = sld [smem:[#allocation8 + $0x82]]  ;;  %s5045_s16 = sld [smem:[#allocation8 + $0x83]] }
  0xe0   : > { %v4360_v14 = vstv %s523_s21  ;;  %s3228_s21 = sld [smem:[#allocation2 + $0x2]]  ;;  %s5047_s25 = sld [smem:[#allocation8 + $0xc]] }
  0xe1   : > { %551 = vrot.lane.b32.xlu1 %v4267_v0, %s3963_s23  ;;  %549 = vrot.lane.b32.xlu0 %v4277_v3, %s3963_s23  ;;  %7876 = vst [vmem:[#allocation43_spill] sm:$0xff] %v4360_v14  ;;  %s5051_s13 = sld [smem:[#allocation8 + $0x8c]]  ;;  %s5053_s10 = sld [smem:[#allocation8 + $0xd]] }
  0xe2   : > { %s5058_s9 = sld [smem:[#allocation8 + $0x8d]]  ;;  %s5060_s27 = sld [smem:[#allocation8 + $0x4]] }
  0xe3   : > { %s5102_s0 = sld [smem:[#allocation8 + $0x8e]]  ;;  %s5104_s20 = sld [smem:[#allocation8 + $0xf]] }
  0xe4   : > { %s5112_s1 = sld [smem:[#allocation8 + $0x8f]] }
  0xe5   : > { %555 = vrot.lane.b32.xlu1 %v4283_v4, %s3963_s23  ;;  %553 = vrot.lane.b32.xlu0 %v4275_v2, %s3963_s23  ;;  %s3225_s23 = sld [smem:[#allocation2 + $0x80]] }
  0xe6   : > { %v4408_v40 = vstv %s3228_s21  ;;  %s3234_s21 = sld [smem:[#allocation2 + $0x5]] }
  0xe7   : > { %7885 = vst [vmem:[#allocation52_spill] sm:$0xff] %v4408_v40 }
  0xe9   : > { %589 = vrot.lane.b32.xlu1 %v4277_v3, %s7610_s17  ;;  %587 = vrot.lane.b32.xlu0 %v4269_v1, %s7610_s17 }
  0xeb   : > { %v4362_v15 = vstv %s3225_s23  ;;  %s3229_s23 = sld [smem:[#allocation2 + $0x82]] }
  0xec   : > { %7877 = vst [vmem:[#allocation44_spill] sm:$0xff] %v4362_v15 }
  0xed   : > { %593 = vrot.lane.b32.xlu1 %v4275_v2, %s7610_s17  ;;  %591 = vrot.lane.b32.xlu0 %v4267_v0, %s7610_s17 }
  0xf1   : > { %627 = vrot.lane.b32.xlu1 %v4269_v1, %s3965_s18  ;;  %595 = vrot.lane.b32.xlu0 %v4283_v4, %s7610_s17  ;;  %v4410_v41 = vstv %s3229_s23  ;;  %s3235_s23 = sld [smem:[#allocation2 + $0x85]]  ;;  %s3241_s17 = sld [smem:[#allocation2 + $0x88]] }
  0xf2   : > { %7886 = vst [vmem:[#allocation53_spill] sm:$0xff] %v4410_v41 }
  0xf5   : > { %631 = vrot.lane.b32.xlu1 %v4267_v0, %s3965_s18  ;;  %629 = vrot.lane.b32.xlu0 %v4277_v3, %s3965_s18 }
  0xf9   : > { %635 = vrot.lane.b32.xlu1 %v4283_v4, %s3965_s18  ;;  %633 = vrot.lane.b32.xlu0 %v4275_v2, %s3965_s18  ;;  %s503_s18 = sld [smem:[#allocation7]] }
  0xfd   : > { %669 = vrot.lane.b32.xlu1 %v4277_v3, %s7608_s30  ;;  %667 = vrot.lane.b32.xlu0 %v4269_v1, %s7608_s30 }
  0xff   : > { %v4370_v19 = vstv %s503_s18  ;;  %s3231_s18 = sld [smem:[#allocation2 + $0x83]] }
 0x100   : > { %7878 = vst [vmem:[#allocation45_spill] sm:$0xff] %v4370_v19 }
 0x101   : > { %673 = vrot.lane.b32.xlu1 %v4275_v2, %s7608_s30  ;;  %671 = vrot.lane.b32.xlu0 %v4267_v0, %s7608_s30 }
 0x105   : > { %707 = vrot.lane.b32.xlu1 %v4269_v1, %s3967_s26  ;;  %675 = vrot.lane.b32.xlu0 %v4283_v4, %s7608_s30  ;;  %s3240_s30 = sld [smem:[#allocation2 + $0x8]]  ;;  %v4433_v53 = vstv %s3231_s18  ;;  %s7649_s18 = smov 32  }
 0x109   : > { %711 = vrot.lane.b32.xlu1 %v4267_v0, %s3967_s26  ;;  %709 = vrot.lane.b32.xlu0 %v4277_v3, %s3967_s26 }
 0x10b   : > { %v4450_v8 = vstv %s3240_s30  ;;  %s7925_s30 = smov 10  }
 0x10d   : > { %715 = vrot.lane.b32.xlu1 %v4283_v4, %s3967_s26  ;;  %713 = vrot.lane.b32.xlu0 %v4275_v2, %s3967_s26  ;;  %s3224_s26 = sld [smem:[#allocation7 + $0x1]] }
 0x111   : > { %749 = vrot.lane.b32.xlu1 %v4277_v3, %s7606_s24  ;;  %747 = vrot.lane.b32.xlu0 %v4269_v1, %s7606_s24 }
 0x113   : > { %v4372_v20 = vstv %s3224_s26  ;;  %s3232_s26 = sld [smem:[#allocation2 + $0x4]] }
 0x114   : > { %7879 = vst [vmem:[#allocation46_spill] sm:$0xff] %v4372_v20 }
 0x115   : > { %753 = vrot.lane.b32.xlu1 %v4275_v2, %s7606_s24  ;;  %751 = vrot.lane.b32.xlu0 %v4267_v0, %s7606_s24 }
 0x119   : > { %787 = vrot.lane.b32.xlu1 %v4269_v1, %s3969_s11  ;;  %755 = vrot.lane.b32.xlu0 %v4283_v4, %s7606_s24  ;;  %s3227_s24 = sld [smem:[#allocation2 + $0x81]]  ;;  %v4446_v62 = vstv %s3232_s26  ;;  %s7647_s26 = smov 28  }
 0x11d   : > { %791 = vrot.lane.b32.xlu1 %v4267_v0, %s3969_s11  ;;  %789 = vrot.lane.b32.xlu0 %v4277_v3, %s3969_s11 }
 0x11f   : > { %v4391_v29 = vstv %s3227_s24  ;;  %s3230_s24 = sld [smem:[#allocation2 + $0x3]] }
 0x120   : > { %7883 = vst [vmem:[#allocation50_spill] sm:$0xff] %v4391_v29 }
 0x121   : > { %795 = vrot.lane.b32.xlu1 %v4283_v4, %s3969_s11  ;;  %793 = vrot.lane.b32.xlu0 %v4275_v2, %s3969_s11  ;;  %s3226_s11 = sld [smem:[#allocation2 + $0x1]] }
 0x125   : > { %3518 = vrot.lane.b32.xlu1 %v7620_v5, %s7618_s19  ;;  %3513 = vrot.lane.b32.xlu0 %v7620_v5, %s7641_s28  ;;  %v4427_v51 = vstv %s3230_s24  ;;  %s3239_s19 = sld [smem:[#allocation2 + $0x87]]  ;;  %s7933_s24 = smov 2  }
 0x127   : > { %v4385_v27 = vstv %s3226_s11  ;;  %s3233_s11 = sld [smem:[#allocation2 + $0x84]] }
 0x128   : > { %7882 = vst [vmem:[#allocation49_spill] sm:$0xff] %v4385_v27 }
 0x129   : > { %3528 = vrot.lane.b32.xlu1 %v7620_v5, %s7614_s2  ;;  %3523 = vrot.lane.b32.xlu0 %v7620_v5, %s7616_s3  ;;  %s3237_s2 = sld [smem:[#allocation2 + $0x86]]  ;;  %s3238_s3 = sld [smem:[#allocation2 + $0x7]] }
 0x12d   : > { %v4448_v63 = vstv %s3233_s11  ;;  %s7645_s11 = smov 24  }
 0x147   : > { %v4345_v6 = vpop.permute.xlu1 %511  ;;  %v4347_v7 = vpop.permute.xlu0 %507 }
 0x148   : > { %7874 = vst [vmem:[#allocation41_spill] sm:$0xff] %v4345_v6 }
 0x14b   : > { %v4349_v9 = vpop.permute.xlu1 %513  ;;  %v4353_v11 = vpop.permute.xlu0 %509 }
 0x14c   : > { %7875 = vst [vmem:[#allocation42_spill] sm:$0xff] %v4349_v9 }
 0x14f   : > { %v4356_v12 = vpop.permute.xlu1 %547  ;;  %v4358_v13 = vpop.permute.xlu0 %515 }
 0x150   : > { %v518_v16 = vsel %vm517_vm0, %v4349_v9, %v4358_v13 }
 0x151   : > { %v529_v17 = vmul.f32 %v4360_v14, %v518_v16  ;;  %v541_v18 = vmul.f32 %v4362_v15, %v518_v16  ;;  %v4452_v16 = vstv %s3241_s17  ;;  %s7921_s17 = smov 12  }
 0x153   : > { %v534_v21 = vadd.f32 %v529_v17, %v4370_v19  ;;  %v546_v22 = vadd.f32 %v541_v18, %v4372_v20  ;;  %v4376_v23 = vpop.permute.xlu1 %551  ;;  %v4378_v24 = vpop.permute.xlu0 %549  ;;  %v520_v17 = vsel %vm517_vm0, %v4353_v11, %v4345_v6  ;;  %v521_v18 = vsel %vm517_vm0, %v4347_v7, %v4353_v11 }
 0x154   : > { %7880 = vst [vmem:[#allocation47_spill] sm:$0xff] %v4376_v23  ;;  %v561_v11 = vsel %vm557_vm1, %v4356_v12, %v4378_v24  ;;  %v539_v2 = vmul.f32 %v4362_v15, %v520_v17 }
 0x157   : > { %v4381_v25 = vpop.permute.xlu1 %555  ;;  %v4383_v26 = vpop.permute.xlu0 %553 }
 0x158   : > { %7881 = vst [vmem:[#allocation48_spill] sm:$0xff] %v4383_v26  ;;  %v558_v28 = vsel %vm557_vm1, %v4383_v26, %v4381_v25 }
 0x159   : > { %v569_v30 = vmul.f32 %v4385_v27, %v558_v28  ;;  %v581_v31 = vmul.f32 %v4391_v29, %v558_v28  ;;  %v4466_v28 = vstv %s3236_s29  ;;  %s7916_s29 = smov 14  }
 0x15b   : > { %v574_v32 = vadd.f32 %v569_v30, %v534_v21  ;;  %v4395_v33 = vpop.permute.xlu1 %589  ;;  %v4397_v34 = vpop.permute.xlu0 %587  ;;  %v586_v35 = vadd.f32 %v581_v31, %v546_v22  ;;  %v4462_v21 = vstv %s3234_s21  ;;  %v4464_v22 = vstv %s3235_s23  ;;  %s7643_s21 = smov 20   ;;  %s3274_s23 = sld [smem:[#allocation8 + $0x8]] }
 0x15c   : > { %v4468_v30 = vstv %s3237_s2  ;;  %v4470_v31 = vstv %s3238_s3  ;;  %s7931_s2 = smov 6   ;;  %s7932_s3 = smov 4  }
 0x15f   : > { %v4399_v36 = vpop.permute.xlu1 %593  ;;  %v4401_v37 = vpop.permute.xlu0 %591 }
 0x160   : > { %7884 = vst [vmem:[#allocation51_spill] sm:$0xff] %v4399_v36 }
 0x163   : > { %v4404_v38 = vpop.permute.xlu1 %627  ;;  %v4406_v39 = vpop.permute.xlu0 %595 }
 0x164   : > { %v598_v42 = vsel %vm597_vm2, %v4399_v36, %v4406_v39  ;;  %v566_v36 = vmul.f32 %v4385_v27, %v561_v11 }
 0x165   : > { %v609_v43 = vmul.f32 %v4408_v40, %v598_v42  ;;  %v621_v44 = vmul.f32 %v4410_v41, %v598_v42 }
 0x167   : > { %v614_v45 = vadd.f32 %v609_v43, %v574_v32  ;;  %v626_v46 = vadd.f32 %v621_v44, %v586_v35  ;;  %v4418_v47 = vpop.permute.xlu1 %631  ;;  %v4420_v48 = vpop.permute.xlu0 %629  ;;  %v4472_v32 = vstv %s3239_s19  ;;  %v522_v35 = vsel %vm517_vm0, %v4358_v13, %v4347_v7  ;;  %s7929_s19 = smov 8  }
 0x168   : > { %7887 = vst [vmem:[#allocation54_spill] sm:$0xff] %v4418_v47  ;;  %v4489_v44 = vmul.f32 %v4450_v8, %v4277_v3  ;;  %v526_v7 = vmul.f32 %v4360_v14, %v521_v18  ;;  %v527_v13 = vmul.f32 %v4360_v14, %v520_v17 }
 0x16b   : > { %v4423_v49 = vpop.permute.xlu1 %635  ;;  %v4425_v50 = vpop.permute.xlu0 %633 }
 0x16c   : > { %7888 = vst [vmem:[#allocation55_spill] sm:$0xff] %v4425_v50  ;;  %v638_v52 = vsel %vm637_vm3, %v4425_v50, %v4423_v49  ;;  %v537_v50 = vmul.f32 %v4362_v15, %v522_v35 }
 0x16d   : > { %v649_v54 = vmul.f32 %v4427_v51, %v638_v52  ;;  %v661_v55 = vmul.f32 %v4433_v53, %v638_v52 }
 0x16f   : > { %v654_v56 = vadd.f32 %v649_v54, %v614_v45  ;;  %v4437_v57 = vpop.permute.xlu1 %669  ;;  %v4439_v58 = vpop.permute.xlu0 %667  ;;  %v666_v59 = vadd.f32 %v661_v55, %v626_v46  ;;  %v4493_v45 = vmul.f32 %v4452_v16, %v4277_v3  ;;  %v560_v46 = vsel %vm557_vm1, %v4378_v24, %v4376_v23 }
 0x170   : > { %v538_v54 = vmul.f32 %v4362_v15, %v521_v18  ;;  %v562_v3 = vsel %vm557_vm1, %v4381_v25, %v4356_v12  ;;  %v525_v24 = vmul.f32 %v4360_v14, %v522_v35  ;;  %v578_v18 = vmul.f32 %v4391_v29, %v561_v11 }
 0x171   : > { %v579_v25 = vmul.f32 %v4391_v29, %v560_v46  ;;  %v565_v17 = vmul.f32 %v4385_v27, %v562_v3  ;;  %v4530_v35 = vmul.f32 %v4452_v16, %v4269_v1  ;;  %v531_v11 = vadd.f32 %v526_v7, %v4370_v19 }
 0x173   : > { %v4442_v60 = vpop.permute.xlu1 %673  ;;  %v4444_v61 = vpop.permute.xlu0 %671  ;;  %v571_v7 = vadd.f32 %v566_v36, %v531_v11 }
 0x174   : > { %7889 = vst [vmem:[#allocation56_spill] sm:$0xff] %v4442_v60 }
 0x177   : > { %v4482_v42 = vpop.permute.xlu1 %707  ;;  %v4484_v43 = vpop.permute.xlu0 %675 }
 0x178   : > { %v678_v52 = vsel %vm677_vm4, %v4442_v60, %v4484_v43  ;;  %v567_v60 = vmul.f32 %v4385_v27, %v560_v46  ;;  %v544_v46 = vadd.f32 %v539_v2, %v4372_v20  ;;  %v542_v27 = vadd.f32 %v537_v50, %v4372_v20 }
 0x179   : > { %v689_v55 = vmul.f32 %v4446_v62, %v678_v52  ;;  %v701_v5 = vmul.f32 %v4448_v63, %v678_v52  ;;  %v4526_v52 = vmul.f32 %v4450_v8, %v4269_v1  ;;  %v601_v1 = vsel %vm597_vm2, %v4397_v34, %v4395_v33 }
 0x17a   : > { %v584_v2 = vadd.f32 %v579_v25, %v544_v46  ;;  %v577_v50 = vmul.f32 %v4391_v29, %v562_v3  ;;  %v606_v36 = vmul.f32 %v4408_v40, %v601_v1  ;;  %v618_v3 = vmul.f32 %v4410_v41, %v601_v1 }
 0x17b   : > { %v694_v23 = vadd.f32 %v689_v55, %v654_v56  ;;  %v706_v26 = vadd.f32 %v701_v5, %v666_v59  ;;  %v4518_v6 = vpop.permute.xlu1 %711  ;;  %v4520_v12 = vpop.permute.xlu0 %709  ;;  %v532_v5 = vadd.f32 %v527_v13, %v4370_v19  ;;  %v543_v56 = vadd.f32 %v538_v54, %v4372_v20 }
 0x17c   : > { %v4537_v59 = vmul.f32 %v4450_v8, %v4283_v4  ;;  %v530_v55 = vadd.f32 %v525_v24, %v4370_v19  ;;  %v600_v54 = vsel %vm597_vm2, %v4395_v33, %v4401_v37  ;;  %v641_v33 = vsel %vm637_vm3, %v4404_v38, %v4420_v48 }
 0x17d   : > { %v572_v15 = vadd.f32 %v567_v60, %v532_v5  ;;  %v583_v13 = vadd.f32 %v578_v18, %v543_v56  ;;  %v602_v60 = vsel %vm597_vm2, %v4406_v39, %v4397_v34  ;;  %v607_v25 = vmul.f32 %v4408_v40, %v600_v54 }
 0x17e   : > { %v570_v24 = vadd.f32 %v565_v17, %v530_v55  ;;  %v640_v17 = vsel %vm637_vm3, %v4420_v48, %v4418_v47  ;;  %v619_v34 = vmul.f32 %v4410_v41, %v600_v54  ;;  %v642_v39 = vsel %vm637_vm3, %v4423_v49, %v4404_v38 }
 0x17f   : > { %v716_v14 = vpop.permute.xlu1 %715  ;;  %v4550_v9 = vpop.permute.xlu0 %713  ;;  %v681_v5 = vsel %vm677_vm4, %v4439_v58, %v4437_v57  ;;  %v617_v55 = vmul.f32 %v4410_v41, %v602_v60  ;;  %v646_v1 = vmul.f32 %v4427_v51, %v641_v33  ;;  %v611_v19 = vadd.f32 %v606_v36, %v571_v7 }
 0x180   : > { %7890 = vst [vmem:[#allocation57_spill] sm:$0xff] %v4550_v9  ;;  %v718_v20 = vsel %vm717_vm5, %v4550_v9, %v716_v14  ;;  %v582_v9 = vadd.f32 %v577_v50, %v542_v27  ;;  %v647_v38 = vmul.f32 %v4427_v51, %v640_v17  ;;  %v658_v49 = vmul.f32 %v4433_v53, %v641_v33 }
 0x181   : > { %v729_v18 = vmul.f32 %v4462_v21, %v718_v20  ;;  %v741_v11 = vmul.f32 %v4464_v22, %v718_v20  ;;  %v605_v20 = vmul.f32 %v4408_v40, %v602_v60  ;;  %v659_v47 = vmul.f32 %v4433_v53, %v640_v17 }
 0x182   : > { %v686_v29 = vmul.f32 %v4446_v62, %v681_v5  ;;  %v623_v60 = vadd.f32 %v618_v3, %v583_v13  ;;  %v612_v41 = vadd.f32 %v607_v25, %v572_v15  ;;  %v624_v40 = vadd.f32 %v619_v34, %v584_v2 }
 0x183   : > { %v734_v56 = vadd.f32 %v729_v18, %v694_v23  ;;  %v4583_v46 = vpop.permute.xlu1 %749  ;;  %v748_v48 = vpop.permute.xlu0 %747  ;;  %v746_v54 = vadd.f32 %v741_v11, %v706_v26  ;;  %v645_v23 = vmul.f32 %v4427_v51, %v642_v39  ;;  %v657_v18 = vmul.f32 %v4433_v53, %v642_v39 }
 0x184   : > { %v698_v26 = vmul.f32 %v4448_v63, %v681_v5  ;;  %v610_v50 = vadd.f32 %v605_v20, %v570_v24  ;;  %v622_v36 = vadd.f32 %v617_v55, %v582_v9  ;;  %v651_v33 = vadd.f32 %v646_v1, %v611_v19 }
 0x185   : > { %v680_v17 = vsel %vm677_vm4, %v4437_v57, %v4444_v61  ;;  %v652_v11 = vadd.f32 %v647_v38, %v612_v41  ;;  %v663_v39 = vadd.f32 %v658_v49, %v623_v60  ;;  %v682_v15 = vsel %vm677_vm4, %v4484_v43, %v4439_v58 }
 0x186   : > { %v4610_v13 = vmul.f32 %v4452_v16, %v4283_v4  ;;  %v664_v2 = vadd.f32 %v659_v47, %v624_v40  ;;  %v650_v24 = vadd.f32 %v645_v23, %v610_v50  ;;  %v662_v9 = vadd.f32 %v657_v18, %v622_v36 }
 0x187   : > { %v4596_v27 = vpop.permute.xlu1 %753  ;;  %v4598_v7 = vpop.permute.xlu0 %751  ;;  %v691_v19 = vadd.f32 %v686_v29, %v651_v33  ;;  %v703_v3 = vadd.f32 %v698_v26, %v663_v39  ;;  %v687_v25 = vmul.f32 %v4446_v62, %v680_v17  ;;  %v720_v41 = vsel %vm717_vm5, %v4520_v12, %v4518_v6 }
 0x188   : > { %v721_v57 = vsel %vm717_vm5, %v4482_v42, %v4520_v12  ;;  %v699_v40 = vmul.f32 %v4448_v63, %v680_v17  ;;  %v685_v47 = vmul.f32 %v4446_v62, %v682_v15  ;;  %v722_v29 = vsel %vm717_vm5, %v716_v14, %v4482_v42 }
 0x189   : > { %v697_v34 = vmul.f32 %v4448_v63, %v682_v15  ;;  %v761_v12 = vsel %vm757_vm6, %v748_v48, %v4583_v46  ;;  %v726_v55 = vmul.f32 %v4462_v21, %v721_v57  ;;  %v727_v1 = vmul.f32 %v4462_v21, %v720_v41 }
 0x18a   : > { %v738_v14 = vmul.f32 %v4464_v22, %v721_v57  ;;  %v725_v38 = vmul.f32 %v4462_v21, %v722_v29  ;;  %v737_v49 = vmul.f32 %v4464_v22, %v722_v29  ;;  %v692_v50 = vadd.f32 %v687_v25, %v652_v11 }
 0x18b   : > { %v788_v58 = vpop.permute.xlu1 %787  ;;  %v756_v4 = vpop.permute.xlu0 %755  ;;  %v704_v36 = vadd.f32 %v699_v40, %v664_v2  ;;  %v690_v33 = vadd.f32 %v685_v47, %v650_v24  ;;  %v766_v17 = vmul.f32 %v4466_v28, %v761_v12  ;;  %v702_v39 = vadd.f32 %v697_v34, %v662_v9 }
 0x18c   : > { %v758_v43 = vsel %vm757_vm6, %v4596_v27, %v756_v4  ;;  %v762_v42 = vsel %vm757_vm6, %v756_v4, %v748_v48  ;;  %v739_v15 = vmul.f32 %v4464_v22, %v720_v41  ;;  %v731_v4 = vadd.f32 %v726_v55, %v691_v19 }
 0x18d   : > { %v769_v5 = vmul.f32 %v4466_v28, %v758_v43  ;;  %v781_v20 = vmul.f32 %v4468_v30, %v758_v43  ;;  %v765_v57 = vmul.f32 %v4466_v28, %v762_v42  ;;  %v732_v29 = vadd.f32 %v727_v1, %v692_v50 }
 0x18e   : > { %v743_v11 = vadd.f32 %v738_v14, %v703_v3  ;;  %v730_v2 = vadd.f32 %v725_v38, %v690_v33  ;;  %v742_v24 = vadd.f32 %v737_v49, %v702_v39  ;;  %v778_v9 = vmul.f32 %v4468_v30, %v761_v12 }
 0x18f   : > { %v774_v23 = vadd.f32 %v769_v5, %v734_v56  ;;  %v786_v18 = vadd.f32 %v781_v20, %v746_v54  ;;  %v4642_v60 = vpop.permute.xlu1 %791  ;;  %v790_v26 = vpop.permute.xlu0 %789  ;;  %v760_v56 = vsel %vm757_vm6, %v4583_v46, %v4598_v7  ;;  %v777_v54 = vmul.f32 %v4468_v30, %v762_v42 }
 0x190   : > { %v801_v48 = vsel %vm797_vm7, %v788_v58, %v790_v26  ;;  %v771_v40 = vadd.f32 %v766_v17, %v731_v4  ;;  %v767_v43 = vmul.f32 %v4466_v28, %v760_v56  ;;  %v770_v3 = vadd.f32 %v765_v57, %v730_v2 }
 0x191   : > { %v806_v47 = vmul.f32 %v4470_v31, %v801_v48  ;;  %v800_v34 = vsel %vm797_vm7, %v790_v26, %v4642_v60  ;;  %v818_v12 = vmul.f32 %v4472_v32, %v801_v48  ;;  %v782_v5 = vadd.f32 %v777_v54, %v742_v24 }
 0x192   : > { %v744_v1 = vadd.f32 %v739_v15, %v704_v36  ;;  %v783_v14 = vadd.f32 %v778_v9, %v743_v11  ;;  %v779_v42 = vmul.f32 %v4468_v30, %v760_v56  ;;  %v807_v49 = vmul.f32 %v4470_v31, %v800_v34  ;;  %v7901_v9 = vld [vmem:[#allocation42_spill] sm:$0xff] }
 0x193   : > { %v796_v25 = vpop.permute.xlu1 %795  ;;  %v4655_v41 = vpop.permute.xlu0 %793  ;;  %v811_v50 = vadd.f32 %v806_v47, %v771_v40  ;;  %v819_v17 = vmul.f32 %v4472_v32, %v800_v34  ;;  %v772_v4 = vadd.f32 %v767_v43, %v732_v29  ;;  %v831_v2 = vmul.f32 %v4450_v8, %v4267_v0  ;;  %v7907_v34 = vld [vmem:[#allocation43_spill] sm:$0xff] }
 0x194   : > { %v802_v19 = vsel %vm797_vm7, %v796_v25, %v788_v58  ;;  %v798_v46 = vsel %vm797_vm7, %v4655_v41, %v796_v25  ;;  %v823_v39 = vadd.f32 %v818_v12, %v783_v14  ;;  %v784_v15 = vadd.f32 %v779_v42, %v744_v1  ;;  %v7902_v25 = vld [vmem:[#allocation41_spill] sm:$0xff]  ;;  %v7911_v42 = vld [vmem:[#allocation50_spill] sm:$0xff] }
 0x195   : > { %v805_v20 = vmul.f32 %v4470_v31, %v802_v19  ;;  %v817_v55 = vmul.f32 %v4472_v32, %v802_v19  ;;  %v809_v58 = vmul.f32 %v4470_v31, %v798_v46  ;;  %v821_v38 = vmul.f32 %v4472_v32, %v798_v46  ;;  %v7904_v19 = vld [vmem:[#allocation48_spill] sm:$0xff]  ;;  %v7905_v46 = vld [vmem:[#allocation47_spill] sm:$0xff]  ;;  %v7910_v1 = vld [vmem:[#allocation49_spill] sm:$0xff] }
 0x196   : > { %v812_v24 = vadd.f32 %v807_v49, %v772_v4  ;;  %v519_v40 = vsel %vm517_vm0, %v7902_v25, %v7901_v9  ;;  %v559_v43 = vsel %vm557_vm1, %v7905_v46, %v7904_v19  ;;  %v7912_v49 = vld [vmem:[#allocation55_spill] sm:$0xff]  ;;  %v7918_v4 = vld [vmem:[#allocation53_spill] sm:$0xff]  ;;  %vm1832_vm1 = vcmp.lt.s32.totalorder %v4351_v10, 20 }
 0x197   : > { %v810_v33 = vadd.f32 %v805_v20, %v770_v3  ;;  %v822_v26 = vadd.f32 %v817_v55, %v782_v5  ;;  %v814_v57 = vadd.f32 %v809_v58, %v774_v23  ;;  %v826_v48 = vadd.f32 %v821_v38, %v786_v18  ;;  %v7908_v5 = vld [vmem:[#allocation44_spill] sm:$0xff]  ;;  %v7909_v55 = vld [vmem:[#allocation51_spill] sm:$0xff] }
 0x198   : > { %v4690_v23 = vadd.f32 %v4489_v44, %v811_v50  ;;  %v4696_v18 = vadd.f32 %v4493_v45, %v823_v39  ;;  %v528_v12 = vmul.f32 %v7907_v34, %v519_v40  ;;  %v540_v20 = vmul.f32 %v7908_v5, %v519_v40  ;;  %v7913_v50 = vld [vmem:[#allocation54_spill] sm:$0xff]  ;;  %v7915_v39 = vld [vmem:[#allocation52_spill] sm:$0xff]  ;;  %v7920_v40 = vld [vmem:[#allocation57_spill] sm:$0xff] }
 0x199   : > { %v4676_v54 = vadd.f32 %v4526_v52, %v810_v33  ;;  %v4679_v36 = vadd.f32 %v4530_v35, %v822_v26  ;;  %v4682_v56 = vadd.f32 %v4537_v59, %v814_v57  ;;  %v4685_v11 = vadd.f32 %v4610_v13, %v826_v48  ;;  %v7914_v26 = vld [vmem:[#allocation45_spill] sm:$0xff] }
 0x19a   : > { %7895 = vst [vmem:[#allocation62_spill] sm:$0xff] %v4690_v23  ;;  %v843_v52 = vmul.f32 %v4452_v16, %v4267_v0  ;;  %v824_v35 = vadd.f32 %v819_v17, %v784_v15  ;;  %7896 = vst [vmem:[#allocation63_spill] sm:$0xff] %v4696_v18  ;;  %v4699_v59 = vadd.f32 %v831_v2, %v812_v24  ;;  %v7919_v2 = vld [vmem:[#allocation56_spill] sm:$0xff] }
 0x19b   : > { %7891 = vst [vmem:[#allocation58_spill] sm:$0xff] %v4676_v54  ;;  %7892 = vst [vmem:[#allocation59_spill] sm:$0xff] %v4679_v36  ;;  %3627 = vtanh.f32 %v4676_v54  ;;  %v599_v58 = vsel %vm597_vm2, %v4401_v37, %v7909_v55  ;;  %v568_v14 = vmul.f32 %v7910_v1, %v559_v43  ;;  %v580_v38 = vmul.f32 %v7911_v42, %v559_v43  ;;  %v7917_v37 = vld [vmem:[#allocation46_spill] sm:$0xff] }
 0x19c   : > { %7893 = vst [vmem:[#allocation60_spill] sm:$0xff] %v4682_v56  ;;  %7894 = vst [vmem:[#allocation61_spill] sm:$0xff] %v4685_v11  ;;  %3629 = vtanh.f32 %v4679_v36  ;;  %v4702_v13 = vadd.f32 %v843_v52, %v824_v35  ;;  %v639_v33 = vsel %vm637_vm3, %v7913_v50, %v7912_v49  ;;  %v533_v17 = vadd.f32 %v528_v12, %v7914_v26  ;;  %v4895_v26 = vpop.permute.xlu0 %3513 }
 0x19d   : > { %7897 = vst [vmem:[#allocation64_spill] sm:$0xff] %v4699_v59  ;;  %3631 = vtanh.f32 %v4690_v23  ;;  %v608_v57 = vmul.f32 %v7915_v39, %v599_v58  ;;  %v545_v48 = vadd.f32 %v540_v20, %v7917_v37  ;;  %v620_v15 = vmul.f32 %v7918_v4, %v599_v58 }
 0x19e   : > { %7898 = vst [vmem:[#allocation65_spill] sm:$0xff] %v4702_v13  ;;  %3633 = vtanh.f32 %v4696_v18  ;;  %v679_v24 = vsel %vm677_vm4, %v4444_v61, %v7919_v2  ;;  %v573_v52 = vadd.f32 %v568_v14, %v533_v17  ;;  %v648_v35 = vmul.f32 %v4427_v51, %v639_v33  ;;  %v4897_v17 = vpop.permute.xlu1 %3518 }
 0x19f   : > { %3635 = vtanh.f32 %v4699_v59  ;;  %v585_v9 = vadd.f32 %v580_v38, %v545_v48  ;;  %v660_v25 = vmul.f32 %v4433_v53, %v639_v33  ;;  %v719_v19 = vsel %vm717_vm5, %v4518_v6, %v7920_v40 }
 0x1a0   : > { %3637 = vtanh.f32 %v4702_v13  ;;  %v613_v46 = vadd.f32 %v608_v57, %v573_v52  ;;  %v688_v43 = vmul.f32 %v4446_v62, %v679_v24  ;;  %v700_v34 = vmul.f32 %v4448_v63, %v679_v24  ;;  %v4905_v39 = vpop.permute.xlu0 %3523 }
 0x1a1   : > { %v625_v61 = vadd.f32 %v620_v15, %v585_v9  ;;  %v759_v51 = vsel %vm757_vm6, %v4598_v7, %v4596_v27  ;;  %v728_v6 = vmul.f32 %v4462_v21, %v719_v19  ;;  %v740_v62 = vmul.f32 %v4464_v22, %v719_v19 }
 0x1a2   : > { %v653_v53 = vadd.f32 %v648_v35, %v613_v46  ;;  %v799_v5 = vsel %vm797_vm7, %v4642_v60, %v4655_v41  ;;  %v768_v20 = vmul.f32 %v4466_v28, %v759_v51  ;;  %v780_v7 = vmul.f32 %v4468_v30, %v759_v51  ;;  %v7922_v60 = vld [vmem:[#allocation40_spill] sm:$0xff]  ;;  %v4909_v57 = vpop.permute.xlu1 %3528 }
 0x1a3   : > { %v665_v12 = vadd.f32 %v660_v25, %v625_v61  ;;  %v808_v22 = vmul.f32 %v4470_v31, %v799_v5  ;;  %v820_v58 = vmul.f32 %v4472_v32, %v799_v5  ;;  %v832_v30 = vmul.f32 %v4450_v8, %v7922_v60 }
 0x1a4   : > { %v693_v63 = vadd.f32 %v688_v43, %v653_v53  ;;  %v844_v14 = vmul.f32 %v4452_v16, %v7922_v60  ;;  %v4820_v8 = vadd.s32 384, %v4351_v10  ;;  %v7930_v33 = vmov 0.0  }
 0x1a5   : > { %v4707_v44 = vpop.eup %3627  ;;  %v705_v27 = vadd.f32 %v700_v34, %v665_v12  ;;  %vm2374_vm3 = vcmp.lt.s32.totalorder %v4351_v10, 56  ;;  %vm2532_vm5 = vcmp.lt.s32.totalorder %v4351_v10, 40 }
 0x1a6   : > { %v4709_v0 = vpop.eup %3629  ;;  %875 = vrot.lane.b32.xlu0 %v4707_v44, %s7641_s28  ;;  %v733_v21 = vadd.f32 %v728_v6, %v693_v63  ;;  %7926 = vst [vmem:[#allocation43_spill] sm:$0xff] %v4820_v8  ;;  %vm496_vm8 = vcmp.lt.s32.totalorder %v4820_v8, 500 }
 0x1a7   : > { %7899 = vst [vmem:[#allocation66_spill] sm:$0xff] %v4709_v0  ;;  %877 = vrot.lane.b32.xlu1 %v4709_v0, %s7641_s28  ;;  %v4715_v45 = vpop.eup %3631  ;;  %v745_v55 = vadd.f32 %v740_v62, %v705_v27 }
 0x1a8   : > { %v4717_v29 = vpop.eup %3633  ;;  %v773_v1 = vadd.f32 %v768_v20, %v733_v21 }
 0x1a9   : > { %7900 = vst [vmem:[#allocation67_spill] sm:$0xff] %v4717_v29  ;;  %v4727_v47 = vpop.eup %3635  ;;  %v785_v28 = vadd.f32 %v780_v7, %v745_v55 }
 0x1aa   : > { %879 = vrot.lane.b32.xlu0 %v4715_v45, %s7641_s28  ;;  %7903 = vst [vmem:[#allocation42_spill] sm:$0xff] %v4727_v47  ;;  %v4733_v3 = vpop.eup %3637  ;;  %v813_v41 = vadd.f32 %v808_v22, %v773_v1 }
 0x1ab   : > { %881 = vrot.lane.b32.xlu1 %v4717_v29, %s7641_s28  ;;  %7906 = vst [vmem:[#allocation41_spill] sm:$0xff] %v4733_v3  ;;  %v825_v42 = vadd.f32 %v820_v58, %v785_v28 }
 0x1ac   : > { %v4805_v31 = vadd.f32 %v832_v30, %v813_v41  ;;  %v5055_v41 = vstv %s3274_s23  ;;  %s5074_s23 = sld [smem:[#allocation8 + $0x84]] }
 0x1ad   : > { %v4807_v32 = vadd.f32 %v844_v14, %v825_v42  ;;  %7946 = vst [vmem:[#allocation69_spill] sm:$0xff] %v5055_v41  ;;  %v3515_v14 = vunpack.i.l.bf16 %v4895_v26  ;;  %v5118_v18 = vmul.f32 %v4715_v45, %v5055_v41 }
 0x1ae   : > { %883 = vrot.lane.b32.xlu0 %v4727_v47, %s7641_s28  ;;  %7923 = vst [vmem:[#allocation48_spill] sm:$0xff] %v4805_v31  ;;  %3639 = vtanh.f32 %v4805_v31 }
 0x1af   : > { %885 = vrot.lane.b32.xlu1 %v4733_v3, %s7641_s28  ;;  %7924 = vst [vmem:[#allocation47_spill] sm:$0xff] %v4807_v32  ;;  %3641 = vtanh.f32 %v4807_v32  ;;  %7957 = vst [vmem:[#allocation80_spill] sm:$0xff] %v5118_v18 }
 0x1b2   : > { %956 = vrot.lane.b32.xlu0 %v4709_v0, %s7916_s29 }
 0x1b3   : > { %954 = vrot.lane.b32.xlu1 %v4707_v44, %s7916_s29 }
 0x1b6   : > { %960 = vrot.lane.b32.xlu0 %v4717_v29, %s7916_s29 }
 0x1b7   : > { %958 = vrot.lane.b32.xlu1 %v4715_v45, %s7916_s29 }
 0x1b8   : > { %v3640_v16 = vpop.eup %3639 }
 0x1b9   : > { %v3642_v38 = vpop.eup %3641  ;;  %v4833_v49 = vsel %vm496_vm8, %v3640_v16, 0.0 }
 0x1ba   : > { %964 = vrot.lane.b32.xlu0 %v4733_v3, %s7916_s29  ;;  %7927 = vst [vmem:[#allocation44_spill] sm:$0xff] %v4833_v49  ;;  %v4837_v50 = vsel %vm496_vm8, %v3642_v38, 0.0 }
 0x1bb   : > { %962 = vrot.lane.b32.xlu1 %v4727_v47, %s7916_s29  ;;  %7928 = vst [vmem:[#allocation51_spill] sm:$0xff] %v4837_v50 }
 0x1be   : > { %1033 = vrot.lane.b32.xlu0 %v4707_v44, %s7921_s17 }
 0x1bf   : > { %1035 = vrot.lane.b32.xlu1 %v4709_v0, %s7921_s17 }
 0x1c2   : > { %1037 = vrot.lane.b32.xlu0 %v4715_v45, %s7921_s17 }
 0x1c3   : > { %1039 = vrot.lane.b32.xlu1 %v4717_v29, %s7921_s17 }
 0x1c6   : > { %1041 = vrot.lane.b32.xlu0 %v4727_v47, %s7921_s17 }
 0x1c7   : > { %1043 = vrot.lane.b32.xlu1 %v4733_v3, %s7921_s17 }
 0x1ca   : > { %1114 = vrot.lane.b32.xlu0 %v4709_v0, %s7925_s30 }
 0x1cb   : > { %1112 = vrot.lane.b32.xlu1 %v4707_v44, %s7925_s30 }
 0x1ce   : > { %1118 = vrot.lane.b32.xlu0 %v4717_v29, %s7925_s30 }
 0x1cf   : > { %1116 = vrot.lane.b32.xlu1 %v4715_v45, %s7925_s30 }
 0x1d2   : > { %1122 = vrot.lane.b32.xlu0 %v4733_v3, %s7925_s30 }
 0x1d3   : > { %1120 = vrot.lane.b32.xlu1 %v4727_v47, %s7925_s30 }
 0x1d6   : > { %887 = vrot.lane.b32.xlu0 %v4833_v49, %s7641_s28 }
 0x1d7   : > { %889 = vrot.lane.b32.xlu1 %v4837_v50, %s7641_s28 }
 0x1da   : > { %968 = vrot.lane.b32.xlu0 %v4837_v50, %s7916_s29 }
 0x1db   : > { %966 = vrot.lane.b32.xlu1 %v4833_v49, %s7916_s29  ;;  %s5003_s29 = sld [smem:[#allocation8 + $0x88]] }
 0x1de   : > { %1045 = vrot.lane.b32.xlu0 %v4833_v49, %s7921_s17 }
 0x1df   : > { %1047 = vrot.lane.b32.xlu1 %v4837_v50, %s7921_s17 }
 0x1e1   : > { %v5063_v42 = vstv %s5003_s29  ;;  %s5078_s29 = sld [smem:[#allocation8 + $0x5]] }
 0x1e2   : > { %1126 = vrot.lane.b32.xlu0 %v4837_v50, %s7925_s30  ;;  %7947 = vst [vmem:[#allocation70_spill] sm:$0xff] %v5063_v42  ;;  %v5122_v23 = vmul.f32 %v4715_v45, %v5063_v42 }
 0x1e3   : > { %1124 = vrot.lane.b32.xlu1 %v4833_v49, %s7925_s30  ;;  %s5005_s30 = sld [smem:[#allocation8 + $0x11]] }
 0x1e4   : > { %7958 = vst [vmem:[#allocation81_spill] sm:$0xff] %v5122_v23 }
 0x1e6   : > { %1191 = vrot.lane.b32.xlu0 %v4707_v44, %s7929_s19 }
 0x1e7   : > { %1193 = vrot.lane.b32.xlu1 %v4709_v0, %s7929_s19 }
 0x1e9   : > { %v5066_v16 = vstv %s5005_s30  ;;  %s5086_s30 = sld [smem:[#allocation8 + $0x85]] }
 0x1ea   : > { %1195 = vrot.lane.b32.xlu0 %v4715_v45, %s7929_s19  ;;  %7948 = vst [vmem:[#allocation71_spill] sm:$0xff] %v5066_v16 }
 0x1eb   : > { %1197 = vrot.lane.b32.xlu1 %v4717_v29, %s7929_s19 }
 0x1ee   : > { %1199 = vrot.lane.b32.xlu0 %v4727_v47, %s7929_s19 }
 0x1ef   : > { %1201 = vrot.lane.b32.xlu1 %v4733_v3, %s7929_s19 }
 0x1f2   : > { %1203 = vrot.lane.b32.xlu0 %v4833_v49, %s7929_s19 }
 0x1f3   : > { %1205 = vrot.lane.b32.xlu1 %v4837_v50, %s7929_s19 }
 0x1f6   : > { %3533 = vrot.lane.b32.xlu0 %v7930_v33, %s7929_s19 }
 0x1f7   : > { %1269 = vrot.lane.b32.xlu1 %v4707_v44, %s7931_s2 }
 0x1fa   : > { %1271 = vrot.lane.b32.xlu0 %v4709_v0, %s7931_s2 }
 0x1fb   : > { %1273 = vrot.lane.b32.xlu1 %v4715_v45, %s7931_s2 }
 0x1fe   : > { %1275 = vrot.lane.b32.xlu0 %v4717_v29, %s7931_s2 }
 0x1ff   : > { %1277 = vrot.lane.b32.xlu1 %v4727_v47, %s7931_s2 }
 0x202   : > { %1279 = vrot.lane.b32.xlu0 %v4733_v3, %s7931_s2 }
 0x203   : > { %1281 = vrot.lane.b32.xlu1 %v4833_v49, %s7931_s2 }
 0x206   : > { %1283 = vrot.lane.b32.xlu0 %v4837_v50, %s7931_s2 }
 0x207   : > { %3538 = vrot.lane.b32.xlu1 %v7930_v33, %s7931_s2  ;;  %s5007_s2 = sld [smem:[#allocation8 + $0x9]] }
 0x20a   : > { %1347 = vrot.lane.b32.xlu0 %v4707_v44, %s7932_s3 }
 0x20b   : > { %1349 = vrot.lane.b32.xlu1 %v4709_v0, %s7932_s3 }
 0x20d   : > { %v5091_v56 = vstv %s5007_s2  ;;  %s5114_s2 = sld [smem:[#allocation8 + $0x6]] }
 0x20e   : > { %1351 = vrot.lane.b32.xlu0 %v4715_v45, %s7932_s3  ;;  %7951 = vst [vmem:[#allocation74_spill] sm:$0xff] %v5091_v56 }
 0x20f   : > { %1353 = vrot.lane.b32.xlu1 %v4717_v29, %s7932_s3 }
 0x212   : > { %1355 = vrot.lane.b32.xlu0 %v4727_v47, %s7932_s3 }
 0x213   : > { %1357 = vrot.lane.b32.xlu1 %v4733_v3, %s7932_s3 }
 0x216   : > { %1359 = vrot.lane.b32.xlu0 %v4833_v49, %s7932_s3 }
 0x217   : > { %1361 = vrot.lane.b32.xlu1 %v4837_v50, %s7932_s3 }
 0x218   : > { %v4915_v37 = vpop.permute.xlu0 %875 }
 0x219   : > { %v4917_v48 = vpop.permute.xlu1 %877 }
 0x21a   : > { %3543 = vrot.lane.b32.xlu0 %v7930_v33, %s7932_s3 }
 0x21b   : > { %1425 = vrot.lane.b32.xlu1 %v4707_v44, %s7933_s24 }
 0x21c   : > { %v4923_v4 = vpop.permute.xlu0 %879 }
 0x21d   : > { %v4925_v15 = vpop.permute.xlu1 %881 }
 0x21e   : > { %1427 = vrot.lane.b32.xlu0 %v4709_v0, %s7933_s24  ;;  %v5205_v0 = vstv %s5074_s23  ;;  %s5939_s23 = sld [smem:[#allocation11 + $0x81]] }
 0x21f   : > { %1429 = vrot.lane.b32.xlu1 %v4715_v45, %s7933_s24  ;;  %v5136_v45 = vmul.f32 %v4707_v44, %v5055_v41  ;;  %v5182_v41 = vstv %s5051_s13  ;;  %7969 = vst [vmem:[#allocation92_spill] sm:$0xff] %v5205_v0  ;;  %s3979_s13 = smov 64  }
 0x220   : > { %v4931_v2 = vpop.permute.xlu0 %883  ;;  %7964 = vst [vmem:[#allocation87_spill] sm:$0xff] %v5182_v41 }
 0x221   : > { %7934 = vst [vmem:[#allocation49_spill] sm:$0xff] %v4931_v2  ;;  %v4933_v24 = vpop.permute.xlu1 %885  ;;  %7960 = vst [vmem:[#allocation83_spill] sm:$0xff] %v5136_v45  ;;  %v5195_v45 = vstv %s5058_s9  ;;  %s8074_s9 = smov 20  }
 0x222   : > { %7935 = vst [vmem:[#allocation50_spill] sm:$0xff] %v4933_v24  ;;  %1431 = vrot.lane.b32.xlu0 %v4717_v29, %s7933_s24  ;;  %v902_v29 = vsel %vm895_vm9, %v4915_v37, %v4923_v4  ;;  %7966 = vst [vmem:[#allocation89_spill] sm:$0xff] %v5195_v45 }
 0x223   : > { %1433 = vrot.lane.b32.xlu1 %v4727_v47, %s7933_s24  ;;  %v5179_v47 = vstv %s5047_s25  ;;  %s3313_s25 = sld [smem:[#allocation11 + $0x91]] }
 0x224   : > { %v4939_v52 = vpop.permute.xlu0 %956  ;;  %7963 = vst [vmem:[#allocation86_spill] sm:$0xff] %v5179_v47 }
 0x225   : > { %v4941_v35 = vpop.permute.xlu1 %954 }
 0x226   : > { %1435 = vrot.lane.b32.xlu0 %v4733_v3, %s7933_s24  ;;  %v5170_v3 = vstv %s5039_s14  ;;  %s3980_s14 = smov 56  }
 0x227   : > { %1437 = vrot.lane.b32.xlu1 %v4833_v49, %s7933_s24  ;;  %v904_v49 = vsel %vm895_vm9, %v3515_v14, %v4915_v37  ;;  %v5167_v14 = vstv %s5037_s15  ;;  %v5210_v37 = vstv %s5078_s29  ;;  %s7742_s15 = smov 48   ;;  %s5941_s29 = sld [smem:[#allocation11 + $0xa]] }
 0x228   : > { %v4947_v9 = vpop.permute.xlu0 %960  ;;  %7971 = vst [vmem:[#allocation94_spill] sm:$0xff] %v5210_v37  ;;  %v5235_v37 = vstv %s5112_s1  ;;  %s5925_s1 = sld [smem:[#allocation11]] }
 0x229   : > { %v4949_v25 = vpop.permute.xlu1 %958  ;;  %7977 = vst [vmem:[#allocation99_spill] sm:$0xff] %v5235_v37 }
 0x22a   : > { %1439 = vrot.lane.b32.xlu0 %v4837_v50, %s7933_s24  ;;  %v5140_v50 = vmul.f32 %v4707_v44, %v5063_v42  ;;  %v5161_v44 = vstv %s5033_s8  ;;  %v5173_v42 = vstv %s5041_s12  ;;  %s8067_s8 = smov 24   ;;  %s3311_s12 = sld [smem:[#allocation11 + $0x88]] }
 0x22b   : > { %3548 = vrot.lane.b32.xlu1 %v7930_v33, %s7933_s24  ;;  %s3277_s24 = sld [smem:[#allocation8 + $0x91]] }
 0x22c   : > { %v4955_v40 = vpop.permute.xlu0 %964  ;;  %7961 = vst [vmem:[#allocation84_spill] sm:$0xff] %v5140_v50  ;;  %v5192_v50 = vstv %s5053_s10  ;;  %s8076_s10 = smov 16  }
 0x22d   : > { %v4957_v19 = vpop.permute.xlu1 %962  ;;  %7965 = vst [vmem:[#allocation88_spill] sm:$0xff] %v5192_v50  ;;  %v5213_v50 = vstv %s5086_s30  ;;  %s5945_s30 = sld [smem:[#allocation11 + $0x8a]] }
 0x22e   : > { %7936 = vst [vmem:[#allocation55_spill] sm:$0xff] %v4957_v19  ;;  %3553 = vrot.lane.b32.xlu0 %v7930_v33, %s7649_s18  ;;  %s5019_s18 = sld [smem:[#allocation10 + $0x1]]  ;;  %7972 = vst [vmem:[#allocation95_spill] sm:$0xff] %v5213_v50  ;;  %v900_v50 = vsel %vm895_vm9, %v4923_v4, %v4931_v2 }
 0x22f   : > { %3558 = vrot.lane.b32.xlu1 %v7930_v33, %s7647_s26  ;;  %s5017_s26 = sld [smem:[#allocation8 + $0x80]] }
 0x230   : > { %v4961_v46 = vpop.permute.xlu0 %1033 }
 0x231   : > { %v4965_v43 = vpop.permute.xlu1 %1035  ;;  %v5068_v38 = vstv %s3277_s24  ;;  %s5088_s24 = sld [smem:[#allocation8 + $0xe]] }
 0x232   : > { %3563 = vrot.lane.b32.xlu0 %v7930_v33, %s7645_s11  ;;  %s5015_s11 = sld [smem:[#allocation10]]  ;;  %7949 = vst [vmem:[#allocation72_spill] sm:$0xff] %v5068_v38  ;;  %v5202_v38 = vstv %s5060_s27  ;;  %s5919_s27 = sld [smem:[#allocation11 + $0x9]] }
 0x233   : > { %3568 = vrot.lane.b32.xlu1 %v7930_v33, %s7643_s21  ;;  %s5013_s21 = sld [smem:[#allocation8]]  ;;  %7968 = vst [vmem:[#allocation91_spill] sm:$0xff] %v5202_v38 }
 0x234   : > { %v4969_v61 = vpop.permute.xlu0 %1037  ;;  %v5100_v32 = vstv %s5019_s18  ;;  %s5132_s18 = sld [smem:[#allocation8 + $0x7]] }
 0x235   : > { %v4973_v34 = vpop.permute.xlu1 %1039  ;;  %7954 = vst [vmem:[#allocation77_spill] sm:$0xff] %v5100_v32  ;;  %v5110_v13 = vstv %s5017_s26  ;;  %s5158_s26 = sld [smem:[#allocation8 + $0x10]] }
 0x236   : > { %3573 = vrot.lane.b32.xlu0 %v7930_v33, %s7641_s28  ;;  %s5011_s28 = sld [smem:[#allocation8 + $0x89]]  ;;  %7956 = vst [vmem:[#allocation79_spill] sm:$0xff] %v5110_v13  ;;  %v5126_v33 = vstv %s5021_s4  ;;  %s5156_s4 = sld [smem:[#allocation8 + $0x87]] }
 0x237   : > { %7959 = vst [vmem:[#allocation82_spill] sm:$0xff] %v5126_v33  ;;  %v5216_v45 = vstv %s5088_s24  ;;  %s5947_s24 = sld [smem:[#allocation11 + $0xb]] }
 0x238   : > { %v4977_v51 = vpop.permute.xlu0 %1041  ;;  %v5097_v59 = vstv %s5015_s11  ;;  %7973 = vst [vmem:[#allocation96_spill] sm:$0xff] %v5216_v45  ;;  %s5933_s11 = sld [smem:[#allocation13 + $0x1]] }
 0x239   : > { %v4979_v53 = vpop.permute.xlu1 %1043  ;;  %7953 = vst [vmem:[#allocation76_spill] sm:$0xff] %v5097_v59  ;;  %v5107_v11 = vstv %s5013_s21  ;;  %s5935_s21 = sld [smem:[#allocation11 + $0x1]] }
 0x23a   : > { %7955 = vst [vmem:[#allocation78_spill] sm:$0xff] %v5107_v11  ;;  %v908_v23 = vmul.f32 %v5107_v11, %v904_v49  ;;  %v5251_v0 = vstv %s5132_s18  ;;  %s5953_s18 = sld [smem:[#allocation11 + $0x82]] }
 0x23b   : > { %7981 = vst [vmem:[#allocation103_spill] sm:$0xff] %v5251_v0  ;;  %v5257_v37 = vstv %s5158_s26  ;;  %s5962_s26 = sld [smem:[#allocation11 + $0x83]] }
 0x23c   : > { %v4981_v6 = vpop.permute.xlu0 %1114  ;;  %v5094_v31 = vstv %s5011_s28  ;;  %s5130_s28 = sld [smem:[#allocation8 + $0x86]]  ;;  %v913_v45 = vadd.f32 %v908_v23, %v5097_v59  ;;  %v5254_v4 = vstv %s5156_s4  ;;  %7983 = vst [vmem:[#allocation105_spill] sm:$0xff] %v5257_v37  ;;  %v922_v37 = vmul.f32 %v5110_v13, %v900_v50  ;;  %s5955_s4 = sld [smem:[#allocation11 + $0x3]] }
 0x23d   : > { %v4983_v12 = vpop.permute.xlu1 %1112  ;;  %7952 = vst [vmem:[#allocation75_spill] sm:$0xff] %v5094_v31  ;;  %7982 = vst [vmem:[#allocation104_spill] sm:$0xff] %v5254_v4 }
 0x240   : > { %v4985_v62 = vpop.permute.xlu0 %1118 }
 0x241   : > { %v4987_v5 = vpop.permute.xlu1 %1116 }
 0x244   : > { %v4989_v63 = vpop.permute.xlu0 %1122 }
 0x245   : > { %v4991_v20 = vpop.permute.xlu1 %1120 }
 0x248   : > { %v4993_v27 = vpop.permute.xlu0 %887 }
 0x249   : > { %7937 = vst [vmem:[#allocation54_spill] sm:$0xff] %v4993_v27  ;;  %v4995_v7 = vpop.permute.xlu1 %889 }
 0x24a   : > { %7938 = vst [vmem:[#allocation45_spill] sm:$0xff] %v4995_v7  ;;  %v920_v7 = vmul.f32 %v5110_v13, %v904_v49  ;;  %v5219_v49 = vstv %s5102_s0  ;;  %s5923_s0 = sld [smem:[#allocation11 + $0x89]] }
 0x24b   : > { %7974 = vst [vmem:[#allocation97_spill] sm:$0xff] %v5219_v49  ;;  %v921_v49 = vmul.f32 %v5110_v13, %v902_v29 }
 0x24c   : > { %v4997_v21 = vpop.permute.xlu0 %968 }
 0x24d   : > { %7939 = vst [vmem:[#allocation52_spill] sm:$0xff] %v4997_v21  ;;  %v4999_v22 = vpop.permute.xlu1 %966  ;;  %v5164_v21 = vstv %s5035_s22  ;;  %v926_v2 = vadd.f32 %v921_v49, %v5100_v32  ;;  %s3312_s22 = sld [smem:[#allocation11 + $0x11]] }
 0x24e   : > { %7940 = vst [vmem:[#allocation46_spill] sm:$0xff] %v4999_v22  ;;  %v5176_v22 = vstv %s5045_s16  ;;  %s3310_s16 = sld [smem:[#allocation11 + $0x8]] }
 0x250   : > { %v5001_v55 = vpop.permute.xlu0 %1045 }
 0x251   : > { %7941 = vst [vmem:[#allocation53_spill] sm:$0xff] %v5001_v55  ;;  %v5009_v58 = vpop.permute.xlu1 %1047 }
 0x252   : > { %7942 = vst [vmem:[#allocation56_spill] sm:$0xff] %v5009_v58  ;;  %v5152_v58 = vstv %s5031_s7  ;;  %s8054_s7 = smov 28  }
 0x254   : > { %v5023_v1 = vpop.permute.xlu0 %1126 }
 0x255   : > { %7943 = vst [vmem:[#allocation57_spill] sm:$0xff] %v5023_v1  ;;  %v5029_v28 = vpop.permute.xlu1 %1124  ;;  %v5146_v1 = vstv %s5025_s5  ;;  %s5184_s5 = sld [smem:[#allocation8 + $0x90]] }
 0x256   : > { %7944 = vst [vmem:[#allocation40_spill] sm:$0xff] %v5029_v28  ;;  %v5149_v28 = vstv %s5027_s6  ;;  %s8044_s6 = smov 32  }
 0x258   : > { %v5043_v60 = vpop.permute.xlu0 %1191 }
 0x259   : > { %v5049_v30 = vpop.permute.xlu1 %1193 }
 0x25a   : > { %7945 = vst [vmem:[#allocation68_spill] sm:$0xff] %v5049_v30  ;;  %v5245_v30 = vstv %s5130_s28  ;;  %s5951_s28 = sld [smem:[#allocation11 + $0x2]] }
 0x25b   : > { %7979 = vst [vmem:[#allocation101_spill] sm:$0xff] %v5245_v30 }
 0x25c   : > { %v5076_v54 = vpop.permute.xlu0 %1195 }
 0x25d   : > { %v5084_v36 = vpop.permute.xlu1 %1197 }
 0x25e   : > { %7950 = vst [vmem:[#allocation73_spill] sm:$0xff] %v5084_v36 }
 0x260   : > { %v5128_v8 = vpop.permute.xlu0 %1199 }
 0x261   : > { %v5154_v55 = vpop.permute.xlu1 %1201 }
 0x262   : > { %7962 = vst [vmem:[#allocation85_spill] sm:$0xff] %v5154_v55  ;;  %v7976_v55 = vunpack.i.h.bf16 %v4895_v26  ;;  %v5242_v26 = vstv %s5114_s2  ;;  %s5949_s2 = sld [smem:[#allocation11 + $0x8b]] }
 0x263   : > { %7978 = vst [vmem:[#allocation100_spill] sm:$0xff] %v5242_v26  ;;  %v910_v26 = vmul.f32 %v5107_v11, %v900_v50 }
 0x264   : > { %v5197_v18 = vpop.permute.xlu0 %1203  ;;  %v905_v27 = vsel %vm895_vm9, %v7976_v55, %v4917_v48  ;;  %v925_v55 = vadd.f32 %v920_v7, %v5100_v32  ;;  %v7984_v7 = vunpack.i.l.bf16 %v4897_v17 }
 0x265   : > { %7967 = vst [vmem:[#allocation90_spill] sm:$0xff] %v5197_v18  ;;  %v5207_v16 = vpop.permute.xlu1 %1205  ;;  %v5222_v18 = vstv %s5104_s20  ;;  %v932_v23 = vmul.f32 %v5091_v56, %v905_v27  ;;  %v944_v0 = vmul.f32 %v5094_v31, %v905_v27  ;;  %v915_v38 = vadd.f32 %v910_v26, %v5097_v59  ;;  %s7740_s20 = smov 40  }
 0x266   : > { %7970 = vst [vmem:[#allocation93_spill] sm:$0xff] %v5207_v16  ;;  %7975 = vst [vmem:[#allocation98_spill] sm:$0xff] %v5222_v18  ;;  %v909_v16 = vmul.f32 %v5107_v11, %v902_v29  ;;  %v903_v29 = vsel %vm895_vm9, %v4917_v48, %v4925_v15  ;;  %v983_v30 = vsel %vm974_vm10, %v7984_v7, %v4941_v35 }
 0x267   : > { %v901_v48 = vsel %vm895_vm9, %v4925_v15, %v4933_v24  ;;  %v937_v11 = vadd.f32 %v932_v23, %v913_v45  ;;  %v981_v7 = vsel %vm974_vm10, %v4941_v35, %v4949_v25  ;;  %v945_v50 = vmul.f32 %v5094_v31, %v903_v29 }
 0x268   : > { %v5239_v18 = vpop.permute.xlu0 %3533  ;;  %v914_v4 = vadd.f32 %v909_v16, %v5097_v59  ;;  %v933_v16 = vmul.f32 %v5091_v56, %v903_v29  ;;  %v949_v13 = vadd.f32 %v944_v0, %v925_v55  ;;  %v987_v49 = vmul.f32 %v5126_v33, %v983_v30 }
 0x269   : > { %v5248_v36 = vpop.permute.xlu1 %1269  ;;  %v999_v15 = vmul.f32 %v5146_v1, %v983_v30  ;;  %v7986_v45 = vunpack.i.h.bf16 %v4897_v17  ;;  %v979_v23 = vsel %vm974_vm10, %v4949_v25, %v4957_v19  ;;  %v934_v0 = vmul.f32 %v5091_v56, %v901_v48 }
 0x26a   : > { %7980 = vst [vmem:[#allocation102_spill] sm:$0xff] %v5248_v36  ;;  %v5274_v36 = vstv %s5184_s5  ;;  %v927_v55 = vadd.f32 %v922_v37, %v5100_v32  ;;  %v938_v29 = vadd.f32 %v933_v16, %v914_v4  ;;  %v988_v26 = vmul.f32 %v5126_v33, %v981_v7  ;;  %s5964_s5 = sld [smem:[#allocation11 + $0xc]] }
 0x26b   : > { %7985 = vst [vmem:[#allocation106_spill] sm:$0xff] %v5274_v36  ;;  %v984_v35 = vsel %vm974_vm10, %v7986_v45, %v4939_v52  ;;  %v946_v30 = vmul.f32 %v5094_v31, %v901_v48  ;;  %v950_v17 = vadd.f32 %v945_v50, %v926_v2  ;;  %v1000_v59 = vmul.f32 %v5146_v1, %v981_v7 }
 0x26c   : > { %v5285_v27 = vpop.permute.xlu0 %1271  ;;  %v7987_v45 = vunpack.i.l.bf16 %v4905_v39  ;;  %v992_v56 = vadd.f32 %v987_v49, %v937_v11  ;;  %v1011_v37 = vmul.f32 %v5149_v28, %v984_v35  ;;  %v982_v4 = vsel %vm974_vm10, %v4939_v52, %v4947_v9 }
 0x26d   : > { %v5290_v36 = vpop.permute.xlu1 %1273  ;;  %v989_v2 = vmul.f32 %v5126_v33, %v979_v23  ;;  %v1004_v7 = vadd.f32 %v999_v15, %v949_v13  ;;  %v1023_v16 = vmul.f32 %v5152_v58, %v984_v35  ;;  %v939_v50 = vadd.f32 %v934_v0, %v915_v38 }
 0x26e   : > { %v1062_v25 = vsel %vm1053_vm11, %v7987_v45, %v4961_v46  ;;  %v1001_v45 = vmul.f32 %v5146_v1, %v979_v23  ;;  %v993_v31 = vadd.f32 %v988_v26, %v938_v29  ;;  %v951_v32 = vadd.f32 %v946_v30, %v927_v55 }
 0x26f   : > { %v1066_v11 = vmul.f32 %v5167_v14, %v1062_v25  ;;  %v1060_v49 = vsel %vm1053_vm11, %v4961_v46, %v4969_v61  ;;  %v1005_v52 = vadd.f32 %v1000_v59, %v950_v17  ;;  %v1012_v33 = vmul.f32 %v5149_v28, %v982_v4 }
 0x270   : > { %v5314_v19 = vpop.permute.xlu0 %1275  ;;  %v1024_v24 = vmul.f32 %v5152_v58, %v982_v4  ;;  %v980_v13 = vsel %vm974_vm10, %v4947_v9, %v4955_v40  ;;  %v1016_v15 = vadd.f32 %v1011_v37, %v992_v56  ;;  %v994_v35 = vadd.f32 %v989_v2, %v939_v50 }
 0x271   : > { %v5322_v48 = vpop.permute.xlu1 %1277  ;;  %v1078_v23 = vmul.f32 %v5170_v3, %v1062_v25  ;;  %v1058_v59 = vsel %vm1053_vm11, %v4969_v61, %v4977_v51  ;;  %v1028_v0 = vadd.f32 %v1023_v16, %v1004_v7  ;;  %v1006_v55 = vadd.f32 %v1001_v45, %v951_v32 }
 0x272   : > { %7988 = vst [vmem:[#allocation107_spill] sm:$0xff] %v5322_v48  ;;  %v7991_v29 = vunpack.i.h.bf16 %v4905_v39  ;;  %v1067_v56 = vmul.f32 %v5167_v14, %v1060_v49  ;;  %v1017_v26 = vadd.f32 %v1012_v33, %v993_v31  ;;  %v1013_v30 = vmul.f32 %v5149_v28, %v980_v13 }
 0x273   : > { %v1025_v17 = vmul.f32 %v5152_v58, %v980_v13  ;;  %v1071_v25 = vadd.f32 %v1066_v11, %v1016_v15  ;;  %v1029_v37 = vadd.f32 %v1024_v24, %v1005_v52  ;;  %v1061_v32 = vsel %vm1053_vm11, %v4965_v43, %v4973_v34 }
 0x274   : > { %v5337_v38 = vpop.permute.xlu0 %1279  ;;  %v1063_v9 = vsel %vm1053_vm11, %v7991_v29, %v4965_v43  ;;  %v1079_v61 = vmul.f32 %v5170_v3, %v1060_v49  ;;  %v1068_v39 = vmul.f32 %v5167_v14, %v1058_v59  ;;  %v1018_v2 = vadd.f32 %v1013_v30, %v994_v35 }
 0x275   : > { %7989 = vst [vmem:[#allocation108_spill] sm:$0xff] %v5337_v38  ;;  %v5344_v46 = vpop.permute.xlu1 %1281  ;;  %v1090_v31 = vmul.f32 %v5161_v44, %v1063_v9  ;;  %v1083_v33 = vadd.f32 %v1078_v23, %v1028_v0  ;;  %v1080_v7 = vmul.f32 %v5170_v3, %v1058_v59  ;;  %v1030_v24 = vadd.f32 %v1025_v17, %v1006_v55 }
 0x276   : > { %7990 = vst [vmem:[#allocation109_spill] sm:$0xff] %v5344_v46  ;;  %v1102_v50 = vmul.f32 %v5164_v21, %v1063_v9  ;;  %v1072_v45 = vadd.f32 %v1067_v56, %v1017_v26  ;;  %v7993_v43 = vunpack.i.l.bf16 %v4909_v57  ;;  %v1091_v49 = vmul.f32 %v5161_v44, %v1061_v32 }
 0x277   : > { %v1059_v52 = vsel %vm1053_vm11, %v4973_v34, %v4979_v53  ;;  %v1095_v13 = vadd.f32 %v1090_v31, %v1071_v25  ;;  %v1139_v15 = vsel %vm1132_vm12, %v4983_v12, %v4987_v5  ;;  %v1103_v35 = vmul.f32 %v5164_v21, %v1061_v32 }
 0x278   : > { %v5360_v4 = vpop.permute.xlu0 %1283  ;;  %v1141_v11 = vsel %vm1132_vm12, %v7993_v43, %v4983_v12  ;;  %v1084_v23 = vadd.f32 %v1079_v61, %v1029_v37  ;;  %v1073_v59 = vadd.f32 %v1068_v39, %v1018_v2  ;;  %v1137_v0 = vsel %vm1132_vm12, %v4987_v5, %v4991_v20 }
 0x279   : > { %7992 = vst [vmem:[#allocation110_spill] sm:$0xff] %v5360_v4  ;;  %v5364_v16 = vpop.permute.xlu1 %3538  ;;  %v1085_v29 = vadd.f32 %v1080_v7, %v1030_v24  ;;  %v1107_v9 = vadd.f32 %v1102_v50, %v1083_v33  ;;  %v1145_v34 = vmul.f32 %v5173_v42, %v1141_v11  ;;  %v7994_v56 = vunpack.i.h.bf16 %v4909_v57  ;;  %v8000_v4 = vld [vmem:[#allocation49_spill] sm:$0xff] }
 0x27a   : > { %v1092_v30 = vmul.f32 %v5161_v44, %v1059_v52  ;;  %v1096_v17 = vadd.f32 %v1091_v49, %v1072_v45  ;;  %v1146_v25 = vmul.f32 %v5173_v42, %v1139_v15  ;;  %v1158_v5 = vmul.f32 %v5176_v22, %v1139_v15 }
 0x27b   : > { %v1142_v12 = vsel %vm1132_vm12, %v7994_v56, %v4981_v6  ;;  %v1104_v37 = vmul.f32 %v5164_v21, %v1059_v52  ;;  %v1157_v32 = vmul.f32 %v5176_v22, %v1141_v11  ;;  %v1147_v61 = vmul.f32 %v5173_v42, %v1137_v0 }
 0x27c   : > { %v5386_v55 = vpop.permute.xlu0 %1347  ;;  %v1159_v57 = vmul.f32 %v5176_v22, %v1137_v0  ;;  %v1169_v39 = vmul.f32 %v5179_v47, %v1142_v12  ;;  %v1181_v2 = vmul.f32 %v5182_v41, %v1142_v12  ;;  %v1108_v31 = vadd.f32 %v1103_v35, %v1084_v23  ;;  %v7996_v12 = vld [vmem:[#allocation92_spill] sm:$0xff] }
 0x27d   : > { %v5394_v26 = vpop.permute.xlu1 %1349  ;;  %v1097_v33 = vadd.f32 %v1092_v30, %v1073_v59  ;;  %v1150_v24 = vadd.f32 %v1145_v34, %v1095_v13  ;;  %v1140_v50 = vsel %vm1132_vm12, %v4981_v6, %v4985_v62  ;;  %v1109_v45 = vadd.f32 %v1104_v37, %v1085_v29  ;;  %v7995_v34 = vld [vmem:[#allocation91_spill] sm:$0xff] }
 0x27e   : > { %v1217_v43 = vsel %vm517_vm0, %v5043_v60, %v5076_v54  ;;  %v1151_v49 = vadd.f32 %v1146_v25, %v1096_v17  ;;  %v1163_v52 = vadd.f32 %v1158_v5, %v1108_v31  ;;  %v1138_v13 = vsel %vm1132_vm12, %v4985_v62, %v4989_v63  ;;  %v7998_v31 = vld [vmem:[#allocation68_spill] sm:$0xff] }
 0x27f   : > { %v1215_v6 = vsel %vm517_vm0, %v5076_v54, %v5128_v8  ;;  %v1162_v15 = vadd.f32 %v1157_v32, %v1107_v9  ;;  %v1152_v35 = vadd.f32 %v1147_v61, %v1097_v33  ;;  %v1164_v23 = vadd.f32 %v1159_v57, %v1109_v45  ;;  %v7997_v57 = vld [vmem:[#allocation73_spill] sm:$0xff] }
 0x280   : > { %v5405_v7 = vpop.permute.xlu0 %1351  ;;  %v3535_v59 = vunpack.i.l.bf16 %v5239_v18  ;;  %v1170_v0 = vmul.f32 %v5179_v47, %v1140_v50  ;;  %v1182_v29 = vmul.f32 %v5182_v41, %v1140_v50  ;;  %v1224_v56 = vmul.f32 %v7995_v34, %v1217_v43 }
 0x281   : > { %v5415_v11 = vpop.permute.xlu1 %1353  ;;  %v1236_v30 = vmul.f32 %v7996_v12, %v1217_v43  ;;  %v1171_v62 = vmul.f32 %v5179_v47, %v1138_v13  ;;  %v1183_v25 = vmul.f32 %v5182_v41, %v1138_v13  ;;  %v1225_v54 = vmul.f32 %v7995_v34, %v1215_v6  ;;  %v7999_v43 = vld [vmem:[#allocation54_spill] sm:$0xff]  ;;  %v8013_v47 = vld [vmem:[#allocation101_spill] sm:$0xff] }
 0x282   : > { %v1237_v9 = vmul.f32 %v7996_v12, %v1215_v6  ;;  %v1174_v37 = vadd.f32 %v1169_v39, %v1150_v24  ;;  %v1175_v32 = vadd.f32 %v1170_v0, %v1151_v49  ;;  %v1187_v61 = vadd.f32 %v1182_v29, %v1163_v52  ;;  %v8001_v49 = vld [vmem:[#allocation85_spill] sm:$0xff]  ;;  %v8003_v0 = vld [vmem:[#allocation88_spill] sm:$0xff] }
 0x283   : > { %v1218_v33 = vsel %vm517_vm0, %v7998_v31, %v7997_v57  ;;  %v1176_v50 = vadd.f32 %v1171_v62, %v1152_v35  ;;  %v1188_v45 = vadd.f32 %v1183_v25, %v1164_v23  ;;  %v5446_v13 = vsel %vm895_vm9, %v8000_v4, %v7999_v43 }
 0x284   : > { %v5430_v17 = vpop.permute.xlu0 %1355  ;;  %v1219_v6 = vsel %vm517_vm0, %v3535_v59, %v5043_v60  ;;  %v1229_v39 = vadd.f32 %v1224_v56, %v1175_v32  ;;  %v1241_v24 = vadd.f32 %v1236_v30, %v1187_v61  ;;  %v1216_v52 = vsel %vm517_vm0, %v7997_v57, %v8001_v49  ;;  %v8005_v60 = vld [vmem:[#allocation89_spill] sm:$0xff]  ;;  %v8006_v32 = vld [vmem:[#allocation102_spill] sm:$0xff] }
 0x285   : > { %v5436_v5 = vpop.permute.xlu1 %1357  ;;  %v3536_v35 = vunpack.i.h.bf16 %v5239_v18  ;;  %v1248_v29 = vmul.f32 %v8003_v0, %v1218_v33  ;;  %v1230_v62 = vadd.f32 %v1225_v54, %v1176_v50  ;;  %v1242_v4 = vadd.f32 %v1237_v9, %v1188_v45  ;;  %v8007_v57 = vld [vmem:[#allocation78_spill] sm:$0xff] }
 0x286   : > { %v3540_v25 = vunpack.i.l.bf16 %v5364_v16  ;;  %v1260_v59 = vmul.f32 %v8005_v60, %v1218_v33  ;;  %v1223_v56 = vmul.f32 %v7995_v34, %v1219_v6  ;;  %v1235_v30 = vmul.f32 %v7996_v12, %v1219_v6 }
 0x287   : > { %v1295_v18 = vsel %vm597_vm2, %v8006_v32, %v5290_v36  ;;  %v1186_v61 = vadd.f32 %v1181_v2, %v1162_v15  ;;  %v5471_v54 = vmul.f32 %v8007_v57, %v5446_v13  ;;  %v1249_v9 = vmul.f32 %v8003_v0, %v1216_v52  ;;  %v8008_v15 = vld [vmem:[#allocation94_spill] sm:$0xff] }
 0x288   : > { %v5456_v23 = vpop.permute.xlu0 %1359  ;;  %v1261_v50 = vmul.f32 %v8005_v60, %v1216_v52  ;;  %v1220_v33 = vsel %vm517_vm0, %v3536_v35, %v7998_v31  ;;  %v1253_v45 = vadd.f32 %v1248_v29, %v1229_v39  ;;  %v1265_v6 = vadd.f32 %v1260_v59, %v1241_v24  ;;  %v8009_v24 = vld [vmem:[#allocation95_spill] sm:$0xff] }
 0x289   : > { %8002 = vst [vmem:[#allocation73_spill] sm:$0xff] %v5456_v23  ;;  %v5460_v43 = vpop.permute.xlu1 %1361  ;;  %v1302_v57 = vmul.f32 %v8008_v15, %v1295_v18  ;;  %v1254_v23 = vadd.f32 %v1249_v9, %v1230_v62  ;;  %v1297_v52 = vsel %vm597_vm2, %v3540_v25, %v8006_v32  ;;  %v1228_v31 = vadd.f32 %v1223_v56, %v1174_v37 }
 0x28a   : > { %8004 = vst [vmem:[#allocation68_spill] sm:$0xff] %v5460_v43  ;;  %v1296_v43 = vsel %vm597_vm2, %v5285_v27, %v5314_v19  ;;  %v1266_v12 = vadd.f32 %v1261_v50, %v1242_v4  ;;  %v1240_v39 = vadd.f32 %v1235_v30, %v1186_v61  ;;  %v1314_v35 = vmul.f32 %v8009_v24, %v1295_v18  ;;  %v8010_v4 = vld [vmem:[#allocation96_spill] sm:$0xff]  ;;  %v8011_v61 = vld [vmem:[#allocation97_spill] sm:$0xff] }
 0x28b   : > { %v1293_v29 = vsel %vm597_vm2, %v5290_v36, %v5322_v48  ;;  %v1247_v59 = vmul.f32 %v8003_v0, %v1220_v33  ;;  %v1259_v62 = vmul.f32 %v8005_v60, %v1220_v33  ;;  %v1326_v9 = vmul.f32 %v8010_v4, %v1296_v43 }
 0x28c   : > { %v5482_v2 = vpop.permute.xlu0 %3543  ;;  %v3541_v50 = vunpack.i.h.bf16 %v5364_v16  ;;  %v1294_v37 = vsel %vm597_vm2, %v5314_v19, %v5337_v38  ;;  %v1301_v25 = vmul.f32 %v8008_v15, %v1297_v52  ;;  %v1373_v36 = vsel %vm677_vm4, %v5386_v55, %v5405_v7 }
 0x28d   : > { %v5488_v41 = vpop.permute.xlu1 %1425  ;;  %v3545_v56 = vunpack.i.l.bf16 %v5482_v2  ;;  %v1307_v32 = vadd.f32 %v1302_v57, %v1253_v45  ;;  %v1303_v18 = vmul.f32 %v8008_v15, %v1293_v29  ;;  %v1315_v16 = vmul.f32 %v8009_v24, %v1293_v29  ;;  %v8012_v45 = vld [vmem:[#allocation100_spill] sm:$0xff] }
 0x28e   : > { %v1338_v33 = vmul.f32 %v8011_v61, %v1296_v43  ;;  %v1252_v19 = vadd.f32 %v1247_v59, %v1228_v31  ;;  %v1264_v0 = vadd.f32 %v1259_v62, %v1240_v39  ;;  %v1319_v38 = vadd.f32 %v1314_v35, %v1265_v6 }
 0x28f   : > { %v1313_v48 = vmul.f32 %v8009_v24, %v1297_v52  ;;  %v1331_v46 = vadd.f32 %v1326_v9, %v1307_v32  ;;  %v1327_v49 = vmul.f32 %v8010_v4, %v1294_v37  ;;  %v1298_v34 = vsel %vm597_vm2, %v3541_v50, %v5285_v27 }
 0x290   : > { %v5509_v30 = vpop.permute.xlu0 %1427  ;;  %v1380_v57 = vmul.f32 %v8012_v45, %v1373_v36  ;;  %v1306_v15 = vadd.f32 %v1301_v25, %v1252_v19  ;;  %v1392_v29 = vmul.f32 %v8013_v47, %v1373_v36  ;;  %v1371_v43 = vsel %vm677_vm4, %v5405_v7, %v5430_v17 }
 0x291   : > { %v1430_v60 = vpop.permute.xlu1 %1429  ;;  %v1375_v6 = vsel %vm677_vm4, %v3545_v56, %v5386_v55  ;;  %v1308_v52 = vadd.f32 %v1303_v18, %v1254_v23  ;;  %v1320_v31 = vadd.f32 %v1315_v16, %v1266_v12  ;;  %v1343_v39 = vadd.f32 %v1338_v33, %v1319_v38  ;;  %v8014_v56 = vld [vmem:[#allocation98_spill] sm:$0xff] }
 0x292   : > { %v1374_v27 = vsel %vm677_vm4, %v5394_v26, %v5415_v11  ;;  %v1339_v59 = vmul.f32 %v8011_v61, %v1294_v37  ;;  %v1318_v62 = vadd.f32 %v1313_v48, %v1264_v0  ;;  %v1325_v9 = vmul.f32 %v8010_v4, %v1298_v34  ;;  %v8015_v37 = vld [vmem:[#allocation99_spill] sm:$0xff] }
 0x293   : > { %v3546_v7 = vunpack.i.h.bf16 %v5482_v2  ;;  %v1332_v25 = vadd.f32 %v1327_v49, %v1308_v52  ;;  %v1385_v55 = vadd.f32 %v1380_v57, %v1331_v46  ;;  %v1381_v12 = vmul.f32 %v8012_v45, %v1371_v43 }
 0x294   : > { %v1432_v50 = vpop.permute.xlu0 %1431  ;;  %v1379_v38 = vmul.f32 %v8012_v45, %v1375_v6  ;;  %v1330_v23 = vadd.f32 %v1325_v9, %v1306_v15  ;;  %v1337_v36 = vmul.f32 %v8011_v61, %v1298_v34  ;;  %v1404_v32 = vmul.f32 %v8014_v56, %v1374_v27  ;;  %v8017_v9 = vld [vmem:[#allocation104_spill] sm:$0xff] }
 0x295   : > { %v5532_v35 = vpop.permute.xlu1 %1433  ;;  %v1397_v18 = vadd.f32 %v1392_v29, %v1343_v39  ;;  %v1372_v48 = vsel %vm677_vm4, %v5415_v11, %v5436_v5  ;;  %v1393_v0 = vmul.f32 %v8013_v47, %v1371_v43  ;;  %v1391_v49 = vmul.f32 %v8013_v47, %v1375_v6 }
 0x296   : > { %v1451_v46 = vsel %vm757_vm6, %v5488_v41, %v1430_v60  ;;  %v1344_v15 = vadd.f32 %v1339_v59, %v1320_v31  ;;  %v1342_v34 = vadd.f32 %v1337_v36, %v1318_v62  ;;  %v1416_v16 = vmul.f32 %v8015_v37, %v1374_v27  ;;  %v8016_v31 = vld [vmem:[#allocation103_spill] sm:$0xff] }
 0x297   : > { %v1376_v33 = vsel %vm677_vm4, %v3546_v7, %v5394_v26  ;;  %v1386_v19 = vadd.f32 %v1381_v12, %v1332_v25  ;;  %v1384_v11 = vadd.f32 %v1379_v38, %v1330_v23  ;;  %v1409_v57 = vadd.f32 %v1404_v32, %v1385_v55  ;;  %v8018_v12 = vld [vmem:[#allocation105_spill] sm:$0xff] }
 0x298   : > { %v1452_v29 = vsel %vm757_vm6, %v5509_v30, %v1432_v50  ;;  %v1405_v43 = vmul.f32 %v8014_v56, %v1372_v48  ;;  %v1417_v6 = vmul.f32 %v8015_v37, %v1372_v48  ;;  %v1421_v52 = vadd.f32 %v1416_v16, %v1397_v18  ;;  %v5562_v59 = vpop.permute.xlu0 %1435 }
 0x299   : > { %v5550_v2 = vpop.permute.xlu1 %1437  ;;  %v1458_v39 = vmul.f32 %v8016_v31, %v1451_v46  ;;  %v1398_v27 = vadd.f32 %v1393_v0, %v1344_v15  ;;  %v1403_v62 = vmul.f32 %v8014_v56, %v1376_v33  ;;  %v1396_v26 = vadd.f32 %v1391_v49, %v1342_v34  ;;  %v8019_v15 = vld [vmem:[#allocation106_spill] sm:$0xff] }
 0x29a   : > { %v1470_v7 = vmul.f32 %v8017_v9, %v1451_v46  ;;  %v1449_v55 = vsel %vm757_vm6, %v1430_v60, %v5532_v35  ;;  %v1482_v38 = vmul.f32 %v8018_v12, %v1452_v29  ;;  %v1415_v32 = vmul.f32 %v8015_v37, %v1376_v33 }
 0x29b   : > { %v1408_v18 = vadd.f32 %v1403_v62, %v1384_v11  ;;  %v1410_v48 = vadd.f32 %v1405_v43, %v1386_v19  ;;  %v1450_v0 = vsel %vm757_vm6, %v1432_v50, %v5562_v59  ;;  %v1463_v49 = vadd.f32 %v1458_v39, %v1409_v57 }
 0x29c   : > { %v1494_v46 = vmul.f32 %v8019_v15, %v1452_v29  ;;  %v1420_v16 = vadd.f32 %v1415_v32, %v1396_v26  ;;  %v1459_v33 = vmul.f32 %v8016_v31, %v1449_v55  ;;  %v1475_v43 = vadd.f32 %v1470_v7, %v1421_v52  ;;  %v8021_v32 = vld [vmem:[#allocation66_spill] sm:$0xff]  ;;  %v8022_v52 = vld [vmem:[#allocation72_spill] sm:$0xff] }
 0x29d   : > { %v3549_v25 = vpop.permute.xlu1 %3548  ;;  %v1471_v50 = vmul.f32 %v8017_v9, %v1449_v55  ;;  %v1487_v57 = vadd.f32 %v1482_v38, %v1463_v49  ;;  %v1483_v29 = vmul.f32 %v8018_v12, %v1450_v0  ;;  %v1541_v7 = vmul.f32 %v8021_v32, %v8022_v52  ;;  %v8023_v49 = vld [vmem:[#allocation45_spill] sm:$0xff] }
 0x29e   : > { %v3551_v23 = vunpack.i.h.bf16 %v3549_v25  ;;  %v3550_v36 = vunpack.i.l.bf16 %v3549_v25  ;;  %v1499_v26 = vadd.f32 %v1494_v46, %v1475_v43 }
 0x2a0   : > { %v1453_v34 = vsel %vm757_vm6, %v3550_v36, %v5488_v41  ;;  %v1454_v60 = vsel %vm757_vm6, %v3551_v23, %v5509_v30  ;;  %v1422_v30 = vadd.f32 %v1417_v6, %v1398_v27  ;;  %v1495_v23 = vmul.f32 %v8019_v15, %v1450_v0  ;;  %v8020_v36 = vld [vmem:[#allocation71_spill] sm:$0xff] }
 0x2a1   : > { %v1457_v19 = vmul.f32 %v8016_v31, %v1453_v34  ;;  %v1469_v11 = vmul.f32 %v8017_v9, %v1453_v34  ;;  %v1481_v41 = vmul.f32 %v8018_v12, %v1454_v60  ;;  %v1493_v25 = vmul.f32 %v8019_v15, %v1454_v60  ;;  %v8026_v27 = vld [vmem:[#allocation79_spill] sm:$0xff]  ;;  %v8027_v60 = vld [vmem:[#allocation80_spill] sm:$0xff] }
 0x2a2   : > { %v1529_v37 = vmul.f32 %v8021_v32, %v8020_v36  ;;  %v1464_v34 = vadd.f32 %v1459_v33, %v1410_v48  ;;  %v923_v0 = vmul.f32 %v8026_v27, %v5446_v13  ;;  %v1476_v46 = vadd.f32 %v1471_v50, %v1422_v30  ;;  %v8028_v33 = vld [vmem:[#allocation83_spill] sm:$0xff]  ;;  %v8029_v32 = vld [vmem:[#allocation84_spill] sm:$0xff]  ;;  %v8035_v13 = vld [vmem:[#allocation46_spill] sm:$0xff] }
 0x2a3   : > { %v1462_v39 = vadd.f32 %v1457_v19, %v1408_v18  ;;  %v1474_v62 = vadd.f32 %v1469_v11, %v1420_v16  ;;  %v8024_v18 = vld [vmem:[#allocation50_spill] sm:$0xff]  ;;  %v8025_v19 = vld [vmem:[#allocation76_spill] sm:$0xff]  ;;  %v1511_v11 = vadd.f32 %v8027_v60, %v1487_v57  ;;  %v8036_v50 = vld [vmem:[#allocation55_spill] sm:$0xff] }
 0x2a4   : > { %v899_v16 = vsel %vm895_vm9, %v8024_v18, %v8023_v49  ;;  %v916_v6 = vadd.f32 %v5471_v54, %v8025_v19  ;;  %v1488_v48 = vadd.f32 %v1483_v29, %v1464_v34  ;;  %v8032_v49 = vld [vmem:[#allocation69_spill] sm:$0xff]  ;;  %v8033_v18 = vld [vmem:[#allocation42_spill] sm:$0xff]  ;;  %v1500_v54 = vadd.f32 %v1495_v23, %v1476_v46 }
 0x2a5   : > { %v1486_v55 = vadd.f32 %v1481_v41, %v1462_v39  ;;  %v1498_v38 = vadd.f32 %v1493_v25, %v1474_v62  ;;  %v8030_v62 = vld [vmem:[#allocation67_spill] sm:$0xff]  ;;  %v8031_v25 = vld [vmem:[#allocation81_spill] sm:$0xff]  ;;  %v1507_v9 = vmul.f32 %v8033_v18, %v8032_v49  ;;  %v8034_v19 = vld [vmem:[#allocation74_spill] sm:$0xff]  ;;  %v977_v57 = vsel %vm974_vm10, %v8036_v50, %v8035_v13 }
 0x2a6   : > { %v1530_v41 = vmul.f32 %v8030_v62, %v8020_v36  ;;  %v1523_v15 = vadd.f32 %v8031_v25, %v1499_v26  ;;  %v935_v12 = vmul.f32 %v8034_v19, %v899_v16  ;;  %v8037_v34 = vld [vmem:[#allocation77_spill] sm:$0xff]  ;;  %v8038_v27 = vld [vmem:[#allocation70_spill] sm:$0xff]  ;;  %v8040_v13 = vld [vmem:[#allocation75_spill] sm:$0xff] }
 0x2a7   : > { %v1510_v43 = vadd.f32 %v8028_v33, %v1486_v55  ;;  %v1522_v39 = vadd.f32 %v8029_v32, %v1498_v38  ;;  %v928_v55 = vadd.f32 %v923_v0, %v8037_v34  ;;  %v1542_v38 = vmul.f32 %v8030_v62, %v8022_v52  ;;  %v8039_v46 = vld [vmem:[#allocation82_spill] sm:$0xff]  ;;  %v8042_v62 = vld [vmem:[#allocation52_spill] sm:$0xff] }
 0x2a8   : > { %v1519_v26 = vmul.f32 %v8033_v18, %v8038_v27  ;;  %v940_v60 = vadd.f32 %v935_v12, %v916_v6  ;;  %v1535_v33 = vadd.f32 %v1530_v41, %v1511_v11  ;;  %v1512_v23 = vadd.f32 %v1507_v9, %v1488_v48 }
 0x2a9   : > { %v1534_v29 = vadd.f32 %v1529_v37, %v1510_v43  ;;  %v1546_v30 = vadd.f32 %v1541_v7, %v1522_v39  ;;  %v990_v32 = vmul.f32 %v8039_v46, %v977_v57  ;;  %v1547_v25 = vadd.f32 %v1542_v38, %v1523_v15  ;;  %v8041_v7 = vld [vmem:[#allocation41_spill] sm:$0xff] }
 0x2aa   : > { %v1524_v19 = vadd.f32 %v1519_v26, %v1500_v54  ;;  %v947_v37 = vmul.f32 %v8040_v13, %v899_v16  ;;  %v1531_v0 = vmul.f32 %v8041_v7, %v8020_v36  ;;  %v1543_v43 = vmul.f32 %v8041_v7, %v8022_v52  ;;  %v8043_v16 = vld [vmem:[#allocation53_spill] sm:$0xff]  ;;  %v8052_v13 = vld [vmem:[#allocation86_spill] sm:$0xff]  ;;  %v8053_v7 = vld [vmem:[#allocation91_spill] sm:$0xff] }
 0x2ab   : > { %3643 = vtanh.f32 %v1534_v29  ;;  %v978_v9 = vsel %vm974_vm10, %v4955_v40, %v8042_v62  ;;  %v995_v6 = vadd.f32 %v990_v32, %v940_v60  ;;  %v1002_v15 = vmul.f32 %v5146_v1, %v977_v57  ;;  %v8045_v57 = vld [vmem:[#allocation56_spill] sm:$0xff]  ;;  %v8051_v32 = vld [vmem:[#allocation90_spill] sm:$0xff] }
 0x2ac   : > { %3645 = vtanh.f32 %v1546_v30  ;;  %v952_v39 = vadd.f32 %v947_v37, %v928_v55  ;;  %v1536_v12 = vadd.f32 %v1531_v0, %v1512_v23  ;;  %v1548_v11 = vadd.f32 %v1543_v43, %v1524_v19  ;;  %v8046_v55 = vld [vmem:[#allocation40_spill] sm:$0xff] }
 0x2ad   : > { %3647 = vtanh.f32 %v1535_v33  ;;  %v1056_v48 = vsel %vm1053_vm11, %v4977_v51, %v8043_v16  ;;  %v1014_v41 = vmul.f32 %v5149_v28, %v978_v9  ;;  %v1026_v1 = vmul.f32 %v5152_v58, %v978_v9  ;;  %v8057_v9 = vld [vmem:[#allocation109_spill] sm:$0xff]  ;;  %v8060_v16 = vld [vmem:[#allocation92_spill] sm:$0xff] }
 0x2ae   : > { %3649 = vtanh.f32 %v1547_v25  ;;  %v1007_v18 = vadd.f32 %v1002_v15, %v952_v39  ;;  %v1069_v50 = vmul.f32 %v5167_v14, %v1056_v48  ;;  %v1057_v51 = vsel %vm1053_vm11, %v4979_v53, %v8045_v57  ;;  %v8056_v39 = vld [vmem:[#allocation85_spill] sm:$0xff] }
 0x2af   : > { %3651 = vtanh.f32 %v1536_v12  ;;  %v1019_v54 = vadd.f32 %v1014_v41, %v995_v6  ;;  %v1081_v30 = vmul.f32 %v5170_v3, %v1056_v48  ;;  %v1135_v58 = vsel %vm1132_vm12, %v4991_v20, %v8046_v55  ;;  %v8058_v12 = vld [vmem:[#allocation107_spill] sm:$0xff]  ;;  %v8061_v41 = vld [vmem:[#allocation110_spill] sm:$0xff] }
 0x2b0   : > { %3653 = vtanh.f32 %v1548_v11  ;;  %v1031_v28 = vadd.f32 %v1026_v1, %v1007_v18  ;;  %v1093_v26 = vmul.f32 %v5161_v44, %v1057_v51  ;;  %v1148_v3 = vmul.f32 %v5173_v42, %v1135_v58  ;;  %v8050_v44 = vld [vmem:[#allocation57_spill] sm:$0xff]  ;;  %v8059_v6 = vld [vmem:[#allocation87_spill] sm:$0xff]  ;;  %v8062_v18 = vld [vmem:[#allocation108_spill] sm:$0xff] }
 0x2b1   : > { %v1074_v14 = vadd.f32 %v1069_v50, %v1019_v54  ;;  %v1105_v20 = vmul.f32 %v5164_v21, %v1057_v51  ;;  %v1136_v46 = vsel %vm1132_vm12, %v4989_v63, %v8050_v44  ;;  %v1213_v25 = vsel %vm517_vm0, %v5128_v8, %v8051_v32  ;;  %v8055_v8 = vld [vmem:[#allocation93_spill] sm:$0xff]  ;;  %v8063_v1 = vld [vmem:[#allocation88_spill] sm:$0xff]  ;;  %v8064_v51 = vld [vmem:[#allocation94_spill] sm:$0xff] }
 0x2b2   : > { %v1086_v53 = vadd.f32 %v1081_v30, %v1031_v28  ;;  %v1160_v21 = vmul.f32 %v5176_v22, %v1135_v58  ;;  %v1172_v37 = vmul.f32 %v8052_v13, %v1136_v46  ;;  %v1226_v0 = vmul.f32 %v8053_v7, %v1213_v25  ;;  %v8069_v7 = vld [vmem:[#allocation105_spill] sm:$0xff] }
 0x2b3   : > { %v1098_v60 = vadd.f32 %v1093_v26, %v1074_v14  ;;  %v1214_v62 = vsel %vm517_vm0, %v8056_v39, %v8055_v8  ;;  %v1291_v22 = vsel %vm597_vm2, %v8058_v12, %v8057_v9  ;;  %v1184_v15 = vmul.f32 %v8059_v6, %v1136_v46  ;;  %v8065_v14 = vld [vmem:[#allocation73_spill] sm:$0xff]  ;;  %v8071_v8 = vld [vmem:[#allocation104_spill] sm:$0xff]  ;;  %v8072_v39 = vld [vmem:[#allocation106_spill] sm:$0xff] }
 0x2b4   : > { %v1110_v42 = vadd.f32 %v1105_v20, %v1086_v53  ;;  %v1238_v48 = vmul.f32 %v8060_v16, %v1213_v25  ;;  %v1292_v54 = vsel %vm597_vm2, %v8062_v18, %v8061_v41  ;;  %v1250_v57 = vmul.f32 %v8063_v1, %v1214_v62  ;;  %v8066_v53 = vld [vmem:[#allocation89_spill] sm:$0xff]  ;;  %v1440_v25 = vpop.permute.xlu0 %1439  ;;  %v8073_v12 = vld [vmem:[#allocation44_spill] sm:$0xff] }
 0x2b5   : > { %v5636_v40 = vpop.eup %3643  ;;  %v1153_v19 = vadd.f32 %v1148_v3, %v1098_v60  ;;  %v1304_v28 = vmul.f32 %v8064_v51, %v1291_v22  ;;  %v1369_v30 = vsel %vm677_vm4, %v5430_v17, %v8065_v14  ;;  %v1328_v26 = vmul.f32 %v8010_v4, %v1292_v54  ;;  %v8068_v4 = vld [vmem:[#allocation68_spill] sm:$0xff]  ;;  %v5839_v14 = vpop.permute.xlu1 %3558 }
 0x2b6   : > { %v5638_v29 = vpop.eup %3645  ;;  %1575 = vrot.lane.b32.xlu0 %v5636_v40, %s8044_s6  ;;  %v1165_v63 = vadd.f32 %v1160_v21, %v1110_v42  ;;  %v1262_v60 = vmul.f32 %v8066_v53, %v1214_v62  ;;  %v1316_v20 = vmul.f32 %v8009_v24, %v1291_v22  ;;  %v1382_v44 = vmul.f32 %v8012_v45, %v1369_v30 }
 0x2b7   : > { %1577 = vrot.lane.b32.xlu1 %v5638_v29, %s8044_s6  ;;  %v5650_v34 = vpop.eup %3647  ;;  %v1177_v43 = vadd.f32 %v1172_v37, %v1153_v19  ;;  %v1340_v17 = vmul.f32 %v8011_v61, %v1292_v54  ;;  %v1370_v42 = vsel %vm677_vm4, %v5436_v5, %v8068_v4  ;;  %v1447_v24 = vsel %vm757_vm6, %v5532_v35, %v5550_v2 }
 0x2b8   : > { %v5656_v38 = vpop.eup %3649  ;;  %v1189_v50 = vadd.f32 %v1184_v15, %v1165_v63  ;;  %v1394_v61 = vmul.f32 %v8013_v47, %v1369_v30  ;;  %v1448_v21 = vsel %vm757_vm6, %v5562_v59, %v1440_v25  ;;  %v1406_v37 = vmul.f32 %v8014_v56, %v1370_v42  ;;  %v8070_v47 = vld [vmem:[#allocation99_spill] sm:$0xff] }
 0x2b9   : > { %8047 = vst [vmem:[#allocation54_spill] sm:$0xff] %v5656_v38  ;;  %v5664_v33 = vpop.eup %3651  ;;  %v1231_v11 = vadd.f32 %v1226_v0, %v1177_v43  ;;  %v1460_v5 = vmul.f32 %v8016_v31, %v1447_v24  ;;  %v1484_v0 = vmul.f32 %v8069_v7, %v1448_v21  ;;  %v1418_v63 = vmul.f32 %v8070_v47, %v1370_v42 }
 0x2ba   : > { %1579 = vrot.lane.b32.xlu0 %v5650_v34, %s8044_s6  ;;  %8048 = vst [vmem:[#allocation49_spill] sm:$0xff] %v5664_v33  ;;  %v5666_v23 = vpop.eup %3653  ;;  %v1243_v55 = vadd.f32 %v1238_v48, %v1189_v50  ;;  %v1472_v59 = vmul.f32 %v8071_v8, %v1447_v24  ;;  %v1496_v62 = vmul.f32 %v8072_v39, %v1448_v21  ;;  %v8078_v51 = vmov 0.0  }
 0x2bb   : > { %1581 = vrot.lane.b32.xlu1 %v5656_v38, %s8044_s6  ;;  %8049 = vst [vmem:[#allocation102_spill] sm:$0xff] %v5666_v23  ;;  %v1255_v58 = vadd.f32 %v1250_v57, %v1231_v11  ;;  %v1508_v22 = vmul.f32 %v8032_v49, %v8073_v12  ;;  %v8075_v11 = vld [vmem:[#allocation51_spill] sm:$0xff]  ;;  %v1520_v48 = vmul.f32 %v8038_v27, %v8073_v12  ;;  %v5829_v57 = vpop.permute.xlu0 %3553  ;;  %v5970_v47 = vstv %s3312_s22  ;;  %s5994_s22 = sld [smem:[#allocation11 + $0x84]] }
 0x2bc   : > { %v1267_v46 = vadd.f32 %v1262_v60, %v1243_v55  ;;  %v1532_v16 = vmul.f32 %v8020_v36, %v8075_v11  ;;  %v1544_v18 = vmul.f32 %v8022_v52, %v8075_v11  ;;  %v5851_v55 = vpop.permute.xlu1 %3568  ;;  %8087 = vst [vmem:[#allocation71_spill] sm:$0xff] %v5970_v47  ;;  %v6007_v11 = vstv %s5919_s27  ;;  %s6030_s27 = sld [smem:[#allocation11 + $0x8e]] }
 0x2bd   : > { %v1309_v3 = vadd.f32 %v1304_v28, %v1255_v58  ;;  %8080 = vst [vmem:[#allocation95_spill] sm:$0xff] %v5851_v55  ;;  %v6064_v39 = vstv %s5935_s21  ;;  %v6085_v8 = vstv %s5941_s29  ;;  %s6097_s21 = sld [smem:[#allocation11 + $0x87]]  ;;  %v6107_v27 = vstv %s5951_s28  ;;  %s6126_s29 = sld [smem:[#allocation11 + $0x90]] }
 0x2be   : > { %1583 = vrot.lane.b32.xlu0 %v5664_v33, %s8044_s6  ;;  %v1321_v45 = vadd.f32 %v1316_v20, %v1267_v46  ;;  %vm2295_vm2 = vcmp.lt.s32.totalorder %v4351_v10, 64  ;;  %s6771_s28 = sld [smem:[#allocation14 + $0x81]] }
 0x2bf   : > { %1585 = vrot.lane.b32.xlu1 %v5666_v23, %s8044_s6  ;;  %v1333_v32 = vadd.f32 %v1328_v26, %v1309_v3  ;;  %v5837_v28 = vpop.permute.xlu0 %3563 }
 0x2c0   : > { %v1345_v13 = vadd.f32 %v1340_v17, %v1321_v45 }
 0x2c1   : > { %v1387_v19 = vadd.f32 %v1382_v44, %v1333_v32 }
 0x2c2   : > { %1656 = vrot.lane.b32.xlu0 %v5638_v29, %s8054_s7  ;;  %v1399_v35 = vadd.f32 %v1394_v61, %v1345_v13 }
 0x2c3   : > { %1654 = vrot.lane.b32.xlu1 %v5636_v40, %s8054_s7  ;;  %v1411_v2 = vadd.f32 %v1406_v37, %v1387_v19  ;;  %v5847_v30 = vpop.permute.xlu0 %3573 }
 0x2c4   : > { %v1423_v56 = vadd.f32 %v1418_v63, %v1399_v35  ;;  %8079 = vst [vmem:[#allocation78_spill] sm:$0xff] %v5847_v30  ;;  %v5959_v35 = vstv %s3310_s16  ;;  %v5972_v63 = vstv %s3313_s25  ;;  %s5986_s16 = sld [smem:[#allocation11 + $0x8d]] }
 0x2c5   : > { %v1465_v43 = vadd.f32 %v1460_v5, %v1411_v2  ;;  %8084 = vst [vmem:[#allocation101_spill] sm:$0xff] %v5959_v35  ;;  %8088 = vst [vmem:[#allocation66_spill] sm:$0xff] %v5972_v63  ;;  %s5996_s25 = sld [smem:[#allocation11 + $0x5]]  ;;  %v6091_v2 = vstv %s5947_s24  ;;  %s2271_s24 = sld [smem:[#allocation16]] }
 0x2c6   : > { %1660 = vrot.lane.b32.xlu0 %v5656_v38, %s8054_s7  ;;  %v1477_v9 = vadd.f32 %v1472_v59, %v1423_v56  ;;  %v6088_v59 = vstv %s5945_s30  ;;  %s3316_s30 = sld [smem:[#allocation14 + $0x9]] }
 0x2c7   : > { %1658 = vrot.lane.b32.xlu1 %v5650_v34, %s8054_s7  ;;  %v1489_v31 = vadd.f32 %v1484_v0, %v1465_v43  ;;  %v5968_v0 = vstv %s3311_s12  ;;  %v3555_v43 = vunpack.i.l.bf16 %v5829_v57  ;;  %s5988_s12 = sld [smem:[#allocation11 + $0x4]] }
 0x2c8   : > { %v1501_v6 = vadd.f32 %v1496_v62, %v1477_v9  ;;  %8086 = vst [vmem:[#allocation103_spill] sm:$0xff] %v5968_v0  ;;  %v6061_v12 = vmul.f32 %v5636_v40, %v5968_v0  ;;  %v6067_v62 = vstv %s5939_s23  ;;  %s6112_s23 = sld [smem:[#allocation11 + $0x10]] }
 0x2c9   : > { %v1513_v15 = vadd.f32 %v1508_v22, %v1489_v31 }
 0x2ca   : > { %1664 = vrot.lane.b32.xlu0 %v5666_v23, %s8054_s7  ;;  %v1525_v49 = vadd.f32 %v1520_v48, %v1501_v6  ;;  %v6000_v6 = vmul.f32 %v5650_v34, %v5959_v35  ;;  %v6013_v48 = vstv %s5925_s1  ;;  %s6043_s1 = sld [smem:[#allocation11 + $0x86]]  ;;  %8096 = vst [vmem:[#allocation84_spill] sm:$0xff] %v6061_v12 }
 0x2cb   : > { %1662 = vrot.lane.b32.xlu1 %v5664_v33, %s8054_s7  ;;  %v1537_v41 = vadd.f32 %v1532_v16, %v1513_v15  ;;  %v6004_v15 = vmul.f32 %v5650_v34, %v5968_v0  ;;  %v6010_v16 = vstv %s5923_s0  ;;  %s6032_s0 = sld [smem:[#allocation11 + $0x6]]  ;;  %v6148_v12 = vstv %s5996_s25  ;;  %s3331_s25 = sld [smem:[#allocation14 + $0x84]] }
 0x2cc   : > { %v1549_v36 = vadd.f32 %v1544_v18, %v1525_v49  ;;  %8089 = vst [vmem:[#allocation72_spill] sm:$0xff] %v6000_v6  ;;  %v6118_v6 = vstv %s5962_s26  ;;  %8105 = vst [vmem:[#allocation70_spill] sm:$0xff] %v6148_v12  ;;  %s6839_s26 = sld [smem:[#allocation14 + $0x82]] }
 0x2cd   : > { %3655 = vtanh.f32 %v1537_v41  ;;  %8090 = vst [vmem:[#allocation45_spill] sm:$0xff] %v6004_v15  ;;  %v6115_v15 = vstv %s5955_s4  ;;  %s6837_s4 = sld [smem:[#allocation14 + $0x2]] }
 0x2ce   : > { %1733 = vrot.lane.b32.xlu0 %v5636_v40, %s8067_s8  ;;  %3657 = vtanh.f32 %v1549_v36 }
 0x2cf   : > { %1735 = vrot.lane.b32.xlu1 %v5638_v29, %s8067_s8 }
 0x2d0   : > { %v6169_v12 = vstv %s6043_s1  ;;  %s3334_s1 = sld [smem:[#allocation14 + $0x5]] }
 0x2d1   : > { %8111 = vst [vmem:[#allocation53_spill] sm:$0xff] %v6169_v12 }
 0x2d2   : > { %1737 = vrot.lane.b32.xlu0 %v5650_v34, %s8067_s8 }
 0x2d3   : > { %1739 = vrot.lane.b32.xlu1 %v5656_v38, %s8067_s8 }
 0x2d6   : > { %1741 = vrot.lane.b32.xlu0 %v5664_v33, %s8067_s8 }
 0x2d7   : > { %1743 = vrot.lane.b32.xlu1 %v5666_v23, %s8067_s8  ;;  %v3656_v52 = vpop.eup %3655 }
 0x2d8   : > { %v5785_v54 = vsel %vm496_vm8, %v3656_v52, 0.0  ;;  %v3658_v50 = vpop.eup %3657 }
 0x2d9   : > { %v5793_v1 = vsel %vm496_vm8, %v3658_v50, 0.0  ;;  %v6036_v36 = vmul.f32 %v5959_v35, %v5785_v54  ;;  %v6040_v52 = vmul.f32 %v5968_v0, %v5785_v54 }
 0x2da   : > { %1814 = vrot.lane.b32.xlu0 %v5638_v29, %s8074_s9  ;;  %v6049_v50 = vmul.f32 %v5970_v47, %v5793_v1  ;;  %v6053_v9 = vmul.f32 %v5972_v63, %v5793_v1 }
 0x2db   : > { %1812 = vrot.lane.b32.xlu1 %v5636_v40, %s8074_s9  ;;  %8091 = vst [vmem:[#allocation50_spill] sm:$0xff] %v6036_v36  ;;  %8092 = vst [vmem:[#allocation76_spill] sm:$0xff] %v6040_v52  ;;  %v6157_v36 = vstv %s6030_s27  ;;  %s3332_s27 = sld [smem:[#allocation14 + $0xd]] }
 0x2dc   : > { %8093 = vst [vmem:[#allocation79_spill] sm:$0xff] %v6049_v50  ;;  %8094 = vst [vmem:[#allocation80_spill] sm:$0xff] %v6053_v9  ;;  %v6143_v9 = vstv %s5994_s22  ;;  %s3330_s22 = sld [smem:[#allocation14 + $0x4]] }
 0x2dd   : > { %8108 = vst [vmem:[#allocation41_spill] sm:$0xff] %v6157_v36  ;;  %v6196_v36 = vstv %s6097_s21  ;;  %s3346_s21 = sld [smem:[#allocation14 + $0x8]] }
 0x2de   : > { %1818 = vrot.lane.b32.xlu0 %v5656_v38, %s8074_s9  ;;  %8115 = vst [vmem:[#allocation90_spill] sm:$0xff] %v6196_v36 }
 0x2df   : > { %1816 = vrot.lane.b32.xlu1 %v5650_v34, %s8074_s9 }
 0x2e2   : > { %1822 = vrot.lane.b32.xlu0 %v5666_v23, %s8074_s9 }
 0x2e3   : > { %1820 = vrot.lane.b32.xlu1 %v5664_v33, %s8074_s9 }
 0x2e6   : > { %1891 = vrot.lane.b32.xlu0 %v5636_v40, %s8076_s10 }
 0x2e7   : > { %1893 = vrot.lane.b32.xlu1 %v5638_v29, %s8076_s10 }
 0x2ea   : > { %1895 = vrot.lane.b32.xlu0 %v5650_v34, %s8076_s10 }
 0x2eb   : > { %1897 = vrot.lane.b32.xlu1 %v5656_v38, %s8076_s10 }
 0x2ee   : > { %1899 = vrot.lane.b32.xlu0 %v5664_v33, %s8076_s10 }
 0x2ef   : > { %1901 = vrot.lane.b32.xlu1 %v5666_v23, %s8076_s10 }
 0x2f2   : > { %1587 = vrot.lane.b32.xlu0 %v5785_v54, %s8044_s6 }
 0x2f3   : > { %1969 = vrot.lane.b32.xlu1 %v5636_v40, %s7921_s17 }
 0x2f6   : > { %1668 = vrot.lane.b32.xlu0 %v5793_v1, %s8054_s7 }
 0x2f7   : > { %1589 = vrot.lane.b32.xlu1 %v5793_v1, %s8044_s6 }
 0x2fa   : > { %1745 = vrot.lane.b32.xlu0 %v5785_v54, %s8067_s8 }
 0x2fb   : > { %1666 = vrot.lane.b32.xlu1 %v5785_v54, %s8054_s7  ;;  %s5978_s7 = sld [smem:[#allocation11 + $0x8c]] }
 0x2fe   : > { %1826 = vrot.lane.b32.xlu0 %v5793_v1, %s8074_s9 }
 0x2ff   : > { %1747 = vrot.lane.b32.xlu1 %v5793_v1, %s8067_s8 }
 0x302   : > { %1903 = vrot.lane.b32.xlu0 %v5785_v54, %s8076_s10 }
 0x303   : > { %1824 = vrot.lane.b32.xlu1 %v5785_v54, %s8074_s9  ;;  %s5980_s9 = sld [smem:[#allocation11 + $0xd]] }
 0x306   : > { %1971 = vrot.lane.b32.xlu0 %v5638_v29, %s7921_s17 }
 0x307   : > { %1905 = vrot.lane.b32.xlu1 %v5793_v1, %s8076_s10 }
 0x30a   : > { %1975 = vrot.lane.b32.xlu0 %v5656_v38, %s7921_s17 }
 0x30b   : > { %1973 = vrot.lane.b32.xlu1 %v5650_v34, %s7921_s17 }
 0x30e   : > { %1979 = vrot.lane.b32.xlu0 %v5666_v23, %s7921_s17 }
 0x30f   : > { %1977 = vrot.lane.b32.xlu1 %v5664_v33, %s7921_s17 }
 0x312   : > { %1983 = vrot.lane.b32.xlu0 %v5793_v1, %s7921_s17 }
 0x313   : > { %1981 = vrot.lane.b32.xlu1 %v5785_v54, %s7921_s17 }
 0x316   : > { %2055 = vrot.lane.b32.xlu0 %v5664_v33, %s7929_s19 }
 0x317   : > { %3578 = vrot.lane.b32.xlu1 %v8078_v51, %s7921_s17  ;;  %s5927_s17 = sld [smem:[#allocation13]] }
 0x31a   : > { %2047 = vrot.lane.b32.xlu0 %v5636_v40, %s7929_s19 }
 0x31b   : > { %2059 = vrot.lane.b32.xlu1 %v5785_v54, %s7929_s19 }
 0x31d   : > { %v6025_v18 = vstv %s5927_s17  ;;  %s6045_s17 = sld [smem:[#allocation11 + $0xf]] }
 0x31e   : > { %3583 = vrot.lane.b32.xlu0 %v8078_v51, %s7929_s19 }
 0x31f   : > { %2051 = vrot.lane.b32.xlu1 %v5650_v34, %s7929_s19 }
 0x322   : > { %2061 = vrot.lane.b32.xlu0 %v5793_v1, %s7929_s19 }
 0x323   : > { %2057 = vrot.lane.b32.xlu1 %v5666_v23, %s7929_s19 }
 0x326   : > { %2053 = vrot.lane.b32.xlu0 %v5656_v38, %s7929_s19 }
 0x327   : > { %2049 = vrot.lane.b32.xlu1 %v5638_v29, %s7929_s19 }
 0x328   : > { %v5857_v58 = vpop.permute.xlu0 %1575 }
 0x329   : > { %v5859_v26 = vpop.permute.xlu1 %1577  ;;  %v1604_v31 = vsel %vm1595_vm13, %v3555_v43, %v5857_v58  ;;  %v6104_v43 = vstv %s5949_s2  ;;  %s3314_s2 = sld [smem:[#allocation16 + $0x1]] }
 0x32a   : > { %2137 = vrot.lane.b32.xlu0 %v5785_v54, %s7932_s3  ;;  %v6057_v54 = vmul.f32 %v5636_v40, %v5959_v35  ;;  %v1608_v0 = vmul.f32 %v6013_v48, %v1604_v31 }
 0x32b   : > { %2133 = vrot.lane.b32.xlu1 %v5664_v33, %s7932_s3  ;;  %v6136_v33 = vstv %s5988_s12  ;;  %s3329_s12 = sld [smem:[#allocation14 + $0x8c]] }
 0x32c   : > { %v5865_v53 = vpop.permute.xlu0 %1579  ;;  %8095 = vst [vmem:[#allocation83_spill] sm:$0xff] %v6057_v54  ;;  %v1613_v30 = vadd.f32 %v1608_v0, %v6025_v18 }
 0x32d   : > { %v5867_v60 = vpop.permute.xlu1 %1581 }
 0x32e   : > { %2129 = vrot.lane.b32.xlu0 %v5650_v34, %s7932_s3  ;;  %v6028_v34 = vstv %s5933_s11  ;;  %s6095_s11 = sld [smem:[#allocation11 + $0x7]] }
 0x32f   : > { %2125 = vrot.lane.b32.xlu1 %v5636_v40, %s7932_s3  ;;  %v6079_v40 = vmul.f32 %v5638_v29, %v5972_v63  ;;  %v6121_v63 = vstv %s5964_s5  ;;  %s6844_s5 = sld [smem:[#allocation14 + $0xb]] }
 0x330   : > { %v5873_v3 = vpop.permute.xlu0 %1583 }
 0x331   : > { %v5875_v20 = vpop.permute.xlu1 %1585  ;;  %8099 = vst [vmem:[#allocation69_spill] sm:$0xff] %v6079_v40 }
 0x332   : > { %2135 = vrot.lane.b32.xlu0 %v5666_v23, %s7932_s3  ;;  %v6110_v23 = vstv %s5953_s18  ;;  %s6784_s18 = sld [smem:[#allocation14 + $0x8a]] }
 0x333   : > { %3588 = vrot.lane.b32.xlu1 %v8078_v51, %s7932_s3 }
 0x334   : > { %v5881_v44 = vpop.permute.xlu0 %1656 }
 0x335   : > { %v5883_v46 = vpop.permute.xlu1 %1654 }
 0x336   : > { %2127 = vrot.lane.b32.xlu0 %v5638_v29, %s7932_s3 }
 0x337   : > { %2139 = vrot.lane.b32.xlu1 %v5793_v1, %s7932_s3  ;;  %v6075_v1 = vmul.f32 %v5638_v29, %v5970_v47  ;;  %v1602_v29 = vsel %vm1595_vm13, %v5857_v58, %v5865_v53  ;;  %v6124_v58 = vstv %s5978_s7  ;;  %v6133_v47 = vstv %s5986_s16  ;;  %s6853_s7 = sld [smem:[#allocation14 + $0x8b]]  ;;  %s3328_s16 = sld [smem:[#allocation14 + $0xc]] }
 0x338   : > { %v5889_v32 = vpop.permute.xlu0 %1660  ;;  %8102 = vst [vmem:[#allocation46_spill] sm:$0xff] %v6133_v47 }
 0x339   : > { %v5891_v17 = vpop.permute.xlu1 %1658  ;;  %8098 = vst [vmem:[#allocation81_spill] sm:$0xff] %v6075_v1  ;;  %v1609_v1 = vmul.f32 %v6013_v48, %v1602_v29 }
 0x33a   : > { %3593 = vrot.lane.b32.xlu0 %v8078_v51, %s3979_s13 }
 0x33b   : > { %2131 = vrot.lane.b32.xlu1 %v5656_v38, %s7932_s3  ;;  %s5929_s3 = sld [smem:[#allocation11 + $0x80]]  ;;  %v6130_v38 = vstv %s5980_s9  ;;  %s3327_s9 = sld [smem:[#allocation14 + $0x83]] }
 0x33c   : > { %v5897_v25 = vpop.permute.xlu0 %1664  ;;  %8101 = vst [vmem:[#allocation74_spill] sm:$0xff] %v6130_v38 }
 0x33d   : > { %v5899_v4 = vpop.permute.xlu1 %1662 }
 0x33e   : > { %3613 = vrot.lane.b32.xlu0 %v8078_v51, %s8044_s6 }
 0x33f   : > { %3598 = vrot.lane.b32.xlu1 %v8078_v51, %s3980_s14 }
 0x340   : > { %v5905_v42 = vpop.permute.xlu0 %1733 }
 0x341   : > { %v5907_v24 = vpop.permute.xlu1 %1735  ;;  %v6016_v49 = vstv %s5929_s3  ;;  %s6071_s3 = sld [smem:[#allocation11 + $0x8f]] }
 0x342   : > { %v1620_v40 = vmul.f32 %v6016_v49, %v1604_v31  ;;  %v8110_v31 = vunpack.i.h.bf16 %v5829_v57  ;;  %v1600_v57 = vsel %vm1595_vm13, %v5865_v53, %v5873_v3  ;;  %v8116_v53 = vunpack.i.l.bf16 %v5839_v14 }
 0x343   : > { %3603 = vrot.lane.b32.xlu1 %v8078_v51, %s7742_s15  ;;  %s6022_s15 = sld [smem:[#allocation11 + $0xe]] }
 0x344   : > { %v5911_v45 = vpop.permute.xlu0 %1737  ;;  %v1625_v12 = vadd.f32 %v1620_v40, %v6028_v34 }
 0x345   : > { %v5913_v19 = vpop.permute.xlu1 %1739 }
 0x347   : > { %3608 = vrot.lane.b32.xlu1 %v8078_v51, %s7740_s20  ;;  %s6020_s20 = sld [smem:[#allocation11 + $0x85]] }
 0x348   : > { %v5917_v61 = vpop.permute.xlu0 %1741 }
 0x349   : > { %v5921_v21 = vpop.permute.xlu1 %1743  ;;  %v6154_v52 = vstv %s6022_s15  ;;  %s8167_s15 = smov 48  }
 0x34a   : > { %8107 = vst [vmem:[#allocation75_spill] sm:$0xff] %v6154_v52 }
 0x34b   : > { %3618 = vrot.lane.b32.xlu1 %v8078_v51, %s8067_s8 }
 0x34c   : > { %v5937_v13 = vpop.permute.xlu0 %1814 }
 0x34d   : > { %8081 = vst [vmem:[#allocation96_spill] sm:$0xff] %v5937_v13  ;;  %v5943_v37 = vpop.permute.xlu1 %1812  ;;  %v6151_v54 = vstv %s6020_s20  ;;  %v1622_v13 = vmul.f32 %v6016_v49, %v1600_v57  ;;  %s8168_s20 = smov 40  }
 0x34e   : > { %8082 = vst [vmem:[#allocation97_spill] sm:$0xff] %v5943_v37  ;;  %8106 = vst [vmem:[#allocation82_spill] sm:$0xff] %v6151_v54  ;;  %v6172_v54 = vstv %s6045_s17  ;;  %v8119_v37 = vunpack.i.h.bf16 %v5839_v14  ;;  %v1681_v14 = vsel %vm1674_vm14, %v5883_v46, %v5891_v17  ;;  %s3335_s17 = sld [smem:[#allocation14 + $0x85]] }
 0x34f   : > { %8112 = vst [vmem:[#allocation56_spill] sm:$0xff] %v6172_v54  ;;  %v1614_v54 = vadd.f32 %v1609_v1, %v6025_v18 }
 0x350   : > { %v5957_v5 = vpop.permute.xlu0 %1818 }
 0x351   : > { %8083 = vst [vmem:[#allocation100_spill] sm:$0xff] %v5957_v5  ;;  %v5966_v7 = vpop.permute.xlu1 %1816  ;;  %v6206_v5 = vstv %s6112_s23  ;;  %s3347_s23 = sld [smem:[#allocation14 + $0x88]] }
 0x352   : > { %8085 = vst [vmem:[#allocation98_spill] sm:$0xff] %v5966_v7  ;;  %8117 = vst [vmem:[#allocation86_spill] sm:$0xff] %v6206_v5  ;;  %v6212_v7 = vstv %s6126_s29  ;;  %s3348_s29 = sld [smem:[#allocation14 + $0x11]] }
 0x353   : > { %8118 = vst [vmem:[#allocation91_spill] sm:$0xff] %v6212_v7 }
 0x354   : > { %v5992_v22 = vpop.permute.xlu0 %1822 }
 0x355   : > { %v6018_v41 = vpop.permute.xlu1 %1820 }
 0x358   : > { %v6069_v56 = vpop.permute.xlu0 %1891 }
 0x359   : > { %8097 = vst [vmem:[#allocation67_spill] sm:$0xff] %v6069_v56  ;;  %v6093_v51 = vpop.permute.xlu1 %1893  ;;  %v6193_v56 = vstv %s6095_s11  ;;  %s3337_s11 = sld [smem:[#allocation14 + $0x8e]] }
 0x35a   : > { %8100 = vst [vmem:[#allocation42_spill] sm:$0xff] %v6093_v51  ;;  %v6160_v51 = vstv %s6032_s0  ;;  %8114 = vst [vmem:[#allocation57_spill] sm:$0xff] %v6193_v56  ;;  %v1610_v56 = vmul.f32 %v6013_v48, %v1600_v57  ;;  %v1627_v57 = vadd.f32 %v1622_v13, %v6028_v34  ;;  %v1682_v13 = vsel %vm1674_vm14, %v5881_v44, %v5889_v32  ;;  %s3333_s0 = sld [smem:[#allocation14 + $0x8d]] }
 0x35b   : > { %8109 = vst [vmem:[#allocation52_spill] sm:$0xff] %v6160_v51  ;;  %v1603_v51 = vsel %vm1595_vm13, %v5859_v26, %v5867_v60 }
 0x35c   : > { %v6138_v35 = vpop.permute.xlu0 %1895  ;;  %v1633_v1 = vmul.f32 %v6007_v11, %v1603_v51  ;;  %v1645_v36 = vmul.f32 %v6010_v16, %v1603_v51 }
 0x35d   : > { %8103 = vst [vmem:[#allocation55_spill] sm:$0xff] %v6138_v35  ;;  %v6145_v50 = vpop.permute.xlu1 %1897  ;;  %v1605_v35 = vsel %vm1595_vm13, %v8110_v31, %v5859_v26 }
 0x35e   : > { %8104 = vst [vmem:[#allocation77_spill] sm:$0xff] %v6145_v50  ;;  %v1621_v50 = vmul.f32 %v6016_v49, %v1602_v29  ;;  %v6186_v29 = vstv %s6071_s3  ;;  %v1632_v26 = vmul.f32 %v6007_v11, %v1605_v35  ;;  %v1644_v52 = vmul.f32 %v6010_v16, %v1605_v35  ;;  %s3336_s3 = sld [smem:[#allocation14 + $0xe]] }
 0x35f   : > { %8113 = vst [vmem:[#allocation40_spill] sm:$0xff] %v6186_v29  ;;  %v1683_v29 = vsel %vm1674_vm14, %v8116_v53, %v5883_v46  ;;  %v1601_v35 = vsel %vm1595_vm13, %v5867_v60, %v5875_v20  ;;  %v1638_v55 = vadd.f32 %v1633_v1, %v1614_v54  ;;  %v1684_v60 = vsel %vm1674_vm14, %v8119_v37, %v5881_v44 }
 0x360   : > { %v6183_v31 = vpop.permute.xlu0 %1899  ;;  %v1626_v40 = vadd.f32 %v1621_v50, %v6028_v34  ;;  %v1637_v53 = vadd.f32 %v1632_v26, %v1613_v30  ;;  %v1649_v5 = vadd.f32 %v1644_v52, %v1625_v12  ;;  %v1687_v38 = vmul.f32 %v6064_v39, %v1683_v29 }
 0x361   : > { %v6190_v0 = vpop.permute.xlu1 %1901  ;;  %v1699_v51 = vmul.f32 %v6067_v62, %v1683_v29  ;;  %v1634_v52 = vmul.f32 %v6007_v11, %v1601_v35  ;;  %v1646_v54 = vmul.f32 %v6010_v16, %v1601_v35  ;;  %v1711_v29 = vmul.f32 %v6085_v8, %v1684_v60 }
 0x362   : > { %v1688_v26 = vmul.f32 %v6064_v39, %v1681_v14  ;;  %v1700_v1 = vmul.f32 %v6067_v62, %v1681_v14  ;;  %v1723_v35 = vmul.f32 %v6088_v59, %v1684_v60 }
 0x364   : > { %v1588_v47 = vpop.permute.xlu0 %1587 }
 0x365   : > { %v6221_v50 = vpop.permute.xlu1 %1969  ;;  %v1598_v7 = vsel %vm1595_vm13, %v5873_v3, %v1588_v47  ;;  %v1615_v3 = vadd.f32 %v1610_v56, %v6025_v18  ;;  %v1650_v47 = vadd.f32 %v1645_v36, %v1626_v40  ;;  %v1704_v36 = vadd.f32 %v1699_v51, %v1649_v5 }
 0x366   : > { %v1611_v30 = vmul.f32 %v6013_v48, %v1598_v7  ;;  %v1623_v12 = vmul.f32 %v6016_v49, %v1598_v7  ;;  %v1692_v49 = vadd.f32 %v1687_v38, %v1637_v53  ;;  %v1712_v5 = vmul.f32 %v6085_v8, %v1682_v13 }
 0x367   : > { %v1639_v53 = vadd.f32 %v1634_v52, %v1615_v3  ;;  %v1651_v51 = vadd.f32 %v1646_v54, %v1627_v57  ;;  %v1728_v60 = vadd.f32 %v1723_v35, %v1704_v36  ;;  %v1693_v54 = vadd.f32 %v1688_v26, %v1638_v55 }
 0x368   : > { %v1616_v37 = vadd.f32 %v1611_v30, %v6025_v18  ;;  %v1628_v7 = vadd.f32 %v1623_v12, %v6028_v34  ;;  %v1669_v48 = vpop.permute.xlu0 %1668  ;;  %v1680_v12 = vsel %vm1674_vm14, %v5889_v32, %v5897_v25  ;;  %v1705_v3 = vadd.f32 %v1700_v1, %v1650_v47 }
 0x369   : > { %v1590_v56 = vpop.permute.xlu1 %1589  ;;  %v1678_v46 = vsel %vm1674_vm14, %v5897_v25, %v1669_v48  ;;  %v1716_v48 = vadd.f32 %v1711_v29, %v1692_v49  ;;  %v1713_v25 = vmul.f32 %v6085_v8, %v1680_v12 }
 0x36a   : > { %v1599_v18 = vsel %vm1595_vm13, %v5875_v20, %v1590_v56  ;;  %v1714_v34 = vmul.f32 %v6085_v8, %v1678_v46  ;;  %v1726_v38 = vmul.f32 %v6088_v59, %v1678_v46  ;;  %v1679_v20 = vsel %vm1674_vm14, %v5891_v17, %v5899_v4 }
 0x36b   : > { %v1635_v44 = vmul.f32 %v6007_v11, %v1599_v18  ;;  %v1647_v40 = vmul.f32 %v6010_v16, %v1599_v18  ;;  %v1724_v56 = vmul.f32 %v6088_v59, %v1682_v13  ;;  %v1689_v46 = vmul.f32 %v6064_v39, %v1679_v20 }
 0x36c   : > { %v1746_v30 = vpop.permute.xlu0 %1745  ;;  %v1701_v32 = vmul.f32 %v6067_v62, %v1679_v20  ;;  %v1725_v8 = vmul.f32 %v6088_v59, %v1680_v12 }
 0x36d   : > { %v1640_v11 = vadd.f32 %v1635_v44, %v1616_v37  ;;  %v1652_v14 = vadd.f32 %v1647_v40, %v1628_v7  ;;  %v1667_v16 = vpop.permute.xlu1 %1666  ;;  %v1756_v37 = vsel %vm1753_vm15, %v5917_v61, %v1746_v30  ;;  %v1717_v40 = vadd.f32 %v1712_v5, %v1693_v54 }
 0x36e   : > { %v1677_v52 = vsel %vm1674_vm14, %v5899_v4, %v1667_v16  ;;  %v8120_v4 = vunpack.i.l.bf16 %v5837_v28  ;;  %v1769_v1 = vmul.f32 %v6107_v27, %v1756_v37  ;;  %v1781_v44 = vmul.f32 %v6110_v23, %v1756_v37 }
 0x36f   : > { %v1690_v17 = vmul.f32 %v6064_v39, %v1677_v52  ;;  %v1702_v57 = vmul.f32 %v6067_v62, %v1677_v52  ;;  %v1694_v35 = vadd.f32 %v1689_v46, %v1639_v53  ;;  %v1706_v30 = vadd.f32 %v1701_v32, %v1651_v51 }
 0x370   : > { %v1827_v7 = vpop.permute.xlu0 %1826  ;;  %v1762_v55 = vsel %vm1753_vm15, %v8120_v4, %v5905_v42  ;;  %v1760_v5 = vsel %vm1753_vm15, %v5905_v42, %v5911_v45 }
 0x371   : > { %v1695_v47 = vadd.f32 %v1690_v17, %v1640_v11  ;;  %v1707_v49 = vadd.f32 %v1702_v57, %v1652_v14  ;;  %v1748_v29 = vpop.permute.xlu1 %1747  ;;  %v1836_v39 = vsel %vm1832_vm1, %v5992_v22, %v1827_v7  ;;  %v1766_v20 = vmul.f32 %v6107_v27, %v1762_v55 }
 0x372   : > { %v1757_v62 = vsel %vm1753_vm15, %v5921_v21, %v1748_v29  ;;  %v1872_v13 = vmul.f32 %v6121_v63, %v1836_v39  ;;  %v1884_v36 = vmul.f32 %v6124_v58, %v1836_v39  ;;  %v1729_v17 = vadd.f32 %v1724_v56, %v1705_v3 }
 0x373   : > { %v1719_v18 = vadd.f32 %v1714_v34, %v1695_v47  ;;  %v1731_v26 = vadd.f32 %v1726_v38, %v1707_v49  ;;  %v1793_v14 = vmul.f32 %v6091_v2, %v1757_v62  ;;  %v1805_v16 = vmul.f32 %v6104_v43, %v1757_v62 }
 0x374   : > { %v1904_v59 = vpop.permute.xlu0 %1903  ;;  %v8121_v34 = vunpack.i.h.bf16 %v5837_v28  ;;  %v1718_v3 = vadd.f32 %v1713_v25, %v1694_v35  ;;  %v1730_v28 = vadd.f32 %v1725_v8, %v1706_v30  ;;  %v1778_v46 = vmul.f32 %v6110_v23, %v1762_v55 }
 0x375   : > { %v1774_v12 = vadd.f32 %v1769_v1, %v1719_v18  ;;  %v1786_v11 = vadd.f32 %v1781_v44, %v1731_v26  ;;  %v1825_v52 = vpop.permute.xlu1 %1824  ;;  %v1913_v32 = vsel %vm895_vm9, %v6183_v31, %v1904_v59  ;;  %v1771_v42 = vadd.f32 %v1766_v20, %v1716_v48  ;;  %v8123_v1 = vld [vmem:[#allocation95_spill] sm:$0xff] }
 0x376   : > { %v1763_v38 = vsel %vm1753_vm15, %v8121_v34, %v5907_v24  ;;  %v1835_v53 = vsel %vm1832_vm1, %v6018_v41, %v1825_v52  ;;  %v1758_v7 = vsel %vm1753_vm15, %v5911_v45, %v5917_v61  ;;  %v1761_v25 = vsel %vm1753_vm15, %v5907_v24, %v5913_v19  ;;  %v8122_v24 = vld [vmem:[#allocation97_spill] sm:$0xff] }
 0x377   : > { %v1798_v51 = vadd.f32 %v1793_v14, %v1774_v12  ;;  %v1810_v54 = vadd.f32 %v1805_v16, %v1786_v11  ;;  %v1848_v57 = vmul.f32 %v6115_v15, %v1835_v53  ;;  %v1860_v56 = vmul.f32 %v6118_v6, %v1835_v53  ;;  %v8126_v12 = vld [vmem:[#allocation46_spill] sm:$0xff] }
 0x378   : > { %v6322_v37 = vpop.permute.xlu0 %1971  ;;  %v1767_v55 = vmul.f32 %v6107_v27, %v1760_v5  ;;  %v1779_v29 = vmul.f32 %v6110_v23, %v1760_v5  ;;  %v1926_v45 = vmul.f32 %v6136_v33, %v1913_v32  ;;  %v1938_v61 = vmul.f32 %v6143_v9, %v1913_v32 }
 0x379   : > { %v1853_v4 = vadd.f32 %v1848_v57, %v1798_v51  ;;  %v1865_v47 = vadd.f32 %v1860_v56, %v1810_v54  ;;  %v1906_v49 = vpop.permute.xlu1 %1905  ;;  %v1783_v62 = vadd.f32 %v1778_v46, %v1728_v60  ;;  %v1768_v18 = vmul.f32 %v6107_v27, %v1758_v7  ;;  %v8127_v56 = vld [vmem:[#allocation96_spill] sm:$0xff] }
 0x37a   : > { %v1914_v48 = vsel %vm895_vm9, %v6190_v0, %v1906_v49  ;;  %v1780_v26 = vmul.f32 %v6110_v23, %v1758_v7  ;;  %v8124_v44 = vunpack.i.l.bf16 %v8123_v1  ;;  %v1790_v27 = vmul.f32 %v6091_v2, %v1763_v38 }
 0x37b   : > { %v1877_v39 = vadd.f32 %v1872_v13, %v1853_v4  ;;  %v1889_v8 = vadd.f32 %v1884_v36, %v1865_v47  ;;  %v8125_v36 = vld [vmem:[#allocation74_spill] sm:$0xff]  ;;  %v1962_v11 = vmul.f32 %v8126_v12, %v1914_v48  ;;  %v1802_v23 = vmul.f32 %v6104_v43, %v1763_v38 }
 0x37c   : > { %v1841_v35 = vsel %vm1832_vm1, %v8124_v44, %v8122_v24  ;;  %v6346_v30 = vpop.permute.xlu0 %1975  ;;  %v1950_v59 = vmul.f32 %v8125_v36, %v1914_v48  ;;  %v1791_v60 = vmul.f32 %v6091_v2, %v1761_v25  ;;  %v1772_v16 = vadd.f32 %v1767_v55, %v1717_v40  ;;  %v8129_v4 = vld [vmem:[#allocation98_spill] sm:$0xff]  ;;  %v8131_v44 = vld [vmem:[#allocation75_spill] sm:$0xff] }
 0x37d   : > { %v1931_v20 = vadd.f32 %v1926_v45, %v1877_v39  ;;  %v1943_v13 = vadd.f32 %v1938_v61, %v1889_v8  ;;  %v6350_v14 = vpop.permute.xlu1 %1973  ;;  %v1784_v52 = vadd.f32 %v1779_v29, %v1729_v17  ;;  %v1759_v34 = vsel %vm1753_vm15, %v5913_v19, %v5921_v21  ;;  %v8130_v61 = vld [vmem:[#allocation100_spill] sm:$0xff] }
 0x37e   : > { %v1773_v51 = vadd.f32 %v1768_v18, %v1718_v3  ;;  %v1785_v54 = vadd.f32 %v1780_v26, %v1730_v28  ;;  %v1845_v57 = vmul.f32 %v6115_v15, %v1841_v35  ;;  %v8128_v46 = vunpack.i.h.bf16 %v8123_v1 }
 0x37f   : > { %v1955_v5 = vadd.f32 %v1950_v59, %v1931_v20  ;;  %v1967_v53 = vadd.f32 %v1962_v11, %v1943_v13  ;;  %v1803_v40 = vmul.f32 %v6104_v43, %v1761_v25  ;;  %v1795_v17 = vadd.f32 %v1790_v27, %v1771_v42  ;;  %v8132_v20 = vld [vmem:[#allocation41_spill] sm:$0xff]  ;;  %v8133_v11 = vld [vmem:[#allocation67_spill] sm:$0xff]  ;;  %v8134_v27 = vld [vmem:[#allocation78_spill] sm:$0xff] }
 0x380   : > { %v1842_v38 = vsel %vm1832_vm1, %v8128_v46, %v8127_v56  ;;  %v6365_v32 = vpop.permute.xlu0 %1979  ;;  %v1807_v7 = vadd.f32 %v1802_v23, %v1783_v62  ;;  %v1839_v19 = vsel %vm1832_vm1, %v8122_v24, %v8129_v4  ;;  %v1792_v3 = vmul.f32 %v6091_v2, %v1759_v34 }
 0x381   : > { %v6372_v21 = vpop.permute.xlu1 %1977  ;;  %v1804_v28 = vmul.f32 %v6104_v43, %v1759_v34  ;;  %v1796_v47 = vadd.f32 %v1791_v60, %v1772_v16  ;;  %v1837_v49 = vsel %vm1832_vm1, %v8129_v4, %v6018_v41  ;;  %v1857_v42 = vmul.f32 %v6118_v6, %v1841_v35  ;;  %v8136_v60 = vld [vmem:[#allocation70_spill] sm:$0xff] }
 0x382   : > { %v1869_v25 = vmul.f32 %v6121_v63, %v1842_v38  ;;  %v1881_v55 = vmul.f32 %v6124_v58, %v1842_v38  ;;  %v1808_v29 = vadd.f32 %v1803_v40, %v1784_v52  ;;  %v1850_v48 = vadd.f32 %v1845_v57, %v1795_v17  ;;  %v8137_v52 = vld [vmem:[#allocation82_spill] sm:$0xff]  ;;  %v8138_v38 = vld [vmem:[#allocation55_spill] sm:$0xff] }
 0x383   : > { %v1846_v39 = vmul.f32 %v6115_v15, %v1839_v19  ;;  %v1797_v8 = vadd.f32 %v1792_v3, %v1773_v51  ;;  %v1809_v2 = vadd.f32 %v1804_v28, %v1785_v54  ;;  %v1858_v43 = vmul.f32 %v6118_v6, %v1839_v19 }
 0x384   : > { %v1984_v45 = vpop.permute.xlu0 %1983  ;;  %v1840_v41 = vsel %vm1832_vm1, %v8127_v56, %v8130_v61  ;;  %v1847_v62 = vmul.f32 %v6115_v15, %v1837_v49  ;;  %v1859_v24 = vmul.f32 %v6118_v6, %v1837_v49  ;;  %v1862_v59 = vadd.f32 %v1857_v42, %v1807_v7 }
 0x385   : > { %v1982_v18 = vpop.permute.xlu1 %1981  ;;  %v1992_v26 = vsel %vm1053_vm11, %v6365_v32, %v1984_v45  ;;  %v8135_v23 = vunpack.i.l.bf16 %v8134_v27  ;;  %v1851_v6 = vadd.f32 %v1846_v39, %v1796_v47  ;;  %v1870_v51 = vmul.f32 %v6121_v63, %v1840_v41 }
 0x386   : > { %v1991_v1 = vsel %vm1053_vm11, %v6372_v21, %v1982_v18  ;;  %v2028_v35 = vmul.f32 %v8131_v44, %v1992_v26  ;;  %v2040_v13 = vmul.f32 %v8132_v20, %v1992_v26  ;;  %v1882_v54 = vmul.f32 %v6124_v58, %v1840_v41  ;;  %v8141_v18 = vld [vmem:[#allocation77_spill] sm:$0xff] }
 0x387   : > { %v1919_v15 = vsel %vm895_vm9, %v8135_v23, %v8133_v11  ;;  %v2004_v16 = vmul.f32 %v8136_v60, %v1991_v1  ;;  %v2016_v34 = vmul.f32 %v8137_v52, %v1991_v1  ;;  %v1838_v57 = vsel %vm1832_vm1, %v8130_v61, %v5992_v22  ;;  %v8142_v1 = vld [vmem:[#allocation52_spill] sm:$0xff] }
 0x388   : > { %v6412_v56 = vpop.permute.xlu0 %2055  ;;  %v1863_v46 = vadd.f32 %v1858_v43, %v1808_v29  ;;  %v1917_v40 = vsel %vm895_vm9, %v8133_v11, %v8138_v38  ;;  %v1874_v19 = vadd.f32 %v1869_v25, %v1850_v48  ;;  %v1852_v3 = vadd.f32 %v1847_v62, %v1797_v8 }
 0x389   : > { %v2009_v17 = vadd.f32 %v2004_v16, %v1955_v5  ;;  %v2021_v7 = vadd.f32 %v2016_v34, %v1967_v53  ;;  %v6418_v4 = vpop.permute.xlu1 %3578  ;;  %v1864_v28 = vadd.f32 %v1859_v24, %v1809_v2  ;;  %v1923_v47 = vmul.f32 %v6136_v33, %v1919_v15 }
 0x38a   : > { %v1886_v49 = vadd.f32 %v1881_v55, %v1862_v59  ;;  %v1871_v22 = vmul.f32 %v6121_v63, %v1838_v57  ;;  %v1883_v29 = vmul.f32 %v6124_v58, %v1838_v57  ;;  %v1935_v45 = vmul.f32 %v6143_v9, %v1919_v15  ;;  %v8139_v55 = vld [vmem:[#allocation42_spill] sm:$0xff] }
 0x38b   : > { %v2033_v42 = vadd.f32 %v2028_v35, %v2009_v17  ;;  %v2045_v39 = vadd.f32 %v2040_v13, %v2021_v7  ;;  %v1924_v43 = vmul.f32 %v6136_v33, %v1917_v40  ;;  %v1915_v5 = vsel %vm895_vm9, %v8138_v38, %v6183_v31  ;;  %v8143_v13 = vld [vmem:[#allocation53_spill] sm:$0xff] }
 0x38c   : > { %v6429_v53 = vpop.permute.xlu0 %2047  ;;  %v1875_v25 = vadd.f32 %v1870_v51, %v1851_v6  ;;  %v1887_v48 = vadd.f32 %v1882_v54, %v1863_v46  ;;  %v8140_v63 = vunpack.i.h.bf16 %v8134_v27  ;;  %v1936_v58 = vmul.f32 %v6143_v9, %v1917_v40 }
 0x38d   : > { %v2060_v2 = vpop.permute.xlu1 %2059  ;;  %v1876_v61 = vadd.f32 %v1871_v22, %v1852_v3  ;;  %v1888_v41 = vadd.f32 %v1883_v29, %v1864_v28  ;;  %v1928_v62 = vadd.f32 %v1923_v47, %v1874_v19  ;;  %v1918_v26 = vsel %vm895_vm9, %v8139_v55, %v8141_v18 }
 0x38e   : > { %v1920_v8 = vsel %vm895_vm9, %v8140_v63, %v8139_v55  ;;  %v2069_v31 = vsel %vm517_vm0, %v6412_v56, %v2060_v2  ;;  %v1925_v24 = vmul.f32 %v6136_v33, %v1915_v5  ;;  %v1940_v27 = vadd.f32 %v1935_v45, %v1886_v49  ;;  %v8144_v55 = vld [vmem:[#allocation56_spill] sm:$0xff] }
 0x38f   : > { %v2082_v35 = vmul.f32 %v8142_v1, %v2069_v31  ;;  %v2094_v59 = vmul.f32 %v8143_v13, %v2069_v31  ;;  %v1947_v11 = vmul.f32 %v8125_v36, %v1920_v8  ;;  %v1929_v23 = vadd.f32 %v1924_v43, %v1875_v25 }
 0x390   : > { %v1995_v15 = vsel %vm1053_vm11, %v6221_v50, %v6350_v14  ;;  %v6452_v16 = vpop.permute.xlu0 %3583  ;;  %v1941_v34 = vadd.f32 %v1936_v58, %v1887_v48  ;;  %v1916_v33 = vsel %vm895_vm9, %v8141_v18, %v6190_v0  ;;  %v1959_v57 = vmul.f32 %v8126_v12, %v1920_v8  ;;  %v8145_v8 = vld [vmem:[#allocation40_spill] sm:$0xff] }
 0x391   : > { %v2087_v6 = vadd.f32 %v2082_v35, %v2033_v42  ;;  %v2099_v51 = vadd.f32 %v2094_v59, %v2045_v39  ;;  %v2052_v54 = vpop.permute.xlu1 %2051  ;;  %v1948_v46 = vmul.f32 %v8125_v36, %v1918_v26  ;;  %v1937_v38 = vmul.f32 %v6143_v9, %v1915_v5 }
 0x392   : > { %v3580_v40 = vunpack.i.l.bf16 %v6418_v4  ;;  %v1952_v17 = vadd.f32 %v1947_v11, %v1928_v62  ;;  %v1960_v7 = vmul.f32 %v8126_v12, %v1918_v26  ;;  %v1930_v19 = vadd.f32 %v1925_v24, %v1876_v61 }
 0x393   : > { %v2002_v3 = vmul.f32 %v8136_v60, %v1995_v15  ;;  %v1964_v28 = vadd.f32 %v1959_v57, %v1940_v27  ;;  %v1949_v0 = vmul.f32 %v8125_v36, %v1916_v33  ;;  %v1953_v47 = vadd.f32 %v1948_v46, %v1929_v23 }
 0x394   : > { %v2014_v49 = vmul.f32 %v8137_v52, %v1995_v15  ;;  %v2062_v22 = vpop.permute.xlu0 %2061  ;;  %v1961_v42 = vmul.f32 %v8126_v12, %v1916_v33  ;;  %v1965_v39 = vadd.f32 %v1960_v7, %v1941_v34  ;;  %v1996_v9 = vsel %vm1053_vm11, %v6322_v37, %v6346_v30 }
 0x395   : > { %v1993_v29 = vsel %vm1053_vm11, %v6350_v14, %v6372_v21  ;;  %v2058_v45 = vpop.permute.xlu1 %2057  ;;  %v1942_v43 = vadd.f32 %v1937_v38, %v1888_v41  ;;  %v3581_v36 = vunpack.i.h.bf16 %v6418_v4  ;;  %v1997_v5 = vsel %vm1053_vm11, %v3580_v40, %v6221_v50 }
 0x396   : > { %v2070_v12 = vsel %vm517_vm0, %v2058_v45, %v2062_v22  ;;  %v2007_v25 = vadd.f32 %v2002_v3, %v1953_v47  ;;  %v1954_v48 = vadd.f32 %v1949_v0, %v1930_v19  ;;  %v2019_v2 = vadd.f32 %v2014_v49, %v1965_v39 }
 0x397   : > { %v2106_v63 = vmul.f32 %v8144_v55, %v2070_v12  ;;  %v2118_v58 = vmul.f32 %v8145_v8, %v2070_v12  ;;  %v2026_v14 = vmul.f32 %v8131_v44, %v1996_v9  ;;  %v2003_v21 = vmul.f32 %v8136_v60, %v1993_v29 }
 0x398   : > { %v1994_v4 = vsel %vm1053_vm11, %v6346_v30, %v6365_v32  ;;  %v2054_v50 = vpop.permute.xlu0 %2053  ;;  %v2015_v61 = vmul.f32 %v8137_v52, %v1993_v29  ;;  %v2001_v41 = vmul.f32 %v8136_v60, %v1997_v5  ;;  %v2038_v26 = vmul.f32 %v8132_v20, %v1996_v9 }
 0x399   : > { %v2111_v62 = vadd.f32 %v2106_v63, %v2087_v6  ;;  %v2123_v31 = vadd.f32 %v2118_v58, %v2099_v51  ;;  %v2050_v18 = vpop.permute.xlu1 %2049  ;;  %v1998_v24 = vsel %vm1053_vm11, %v3581_v36, %v6322_v37  ;;  %v2013_v35 = vmul.f32 %v8137_v52, %v1997_v5 }
 0x39a   : > { %v3585_v59 = vunpack.i.l.bf16 %v6452_v16  ;;  %v2031_v11 = vadd.f32 %v2026_v14, %v2007_v25  ;;  %v1966_v30 = vadd.f32 %v1961_v42, %v1942_v43  ;;  %v2027_v32 = vmul.f32 %v8131_v44, %v1994_v4 }
 0x39b   : > { %v2039_v27 = vmul.f32 %v8132_v20, %v1994_v4  ;;  %v2043_v60 = vadd.f32 %v2038_v26, %v2019_v2  ;;  %v2008_v23 = vadd.f32 %v2003_v21, %v1954_v48  ;;  %v2071_v15 = vsel %vm517_vm0, %v2052_v54, %v6412_v56 }
 0x39c   : > { %v2073_v37 = vsel %vm517_vm0, %v6429_v53, %v2052_v54  ;;  %v2138_v34 = vpop.permute.xlu0 %2137  ;;  %v2020_v52 = vadd.f32 %v2015_v61, %v1966_v30  ;;  %v2006_v33 = vadd.f32 %v2001_v41, %v1952_v17  ;;  %v2025_v6 = vmul.f32 %v8131_v44, %v1998_v24  ;;  %v8146_v17 = vld [vmem:[#allocation57_spill] sm:$0xff]  ;;  %v8147_v44 = vld [vmem:[#allocation90_spill] sm:$0xff] }
 0x39d   : > { %v2037_v51 = vmul.f32 %v8132_v20, %v1998_v24  ;;  %v2134_v57 = vpop.permute.xlu1 %2133  ;;  %v2018_v46 = vadd.f32 %v2013_v35, %v1964_v28  ;;  %v3586_v38 = vunpack.i.h.bf16 %v6452_v16  ;;  %v2075_v40 = vsel %vm517_vm0, %v3585_v59, %v6429_v53 }
 0x39e   : > { %v2147_v56 = vsel %vm677_vm4, %v2134_v57, %v2138_v34  ;;  %v2080_v54 = vmul.f32 %v8142_v1, %v2073_v37  ;;  %v2081_v7 = vmul.f32 %v8142_v1, %v2071_v15  ;;  %v2092_v20 = vmul.f32 %v8143_v13, %v2073_v37 }
 0x39f   : > { %v2160_v19 = vmul.f32 %v8146_v17, %v2147_v56  ;;  %v2172_v3 = vmul.f32 %v8147_v44, %v2147_v56  ;;  %v2093_v28 = vmul.f32 %v8143_v13, %v2071_v15  ;;  %v2076_v16 = vsel %vm517_vm0, %v3586_v38, %v2050_v18 }
 0x3a0   : > { %v2072_v53 = vsel %vm517_vm0, %v2054_v50, %v2058_v45  ;;  %v2130_v0 = vpop.permute.xlu0 %2129  ;;  %v2079_v47 = vmul.f32 %v8142_v1, %v2075_v40  ;;  %v2091_v49 = vmul.f32 %v8143_v13, %v2075_v40  ;;  %v2032_v9 = vadd.f32 %v2027_v32, %v2008_v23 }
 0x3a1   : > { %v2165_v22 = vadd.f32 %v2160_v19, %v2111_v62  ;;  %v2177_v42 = vadd.f32 %v2172_v3, %v2123_v31  ;;  %v2126_v39 = vpop.permute.xlu1 %2125  ;;  %v2044_v29 = vadd.f32 %v2039_v27, %v2020_v52  ;;  %v2030_v43 = vadd.f32 %v2025_v6, %v2006_v33  ;;  %v8148_v52 = vld [vmem:[#allocation86_spill] sm:$0xff]  ;;  %v8149_v6 = vld [vmem:[#allocation91_spill] sm:$0xff] }
 0x3a2   : > { %v2042_v36 = vadd.f32 %v2037_v51, %v2018_v46  ;;  %v2103_v5 = vmul.f32 %v8144_v55, %v2076_v16  ;;  %v2074_v12 = vsel %vm517_vm0, %v2050_v18, %v2054_v50  ;;  %v2105_v25 = vmul.f32 %v8144_v55, %v2072_v53 }
 0x3a3   : > { %v2117_v45 = vmul.f32 %v8145_v8, %v2072_v53  ;;  %v2085_v48 = vadd.f32 %v2080_v54, %v2031_v11  ;;  %v2086_v1 = vadd.f32 %v2081_v7, %v2032_v9  ;;  %v2097_v63 = vadd.f32 %v2092_v20, %v2043_v60  ;;  %v8151_v9 = vld [vmem:[#allocation76_spill] sm:$0xff] }
 0x3a4   : > { %v2115_v13 = vmul.f32 %v8145_v8, %v2076_v16  ;;  %v2136_v58 = vpop.permute.xlu0 %2135  ;;  %v2098_v2 = vadd.f32 %v2093_v28, %v2044_v29  ;;  %v2084_v14 = vadd.f32 %v2079_v47, %v2030_v43  ;;  %v2096_v21 = vadd.f32 %v2091_v49, %v2042_v36  ;;  %v8150_v49 = vld [vmem:[#allocation50_spill] sm:$0xff]  ;;  %v8152_v43 = vld [vmem:[#allocation83_spill] sm:$0xff] }
 0x3a5   : > { %v2149_v4 = vsel %vm677_vm4, %v2130_v0, %v2134_v57  ;;  %v3589_v61 = vpop.permute.xlu1 %3588  ;;  %v2104_v41 = vmul.f32 %v8144_v55, %v2074_v12  ;;  %v2116_v50 = vmul.f32 %v8145_v8, %v2074_v12  ;;  %v2151_v62 = vsel %vm677_vm4, %v2126_v39, %v2130_v0 }
 0x3a6   : > { %v3590_v31 = vunpack.i.l.bf16 %v3589_v61  ;;  %v2108_v18 = vadd.f32 %v2103_v5, %v2084_v14  ;;  %v2110_v26 = vadd.f32 %v2105_v25, %v2086_v1  ;;  %v2122_v24 = vadd.f32 %v2117_v45, %v2098_v2  ;;  %v8153_v5 = vld [vmem:[#allocation84_spill] sm:$0xff]  ;;  %v8157_v14 = vld [vmem:[#allocation69_spill] sm:$0xff] }
 0x3a7   : > { %v3591_v35 = vunpack.i.h.bf16 %v3589_v61  ;;  %v2120_v59 = vadd.f32 %v2115_v13, %v2096_v21  ;;  %v2159_v11 = vmul.f32 %v8146_v17, %v2149_v4  ;;  %v2171_v30 = vmul.f32 %v8147_v44, %v2149_v4 }
 0x3a8   : > { %v2153_v32 = vsel %vm677_vm4, %v3590_v31, %v2126_v39  ;;  %v2128_v27 = vpop.permute.xlu0 %2127  ;;  %v2158_v55 = vmul.f32 %v8146_v17, %v2151_v62  ;;  %v2170_v37 = vmul.f32 %v8147_v44, %v2151_v62  ;;  %v2109_v56 = vadd.f32 %v2104_v41, %v2085_v48  ;;  %v8154_v48 = vld [vmem:[#allocation79_spill] sm:$0xff]  ;;  %v8158_v62 = vld [vmem:[#allocation101_spill] sm:$0xff] }
 0x3a9   : > { %v2157_v8 = vmul.f32 %v8146_v17, %v2153_v32  ;;  %v2169_v60 = vmul.f32 %v8147_v44, %v2153_v32  ;;  %v2140_v23 = vpop.permute.xlu1 %2139  ;;  %v2154_v15 = vsel %vm677_vm4, %v3591_v35, %v2128_v27  ;;  %v2121_v54 = vadd.f32 %v2116_v50, %v2097_v63  ;;  %v8155_v63 = vld [vmem:[#allocation80_spill] sm:$0xff]  ;;  %v8159_v31 = vld [vmem:[#allocation49_spill] sm:$0xff] }
 0x3aa   : > { %v2148_v34 = vsel %vm677_vm4, %v2136_v58, %v2140_v23  ;;  %v2181_v33 = vmul.f32 %v8148_v52, %v2154_v15  ;;  %v2193_v51 = vmul.f32 %v8149_v6, %v2154_v15  ;;  %v2164_v7 = vadd.f32 %v2159_v11, %v2110_v26  ;;  %v8160_v26 = vld [vmem:[#allocation71_spill] sm:$0xff] }
 0x3ab   : > { %v2184_v57 = vmul.f32 %v8148_v52, %v2148_v34  ;;  %v2196_v46 = vmul.f32 %v8149_v6, %v2148_v34  ;;  %v2162_v38 = vadd.f32 %v2157_v8, %v2108_v18  ;;  %v2174_v40 = vadd.f32 %v2169_v60, %v2120_v59  ;;  %v8162_v59 = vld [vmem:[#allocation103_spill] sm:$0xff]  ;;  %v8165_v8 = vld [vmem:[#allocation45_spill] sm:$0xff] }
 0x3ac   : > { %v2176_v17 = vadd.f32 %v2171_v30, %v2122_v24  ;;  %v2163_v16 = vadd.f32 %v2158_v55, %v2109_v56  ;;  %v2175_v53 = vadd.f32 %v2170_v37, %v2121_v54  ;;  %v2207_v18 = vmul.f32 %v8159_v31, %v8158_v62  ;;  %v8161_v24 = vld [vmem:[#allocation54_spill] sm:$0xff] }
 0x3ad   : > { %v2189_v19 = vadd.f32 %v2184_v57, %v2165_v22  ;;  %v2201_v3 = vadd.f32 %v2196_v46, %v2177_v42  ;;  %v2186_v44 = vadd.f32 %v2181_v33, %v2162_v38  ;;  %v2198_v20 = vadd.f32 %v2193_v51, %v2174_v40  ;;  %v2132_v28 = vpop.permute.xlu1 %2131  ;;  %v8163_v30 = vld [vmem:[#allocation66_spill] sm:$0xff] }
 0x3ae   : > { %v2150_v0 = vsel %vm677_vm4, %v2132_v28, %v2136_v58  ;;  %v2152_v47 = vsel %vm677_vm4, %v2128_v27, %v2132_v28  ;;  %v8156_v58 = vld [vmem:[#allocation81_spill] sm:$0xff]  ;;  %v2230_v35 = vmul.f32 %v8161_v24, %v8160_v26  ;;  %v2219_v11 = vmul.f32 %v8159_v31, %v8162_v59  ;;  %v8164_v27 = vld [vmem:[#allocation72_spill] sm:$0xff] }
 0x3af   : > { %v2213_v39 = vadd.f32 %v8150_v49, %v2189_v19  ;;  %v2225_v29 = vadd.f32 %v8151_v9, %v2201_v3  ;;  %v2210_v36 = vadd.f32 %v8152_v43, %v2186_v44  ;;  %v2222_v22 = vadd.f32 %v8153_v5, %v2198_v20 }
 0x3b0   : > { %v2182_v42 = vmul.f32 %v8148_v52, %v2152_v47  ;;  %v2183_v12 = vmul.f32 %v8148_v52, %v2150_v0  ;;  %v2194_v25 = vmul.f32 %v8149_v6, %v2152_v47  ;;  %v2195_v45 = vmul.f32 %v8149_v6, %v2150_v0  ;;  %v8166_v52 = vld [vmem:[#allocation102_spill] sm:$0xff] }
 0x3b1   : > { %v6566_v1 = vadd.f32 %v8154_v48, %v2213_v39  ;;  %v6569_v13 = vadd.f32 %v8155_v63, %v2225_v29  ;;  %v2234_v2 = vadd.f32 %v8156_v58, %v2210_v36  ;;  %v2246_v21 = vadd.f32 %v8157_v14, %v2222_v22  ;;  %v6701_v28 = vpop.permute.xlu1 %3598 }
 0x3b2   : > { %v2187_v4 = vadd.f32 %v2182_v42, %v2163_v16  ;;  %v2188_v61 = vadd.f32 %v2183_v12, %v2164_v7  ;;  %v2199_v41 = vadd.f32 %v2194_v25, %v2175_v53  ;;  %v2200_v50 = vadd.f32 %v2195_v45, %v2176_v17  ;;  %v6717_v53 = vpop.permute.xlu0 %3593 }
 0x3b3   : > { %v2242_v32 = vmul.f32 %v8161_v24, %v8163_v30  ;;  %3659 = vtanh.f32 %v2234_v2  ;;  %v2231_v33 = vmul.f32 %v8166_v52, %v8160_v26  ;;  %v2243_v6 = vmul.f32 %v8166_v52, %v8163_v30 }
 0x3b4   : > { %v2211_v55 = vadd.f32 %v8164_v27, %v2187_v4  ;;  %v2223_v60 = vadd.f32 %v8165_v8, %v2199_v41  ;;  %v2212_v23 = vadd.f32 %v2207_v18, %v2188_v61  ;;  %3661 = vtanh.f32 %v2246_v21 }
 0x3b5   : > { %v2224_v15 = vadd.f32 %v2219_v11, %v2200_v50  ;;  %v6711_v16 = vpop.permute.xlu1 %3603  ;;  %v8171_v47 = vmov 0.0   ;;  %v7790_v9 = vunpack.i.l.bf16 %v6717_v53  ;;  %v7791_v36 = vunpack.i.h.bf16 %v6717_v53 }
 0x3b6   : > { %v2235_v37 = vadd.f32 %v2230_v35, %v2211_v55  ;;  %v2247_v34 = vadd.f32 %v2242_v32, %v2223_v60  ;;  %v2236_v51 = vadd.f32 %v2231_v33, %v2212_v23  ;;  %v6727_v49 = vpop.permute.xlu0 %3613  ;;  %v6744_v22 = vstv %s3316_s30  ;;  %s7058_s30 = sld [smem:[#allocation14 + $0x8f]] }
 0x3b7   : > { %v2248_v57 = vadd.f32 %v2243_v6, %v2224_v15  ;;  %8172 = vst [vmem:[#allocation85_spill] sm:$0xff] %v6727_v49  ;;  %v6746_v12 = vstv %s2271_s24  ;;  %v6748_v25 = vstv %s3314_s2  ;;  %v7787_v15 = vunpack.i.h.bf16 %v6701_v28  ;;  %s7060_s24 = sld [smem:[#allocation14 + $0x7]] }
 0x3b8   : > { %3663 = vtanh.f32 %v2235_v37  ;;  %v7789_v37 = vunpack.i.l.bf16 %v6701_v28  ;;  %vm2453_vm4 = vcmp.lt.s32.totalorder %v4351_v10, 48  ;;  %s7062_s2 = sld [smem:[#allocation14 + $0x87]] }
 0x3b9   : > { %3665 = vtanh.f32 %v2247_v34  ;;  %v6719_v0 = vpop.permute.xlu1 %3608 }
 0x3ba   : > { %3667 = vtanh.f32 %v2236_v51  ;;  %8170 = vst [vmem:[#allocation93_spill] sm:$0xff] %v6719_v0 }
 0x3bb   : > { %3669 = vtanh.f32 %v2248_v57  ;;  %v6818_v57 = vstv %s6771_s28  ;;  %s8241_s28 = sld [smem:[#allocation39_spill]] }
 0x3bc   : > { %3671 = vtanh.f32 %v6569_v13 }
 0x3bd   : > { %v6587_v46 = vpop.eup %3659  ;;  %3673 = vtanh.f32 %v6566_v1  ;;  %v6731_v39 = vpop.permute.xlu1 %3618 }
 0x3be   : > { %v6589_v38 = vpop.eup %3661  ;;  %2275 = vrot.lane.b32.xlu0 %v6587_v46, %s3979_s13  ;;  %8173 = vst [vmem:[#allocation109_spill] sm:$0xff] %v6731_v39 }
 0x3bf   : > { %2277 = vrot.lane.b32.xlu1 %v6589_v38, %s3979_s13 }
 0x3c2   : > { %v6595_v40 = vpop.eup %3663 }
 0x3c3   : > { %v6597_v56 = vpop.eup %3665  ;;  %2279 = vrot.lane.b32.xlu0 %v6595_v40, %s3979_s13 }
 0x3c4   : > { %2281 = vrot.lane.b32.xlu1 %v6597_v56, %s3979_s13  ;;  %v6603_v54 = vpop.eup %3667 }
 0x3c5   : > { %v6605_v7 = vpop.eup %3669 }
 0x3c6   : > { %v3672_v17 = vpop.eup %3671 }
 0x3c7   : > { %2283 = vrot.lane.b32.xlu0 %v6603_v54, %s3979_s13  ;;  %v3674_v19 = vpop.eup %3673  ;;  %v6679_v44 = vsel %vm496_vm8, %v3672_v17, 0.0 }
 0x3c8   : > { %2285 = vrot.lane.b32.xlu1 %v6605_v7, %s3979_s13  ;;  %v6687_v20 = vsel %vm496_vm8, %v3674_v19, 0.0 }
 0x3cb   : > { %2356 = vrot.lane.b32.xlu0 %v6589_v38, %s3980_s14 }
 0x3cc   : > { %2354 = vrot.lane.b32.xlu1 %v6587_v46, %s3980_s14 }
 0x3cf   : > { %2360 = vrot.lane.b32.xlu0 %v6597_v56, %s3980_s14 }
 0x3d0   : > { %2358 = vrot.lane.b32.xlu1 %v6595_v40, %s3980_s14 }
 0x3d3   : > { %2364 = vrot.lane.b32.xlu0 %v6605_v7, %s3980_s14 }
 0x3d4   : > { %2362 = vrot.lane.b32.xlu1 %v6603_v54, %s3980_s14 }
 0x3d7   : > { %2433 = vrot.lane.b32.xlu0 %v6587_v46, %s8167_s15 }
 0x3d8   : > { %2435 = vrot.lane.b32.xlu1 %v6589_v38, %s8167_s15 }
 0x3db   : > { %2437 = vrot.lane.b32.xlu0 %v6595_v40, %s8167_s15 }
 0x3dc   : > { %2439 = vrot.lane.b32.xlu1 %v6597_v56, %s8167_s15 }
 0x3df   : > { %2441 = vrot.lane.b32.xlu0 %v6603_v54, %s8167_s15 }
 0x3e0   : > { %2443 = vrot.lane.b32.xlu1 %v6605_v7, %s8167_s15 }
 0x3e3   : > { %2516 = vrot.lane.b32.xlu0 %v6595_v40, %s8168_s20 }
 0x3e4   : > { %2512 = vrot.lane.b32.xlu1 %v6587_v46, %s8168_s20 }
 0x3e7   : > { %2514 = vrot.lane.b32.xlu0 %v6589_v38, %s8168_s20 }
 0x3e8   : > { %2520 = vrot.lane.b32.xlu1 %v6603_v54, %s8168_s20 }
 0x3eb   : > { %2522 = vrot.lane.b32.xlu0 %v6605_v7, %s8168_s20 }
 0x3ec   : > { %2518 = vrot.lane.b32.xlu1 %v6597_v56, %s8168_s20 }
 0x3ef   : > { %2591 = vrot.lane.b32.xlu0 %v6587_v46, %s8044_s6 }
 0x3f0   : > { %2595 = vrot.lane.b32.xlu1 %v6595_v40, %s8044_s6 }
 0x3f3   : > { %2599 = vrot.lane.b32.xlu0 %v6603_v54, %s8044_s6 }
 0x3f4   : > { %2593 = vrot.lane.b32.xlu1 %v6589_v38, %s8044_s6 }
 0x3f7   : > { %2597 = vrot.lane.b32.xlu0 %v6597_v56, %s8044_s6 }
 0x3f8   : > { %2601 = vrot.lane.b32.xlu1 %v6605_v7, %s8044_s6 }
 0x3fb   : > { %2673 = vrot.lane.b32.xlu0 %v6595_v40, %s8067_s8 }
 0x3fc   : > { %2669 = vrot.lane.b32.xlu1 %v6587_v46, %s8067_s8 }
 0x3ff   : > { %2671 = vrot.lane.b32.xlu0 %v6589_v38, %s8067_s8 }
 0x400   : > { %2677 = vrot.lane.b32.xlu1 %v6603_v54, %s8067_s8 }
 0x403   : > { %2679 = vrot.lane.b32.xlu0 %v6605_v7, %s8067_s8 }
 0x404   : > { %2675 = vrot.lane.b32.xlu1 %v6597_v56, %s8067_s8 }
 0x407   : > { %2747 = vrot.lane.b32.xlu0 %v6587_v46, %s8076_s10 }
 0x408   : > { %2751 = vrot.lane.b32.xlu1 %v6595_v40, %s8076_s10 }
 0x40b   : > { %2755 = vrot.lane.b32.xlu0 %v6603_v54, %s8076_s10 }
 0x40c   : > { %2289 = vrot.lane.b32.xlu1 %v6679_v44, %s3979_s13 }
 0x40f   : > { %2287 = vrot.lane.b32.xlu0 %v6687_v20, %s3979_s13  ;;  %s2306_s13 = sld [smem:[#allocation14]] }
 0x410   : > { %2366 = vrot.lane.b32.xlu1 %v6687_v20, %s3980_s14 }
 0x413   : > { %2368 = vrot.lane.b32.xlu0 %v6679_v44, %s3980_s14  ;;  %s3315_s14 = sld [smem:[#allocation14 + $0x80]] }
 0x414   : > { %2526 = vrot.lane.b32.xlu1 %v6679_v44, %s8168_s20 }
 0x415   : > { %v6739_v29 = vstv %s2306_s13  ;;  %s7048_s13 = sld [smem:[#allocation14 + $0x86]] }
 0x417   : > { %2445 = vrot.lane.b32.xlu0 %v6687_v20, %s8167_s15 }
 0x418   : > { %2603 = vrot.lane.b32.xlu1 %v6687_v20, %s8044_s6 }
 0x419   : > { %v6741_v43 = vstv %s3315_s14  ;;  %s7050_s14 = sld [smem:[#allocation14 + $0xf]] }
 0x41b   : > { %2447 = vrot.lane.b32.xlu0 %v6679_v44, %s8167_s15  ;;  %s3349_s15 = sld [smem:[#allocation14 + $0x91]] }
 0x41c   : > { %2683 = vrot.lane.b32.xlu1 %v6679_v44, %s8067_s8 }
 0x41f   : > { %2524 = vrot.lane.b32.xlu0 %v6687_v20, %s8168_s20  ;;  %s7044_s20 = sld [smem:[#allocation14 + $0x6]] }
 0x420   : > { %2759 = vrot.lane.b32.xlu1 %v6687_v20, %s8076_s10 }
 0x423   : > { %2605 = vrot.lane.b32.xlu0 %v6679_v44, %s8044_s6  ;;  %s3317_s6 = sld [smem:[#allocation14 + $0x89]] }
 0x424   : > { %2749 = vrot.lane.b32.xlu1 %v6589_v38, %s8076_s10 }
 0x427   : > { %2681 = vrot.lane.b32.xlu0 %v6687_v20, %s8067_s8  ;;  %s6766_s8 = sld [smem:[#allocation14 + $0x1]] }
 0x428   : > { %2757 = vrot.lane.b32.xlu1 %v6605_v7, %s8076_s10 }
 0x429   : > { %v6754_v48 = vstv %s3317_s6  ;;  %s7064_s6 = sld [smem:[#allocation14 + $0x10]] }
 0x42b   : > { %3623 = vrot.lane.b32.xlu0 %v8171_v47, %s8076_s10 }
 0x42c   : > { %2825 = vrot.lane.b32.xlu1 %v6587_v46, %s7929_s19 }
 0x42d   : > { %v6812_v34 = vstv %s6766_s8  ;;  %s7074_s8 = sld [smem:[#allocation14 + $0x90]] }
 0x42f   : > { %2753 = vrot.lane.b32.xlu0 %v6597_v56, %s8076_s10 }
 0x430   : > { %2833 = vrot.lane.b32.xlu1 %v6603_v54, %s7929_s19  ;;  %v2276_v5 = vpop.permute.xlu0 %2275 }
 0x431   : > { %v2278_v42 = vpop.permute.xlu1 %2277  ;;  %v2304_v45 = vsel %vm2295_vm2, %v7790_v9, %v2276_v5 }
 0x432   : > { %v2305_v1 = vsel %vm2295_vm2, %v7791_v36, %v2278_v42  ;;  %v2308_v63 = vmul.f32 %v6739_v29, %v2304_v45  ;;  %v2320_v13 = vmul.f32 %v6741_v43, %v2304_v45 }
 0x433   : > { %2761 = vrot.lane.b32.xlu0 %v6679_v44, %s8076_s10  ;;  %v2332_v58 = vmul.f32 %v6744_v22, %v2305_v1  ;;  %v2344_v4 = vmul.f32 %v6754_v48, %v2305_v1  ;;  %s6776_s10 = sld [smem:[#allocation14 + $0xa]]  ;;  %v6833_v1 = vstv %s6784_s18  ;;  %s8252_s18 = sld [smem:[#allocation33_spill]] }
 0x434   : > { %2841 = vrot.lane.b32.xlu1 %v8171_v47, %s7929_s19  ;;  %v2313_v2 = vadd.f32 %v2308_v63, %v6746_v12  ;;  %v2325_v14 = vadd.f32 %v2320_v13, %v6748_v25 }
 0x435   : > { %v2280_v21 = vpop.permute.xlu0 %2279 }
 0x436   : > { %v2282_v61 = vpop.permute.xlu1 %2281  ;;  %v2302_v41 = vsel %vm2295_vm2, %v2276_v5, %v2280_v21  ;;  %v2337_v18 = vadd.f32 %v2332_v58, %v2313_v2  ;;  %v2349_v26 = vadd.f32 %v2344_v4, %v2325_v14 }
 0x437   : > { %v2303_v50 = vsel %vm2295_vm2, %v2278_v42, %v2282_v61  ;;  %v2309_v62 = vmul.f32 %v6739_v29, %v2302_v41  ;;  %v2321_v31 = vmul.f32 %v6741_v43, %v2302_v41  ;;  %2829 = vrot.lane.b32.xlu0 %v6595_v40, %s7929_s19 }
 0x438   : > { %2831 = vrot.lane.b32.xlu1 %v6597_v56, %s7929_s19  ;;  %v2333_v24 = vmul.f32 %v6744_v22, %v2303_v50  ;;  %v2345_v30 = vmul.f32 %v6754_v48, %v2303_v50 }
 0x439   : > { %v2314_v35 = vadd.f32 %v2309_v62, %v6746_v12  ;;  %v2326_v59 = vadd.f32 %v2321_v31, %v6748_v25  ;;  %v6791_v11 = vpop.permute.xlu0 %2283  ;;  %v6822_v5 = vstv %s6776_s10  ;;  %s7482_s10 = scalar_lea.vmem [#allocation18], %s8241_s28 }
 0x43a   : > { %v6794_v32 = vpop.permute.xlu1 %2285  ;;  %v2300_v27 = vsel %vm2295_vm2, %v2280_v21, %v6791_v11 }
 0x43b   : > { %v2301_v55 = vsel %vm2295_vm2, %v2282_v61, %v6794_v32  ;;  %v2310_v8 = vmul.f32 %v6739_v29, %v2300_v27  ;;  %v2322_v60 = vmul.f32 %v6741_v43, %v2300_v27  ;;  %2837 = vrot.lane.b32.xlu0 %v6687_v20, %s7929_s19  ;;  %v2338_v23 = vadd.f32 %v2333_v24, %v2314_v35 }
 0x43c   : > { %2839 = vrot.lane.b32.xlu1 %v6679_v44, %s7929_s19  ;;  %v2350_v52 = vadd.f32 %v2345_v30, %v2326_v59  ;;  %v2334_v33 = vmul.f32 %v6744_v22, %v2301_v55  ;;  %v2346_v19 = vmul.f32 %v6754_v48, %v2301_v55  ;;  %v7786_v59 = vunpack.i.l.bf16 %v6711_v16 }
 0x43d   : > { %v2315_v6 = vadd.f32 %v2310_v8, %v6746_v12  ;;  %v2327_v51 = vadd.f32 %v2322_v60, %v6748_v25  ;;  %v2357_v17 = vpop.permute.xlu0 %2356 }
 0x43e   : > { %v2355_v3 = vpop.permute.xlu1 %2354  ;;  %v2384_v42 = vsel %vm2374_vm3, %v7787_v15, %v2357_v17 }
 0x43f   : > { %v2383_v45 = vsel %vm2374_vm3, %v7789_v37, %v2355_v3  ;;  %2827 = vrot.lane.b32.xlu0 %v6589_v38, %s7929_s19  ;;  %v2339_v63 = vadd.f32 %v2334_v33, %v2315_v6  ;;  %v2351_v2 = vadd.f32 %v2346_v19, %v2327_v51  ;;  %v2411_v14 = vmul.f32 %v6822_v5, %v2384_v42 }
 0x440   : > { %v2387_v13 = vmul.f32 %v6812_v34, %v2383_v45  ;;  %v2399_v58 = vmul.f32 %v6818_v57, %v2383_v45  ;;  %v2423_v41 = vmul.f32 %v6833_v1, %v2384_v42  ;;  %v7784_v45 = vunpack.i.h.bf16 %v6711_v16 }
 0x441   : > { %v2361_v21 = vpop.permute.xlu0 %2360 }
 0x442   : > { %v2392_v4 = vadd.f32 %v2387_v13, %v2337_v18  ;;  %v2404_v61 = vadd.f32 %v2399_v58, %v2349_v26  ;;  %v2359_v50 = vpop.permute.xlu1 %2358  ;;  %v2382_v62 = vsel %vm2374_vm3, %v2357_v17, %v2361_v21  ;;  %v6884_v58 = vstv %s6844_s5  ;;  %s8261_s5 = sld [smem:[#allocation38_spill]] }
 0x443   : > { %v2381_v31 = vsel %vm2374_vm3, %v2355_v3, %v2359_v50  ;;  %2835 = vrot.lane.b32.xlu0 %v6605_v7, %s7929_s19  ;;  %v2412_v30 = vmul.f32 %v6822_v5, %v2382_v62  ;;  %v2424_v60 = vmul.f32 %v6833_v1, %v2382_v62 }
 0x444   : > { %v2416_v24 = vadd.f32 %v2411_v14, %v2392_v4  ;;  %v2428_v35 = vadd.f32 %v2423_v41, %v2404_v61  ;;  %v2388_v18 = vmul.f32 %v6812_v34, %v2381_v31  ;;  %v2400_v26 = vmul.f32 %v6818_v57, %v2381_v31 }
 0x445   : > { %v6859_v27 = vpop.permute.xlu0 %2364 }
 0x446   : > { %v2393_v55 = vadd.f32 %v2388_v18, %v2338_v23  ;;  %v2405_v8 = vadd.f32 %v2400_v26, %v2350_v52  ;;  %v6862_v33 = vpop.permute.xlu1 %2362  ;;  %v2380_v6 = vsel %vm2374_vm3, %v2361_v21, %v6859_v27  ;;  %v6874_v23 = vstv %s6837_s4  ;;  %s3357_s4 = smul.u32 640, %s8252_s18 }
 0x447   : > { %v2379_v51 = vsel %vm2374_vm3, %v2359_v50, %v6862_v33  ;;  %2843 = vrot.lane.b32.xlu0 %v8171_v47, %s7929_s19  ;;  %v6877_v52 = vstv %s6839_s26  ;;  %v2413_v13 = vmul.f32 %v6822_v5, %v2380_v6  ;;  %v2425_v4 = vmul.f32 %v6833_v1, %v2380_v6  ;;  %s3326_s19 = sld [smem:[#allocation14 + $0x3]]  ;;  %s3006_s26 = sshll.u32 %s7482_s10, 4  ;;  %s7514_s26 = int_to_ptr.vmem [resolvable:$true] %s3006_s26 }
 0x448   : > { %v2417_v17 = vadd.f32 %v2412_v30, %v2393_v55  ;;  %v2429_v19 = vadd.f32 %v2424_v60, %v2405_v8  ;;  %v2389_v3 = vmul.f32 %v6812_v34, %v2379_v51  ;;  %v2401_v42 = vmul.f32 %v6818_v57, %v2379_v51 }
 0x449   : > { %v2434_v47 = vpop.permute.xlu0 %2433  ;;  %v6892_v50 = vstv %s6853_s7  ;;  %s8265_s7 = sld [smem:[#allocation36_spill]] }
 0x44a   : > { %v2394_v14 = vadd.f32 %v2389_v3, %v2339_v63  ;;  %v2406_v21 = vadd.f32 %v2401_v42, %v2351_v2  ;;  %v2436_v61 = vpop.permute.xlu1 %2435  ;;  %v2462_v41 = vsel %vm2453_vm4, %v7786_v59, %v2434_v47  ;;  %8174 = vst [vmem:[#allocation107_spill] sm:$0xff] %v6892_v50 }
 0x44b   : > { %v2463_v62 = vsel %vm2453_vm4, %v7784_v45, %v2436_v61  ;;  %v2466_v31 = vmul.f32 %v6874_v23, %v2462_v41  ;;  %v2478_v63 = vmul.f32 %v6877_v52, %v2462_v41 }
 0x44c   : > { %v2418_v2 = vadd.f32 %v2413_v13, %v2394_v14  ;;  %v2430_v18 = vadd.f32 %v2425_v4, %v2406_v21  ;;  %v2490_v26 = vmul.f32 %v6884_v58, %v2463_v62  ;;  %v2502_v60 = vmul.f32 %v6892_v50, %v2463_v62 }
 0x44d   : > { %v2471_v30 = vadd.f32 %v2466_v31, %v2416_v24  ;;  %v2483_v55 = vadd.f32 %v2478_v63, %v2428_v35  ;;  %v2438_v8 = vpop.permute.xlu0 %2437  ;;  %v7785_v62 = vunpack.i.l.bf16 %v6719_v0 }
 0x44e   : > { %v2440_v6 = vpop.permute.xlu1 %2439  ;;  %v2460_v51 = vsel %vm2453_vm4, %v2434_v47, %v2438_v8 }
 0x44f   : > { %v2461_v3 = vsel %vm2453_vm4, %v2436_v61, %v2440_v6  ;;  %v2467_v42 = vmul.f32 %v6874_v23, %v2460_v51  ;;  %v2479_v13 = vmul.f32 %v6877_v52, %v2460_v51  ;;  %v2495_v14 = vadd.f32 %v2490_v26, %v2471_v30  ;;  %p8271_p3 = scmp.ne.s32.totalorder %s8265_s7, 0 }
 0x450   : > { %v2507_v21 = vadd.f32 %v2502_v60, %v2483_v55  ;;  %v2491_v4 = vmul.f32 %v6884_v58, %v2461_v3  ;;  %v2503_v47 = vmul.f32 %v6892_v50, %v2461_v3  ;;  %v6924_v30 = vstv %s3326_s19 }
 0x451   : > { %v2472_v24 = vadd.f32 %v2467_v42, %v2417_v17  ;;  %v2484_v35 = vadd.f32 %v2479_v13, %v2429_v19  ;;  %v6909_v41 = vpop.permute.xlu0 %2441  ;;  %8175 = vst [vmem:[#allocation87_spill] sm:$0xff] %v6924_v30  ;;  %v6926_v55 = vstv %s3327_s9 }
 0x452   : > { %v6913_v31 = vpop.permute.xlu1 %2443  ;;  %v2458_v61 = vsel %vm2453_vm4, %v2438_v8, %v6909_v41  ;;  %8176 = vst [vmem:[#allocation92_spill] sm:$0xff] %v6926_v55 }
 0x453   : > { %v2459_v63 = vsel %vm2453_vm4, %v2440_v6, %v6913_v31  ;;  %v2468_v17 = vmul.f32 %v6874_v23, %v2458_v61  ;;  %v2480_v19 = vmul.f32 %v6877_v52, %v2458_v61  ;;  %v2496_v26 = vadd.f32 %v2491_v4, %v2472_v24 }
 0x454   : > { %v2508_v60 = vadd.f32 %v2503_v47, %v2484_v35  ;;  %v2492_v51 = vmul.f32 %v6884_v58, %v2459_v63  ;;  %v2504_v8 = vmul.f32 %v6892_v50, %v2459_v63 }
 0x455   : > { %v2473_v3 = vadd.f32 %v2468_v17, %v2418_v2  ;;  %v2485_v42 = vadd.f32 %v2480_v19, %v2430_v18  ;;  %v2517_v13 = vpop.permute.xlu0 %2516  ;;  %v7788_v18 = vunpack.i.h.bf16 %v6719_v0  ;;  %v6941_v17 = vstv %s3328_s16  ;;  %s8267_s16 = sld [smem:[#allocation120_spill]] }
 0x456   : > { %v2513_v6 = vpop.permute.xlu1 %2512  ;;  %8177 = vst [vmem:[#allocation110_spill] sm:$0xff] %v6941_v17  ;;  %v6943_v19 = vstv %s3329_s12  ;;  %v7052_v0 = vstv %s3349_s15 }
 0x457   : > { %v2541_v4 = vsel %vm2532_vm5, %v7785_v62, %v2513_v6  ;;  %v2539_v24 = vsel %vm2532_vm5, %v2513_v6, %v2517_v13  ;;  %v2497_v61 = vadd.f32 %v2492_v51, %v2473_v3  ;;  %v2509_v45 = vadd.f32 %v2504_v8, %v2485_v42  ;;  %8178 = vst [vmem:[#allocation108_spill] sm:$0xff] %v6943_v19 }
 0x458   : > { %v2545_v35 = vmul.f32 %v6924_v30, %v2541_v4  ;;  %v2557_v47 = vmul.f32 %v6926_v55, %v2541_v4  ;;  %v2546_v63 = vmul.f32 %v6924_v30, %v2539_v24  ;;  %v2558_v2 = vmul.f32 %v6926_v55, %v2539_v24  ;;  %8184 = vst [vmem:[#allocation105_spill] sm:$0xff] %v7052_v0 }
 0x459   : > { %v2515_v62 = vpop.permute.xlu0 %2514 }
 0x45a   : > { %v2550_v6 = vadd.f32 %v2545_v35, %v2495_v14  ;;  %v2562_v51 = vadd.f32 %v2557_v47, %v2507_v21  ;;  %v2551_v8 = vadd.f32 %v2546_v63, %v2496_v26  ;;  %v2563_v3 = vadd.f32 %v2558_v2, %v2508_v60  ;;  %v6945_v42 = vpop.permute.xlu1 %2520 }
 0x45b   : > { %8179 = vst [vmem:[#allocation88_spill] sm:$0xff] %v6945_v42  ;;  %v2537_v4 = vsel %vm2532_vm5, %v2517_v13, %v6945_v42  ;;  %v2542_v24 = vsel %vm2532_vm5, %v7788_v18, %v2515_v62  ;;  %s8268_s12 = smov %s8267_s16 }
 0x45c   : > { %v2547_v59 = vmul.f32 %v6924_v30, %v2537_v4  ;;  %v2559_v15 = vmul.f32 %v6926_v55, %v2537_v4  ;;  %v2569_v14 = vmul.f32 %v6941_v17, %v2542_v24  ;;  %v2581_v21 = vmul.f32 %v6943_v19, %v2542_v24 }
 0x45d   : > { %v6958_v26 = vpop.permute.xlu0 %2522 }
 0x45e   : > { %v2552_v60 = vadd.f32 %v2547_v59, %v2497_v61  ;;  %v2564_v35 = vadd.f32 %v2559_v15, %v2509_v45  ;;  %v2574_v13 = vadd.f32 %v2569_v14, %v2550_v6  ;;  %v2586_v47 = vadd.f32 %v2581_v21, %v2562_v51  ;;  %v2519_v63 = vpop.permute.xlu1 %2518 }
 0x45f   : > { %v2540_v2 = vsel %vm2532_vm5, %v2515_v62, %v2519_v63  ;;  %v2538_v4 = vsel %vm2532_vm5, %v2519_v63, %v6958_v26  ;;  %v7794_v15 = vunpack.i.l.bf16 %v6727_v49  ;;  %v6970_v59 = vstv %s3330_s22  ;;  %s7512_s22 = scalar_lea.hbm %s8267_s16, %s3357_s4 }
 0x460   : > { %v2570_v18 = vmul.f32 %v6941_v17, %v2540_v2  ;;  %v2582_v24 = vmul.f32 %v6943_v19, %v2540_v2  ;;  %v2571_v37 = vmul.f32 %v6941_v17, %v2538_v4  ;;  %v2583_v9 = vmul.f32 %v6943_v19, %v2538_v4  ;;  %8180 = vst [vmem:[#allocation94_spill] sm:$0xff] %v6970_v59 }
 0x461   : > { %v6972_v45 = vstv %s3331_s25  ;;  %v2592_v61 = vpop.permute.xlu0 %2591  ;;  %s2987_s25 = scalar_lea.sflag [#allocation4], %s8261_s5 }
 0x462   : > { %8181 = vst [vmem:[#allocation73_spill] sm:$0xff] %v6972_v45  ;;  %v2575_v62 = vadd.f32 %v2570_v18, %v2551_v8  ;;  %v2587_v6 = vadd.f32 %v2582_v24, %v2563_v3  ;;  %v2576_v51 = vadd.f32 %v2571_v37, %v2552_v60  ;;  %v2588_v14 = vadd.f32 %v2583_v9, %v2564_v35  ;;  %v2596_v21 = vpop.permute.xlu1 %2595 }
 0x463   : > { %v2617_v63 = vsel %vm1595_vm13, %v2592_v61, %v2596_v21  ;;  %v2619_v2 = vsel %vm1595_vm13, %v7794_v15, %v2592_v61  ;;  %v7799_v37 = vunpack.i.h.bf16 %v6727_v49  ;;  %v6985_v9 = vstv %s3332_s27  ;;  %s3833_s27 = scalar_lea.vmem %s7514_s26, 640 }
 0x464   : > { %v2623_v4 = vmul.f32 %v6970_v59, %v2619_v2  ;;  %v2624_v36 = vmul.f32 %v6970_v59, %v2617_v63  ;;  %v2635_v19 = vmul.f32 %v6972_v45, %v2619_v2  ;;  %v2636_v18 = vmul.f32 %v6972_v45, %v2617_v63  ;;  %p3834_p5 = scmp.ne.s32.totalorder %s7514_s26, %s3833_s27 }
 0x465   : > { %v6987_v8 = vstv %s3333_s0  ;;  %v6989_v3 = vpop.permute.xlu0 %2599  ;;  %s3983_s0 = smov [#allocation18]  }
 0x466   : > { %8182 = vst [vmem:[#allocation89_spill] sm:$0xff] %v6989_v3  ;;  %v2628_v60 = vadd.f32 %v2623_v4, %v2574_v13  ;;  %v6991_v35 = vadd.f32 %v2624_v36, %v2575_v62  ;;  %v2640_v24 = vadd.f32 %v2635_v19, %v2586_v47  ;;  %v6993_v61 = vadd.f32 %v2636_v18, %v2587_v6  ;;  %v2594_v15 = vpop.permute.xlu1 %2593  ;;  %p3835_p4 = pnand %p3834_p5, %p8271_p3 }
 0x467   : > { %v2620_v63 = vsel %vm1595_vm13, %v7799_v37, %v2594_v15  ;;  %v2615_v2 = vsel %vm1595_vm13, %v2596_v21, %v6989_v3 }
 0x468   : > { %v2647_v55 = vmul.f32 %v6985_v9, %v2620_v63  ;;  %v2659_v30 = vmul.f32 %v6987_v8, %v2620_v63  ;;  %v2625_v36 = vmul.f32 %v6970_v59, %v2615_v2  ;;  %v2637_v19 = vmul.f32 %v6972_v45, %v2615_v2  ;;  %p3836_p2 = pneg %p3835_p4 }
 0x469   : > { %v2598_v13 = vpop.permute.xlu0 %2597  ;;  %v7805_v2 = vunpack.i.l.bf16 %v6731_v39  ;;  %v7014_v45 = vstv %s3334_s1  ;;  %v7031_v59 = vstv %s3337_s11  ;;  %s3837_s1 = sshll.u32 %s3983_s0, 4  ;;  %s3838_s1 = int_to_ptr.vmem [resolvable:$false] %s3837_s1 }
 0x46a   : > { %v2652_v47 = vadd.f32 %v2647_v55, %v2628_v60  ;;  %v2664_v62 = vadd.f32 %v2659_v30, %v2640_v24  ;;  %v2630_v6 = vadd.f32 %v2625_v36, %v2576_v51  ;;  %v2642_v4 = vadd.f32 %v2637_v19, %v2588_v14  ;;  %v7006_v18 = vpop.permute.xlu1 %2601  ;;  %p3840_p8 = scmp.lt.s32.totalorder %s7514_s26, %s3838_s1 }
 0x46b   : > { %8183 = vst [vmem:[#allocation68_spill] sm:$0xff] %v7006_v18  ;;  %v2616_v21 = vsel %vm1595_vm13, %v2598_v13, %v7006_v18  ;;  %v7016_v55 = vstv %s3335_s17  ;;  %v7029_v18 = vstv %s3336_s3  ;;  %s3839_s17 = scalar_lea.vmem %s3838_s1, 1280 }
 0x46c   : > { %v2649_v63 = vmul.f32 %v6985_v9, %v2616_v21  ;;  %v2661_v37 = vmul.f32 %v6987_v8, %v2616_v21  ;;  %v7816_v21 = vunpack.i.h.bf16 %v6731_v39  ;;  %v2928_v39 = vstv %s3348_s29  ;;  %p3841_p6 = scmp.lt.s32.totalorder %s3839_s17, %s3833_s27 }
 0x46d   : > { %v2674_v30 = vpop.permute.xlu0 %2673 }
 0x46e   : > { %v7018_v51 = vadd.f32 %v2649_v63, %v2630_v6  ;;  %v7020_v14 = vadd.f32 %v2661_v37, %v2642_v4  ;;  %v2670_v60 = vpop.permute.xlu1 %2669  ;;  %v2904_v63 = vstv %s3346_s21  ;;  %p3842_p7 = por %p3841_p6, %p3840_p8 }
 0x46f   : > { %v2697_v24 = vsel %vm1753_vm15, %v7805_v2, %v2670_v60  ;;  %v2916_v2 = vstv %s3347_s23 }
 0x470   : > { %v2701_v36 = vmul.f32 %v7014_v45, %v2697_v24  ;;  %v2713_v19 = vmul.f32 %v7016_v55, %v2697_v24  ;;  %p3843_p10 = pnand %p3842_p7, %p3836_p2 }
 0x471   : > { %v7033_v6 = vpop.permute.xlu0 %2671 }
 0x472   : > { %v7035_v37 = vpop.permute.xlu1 %2677  ;;  %v2698_v4 = vsel %vm1753_vm15, %v7816_v21, %v7033_v6  ;;  %v2706_v49 = vadd.f32 %v2701_v36, %v2652_v47  ;;  %v2718_v24 = vadd.f32 %v2713_v19, %v2664_v62  ;;  %v7067_v62 = vmul.f32 %v2904_v63, %v6687_v20 }
 0x473   : > { %v2725_v3 = vmul.f32 %v7029_v18, %v2698_v4  ;;  %v2737_v17 = vmul.f32 %v7031_v59, %v2698_v4  ;;  %v7070_v36 = vmul.f32 %v2916_v2, %v6687_v20  ;;  %v7084_v19 = vmul.f32 %v6587_v46, %v2904_v63 }
 0x474   : > { %8187 = vst [vmem:[#allocation106_spill] sm:$0xff] %v7067_v62  ;;  %v7089_v20 = vmul.f32 %v6595_v40, %v2904_v63 }
 0x475   : > { %v7046_v42 = vpop.permute.xlu0 %2679  ;;  %v7054_v21 = vadd.f32 %v2725_v3, %v2706_v49  ;;  %v7056_v50 = vadd.f32 %v2737_v17, %v2718_v24  ;;  %8188 = vst [vmem:[#allocation44_spill] sm:$0xff] %v7070_v36  ;;  %v2618_v49 = vsel %vm1595_vm13, %v2594_v15, %v2598_v13  ;;  %v7077_v17 = vmul.f32 %v2928_v39, %v6679_v44 }
 0x476   : > { %v2676_v47 = vpop.permute.xlu1 %2675  ;;  %v7081_v3 = vmul.f32 %v7052_v0, %v6679_v44  ;;  %8191 = vst [vmem:[#allocation95_spill] sm:$0xff] %v7084_v19  ;;  %8192 = vst [vmem:[#allocation74_spill] sm:$0xff] %v7089_v20  ;;  %v7092_v15 = vmul.f32 %v6587_v46, %v2916_v2  ;;  %v7095_v13 = vmul.f32 %v6589_v38, %v2928_v39  ;;  %v7163_v20 = vstv %s7074_s8 }
 0x477   : > { %8185 = vst [vmem:[#allocation99_spill] sm:$0xff] %v7054_v21  ;;  %8186 = vst [vmem:[#allocation104_spill] sm:$0xff] %v7056_v50  ;;  %v7099_v24 = vmul.f32 %v6589_v38, %v7052_v0  ;;  %v2695_v44 = vsel %vm1753_vm15, %v2670_v60, %v2674_v30  ;;  %v7109_v46 = vmul.f32 %v6603_v54, %v2904_v63  ;;  %v7165_v50 = vmul.f32 0.0, %v2904_v63 }
 0x478   : > { %8189 = vst [vmem:[#allocation51_spill] sm:$0xff] %v7077_v17  ;;  %8190 = vst [vmem:[#allocation97_spill] sm:$0xff] %v7081_v3  ;;  %v7106_v3 = vmul.f32 %v6595_v40, %v2916_v2  ;;  %v2660_v38 = vmul.f32 %v6987_v8, %v2618_v49  ;;  %v2693_v60 = vsel %vm1753_vm15, %v2674_v30, %v7035_v37  ;;  %v7123_v40 = vstv %s7044_s20 }
 0x479   : > { %v7086_v4 = vpop.permute.xlu0 %2747  ;;  %8193 = vst [vmem:[#allocation46_spill] sm:$0xff] %v7092_v15  ;;  %8194 = vst [vmem:[#allocation96_spill] sm:$0xff] %v7095_v13  ;;  %v7112_v15 = vmul.f32 %v6603_v54, %v2916_v2  ;;  %v2648_v13 = vmul.f32 %v6985_v9, %v2618_v49  ;;  %v7127_v54 = vmul.f32 %v6597_v56, %v7052_v0  ;;  %v7167_v21 = vmul.f32 0.0, %v2916_v2 }
 0x47a   : > { %8195 = vst [vmem:[#allocation98_spill] sm:$0xff] %v7099_v24  ;;  %v7103_v19 = vpop.permute.xlu1 %2751  ;;  %8196 = vst [vmem:[#allocation100_spill] sm:$0xff] %v7106_v3  ;;  %v7120_v24 = vmul.f32 %v6597_v56, %v2928_v39  ;;  %v7130_v17 = vmul.f32 %v6605_v7, %v2928_v39  ;;  %v7134_v49 = vmul.f32 %v6605_v7, %v7052_v0  ;;  %v7152_v3 = vstv %s7060_s24 }
 0x47b   : > { %8197 = vst [vmem:[#allocation75_spill] sm:$0xff] %v7109_v46  ;;  %8198 = vst [vmem:[#allocation41_spill] sm:$0xff] %v7112_v15  ;;  %v2702_v30 = vmul.f32 %v7014_v45, %v2695_v44  ;;  %v2714_v36 = vmul.f32 %v7016_v55, %v2695_v44  ;;  %v7139_v15 = vstv %s7048_s13  ;;  %v7144_v46 = vstv %s7050_s14 }
 0x47c   : > { %8199 = vst [vmem:[#allocation67_spill] sm:$0xff] %v7120_v24  ;;  %8200 = vst [vmem:[#allocation78_spill] sm:$0xff] %v7127_v54  ;;  %v2703_v56 = vmul.f32 %v7014_v45, %v2693_v60  ;;  %v2715_v54 = vmul.f32 %v7016_v55, %v2693_v60  ;;  %v7149_v24 = vstv %s7058_s30  ;;  %v2653_v7 = vadd.f32 %v2648_v13, %v6991_v35 }
 0x47d   : > { %8201 = vst [vmem:[#allocation70_spill] sm:$0xff] %v7130_v17  ;;  %8202 = vst [vmem:[#allocation82_spill] sm:$0xff] %v7134_v49  ;;  %v7141_v62 = vpop.permute.xlu0 %2755  ;;  %v2665_v0 = vadd.f32 %v2660_v38, %v6993_v61  ;;  %v7157_v44 = vstv %s7062_s2  ;;  %v7160_v49 = vstv %s7064_s6  ;;  %v7169_v60 = vmul.f32 0.0, %v2928_v39 }
 0x47e   : > { %8203 = vst [vmem:[#allocation55_spill] sm:$0xff] %v7144_v46  ;;  %v2290_v17 = vpop.permute.xlu1 %2289  ;;  %8204 = vst [vmem:[#allocation42_spill] sm:$0xff] %v7149_v24  ;;  %v2707_v46 = vadd.f32 %v2702_v30, %v2653_v7  ;;  %v7179_v38 = vadd.f32 %v2703_v56, %v7018_v51  ;;  %v7182_v2 = vadd.f32 %v2715_v54, %v7020_v14  ;;  %v8208_v63 = vunpack.i.l.bf16 %v6717_v53 }
 0x47f   : > { %8205 = vst [vmem:[#allocation77_spill] sm:$0xff] %v7152_v3  ;;  %8206 = vst [vmem:[#allocation52_spill] sm:$0xff] %v7167_v21  ;;  %v2719_v24 = vadd.f32 %v2714_v36, %v2665_v0  ;;  %v8207_v3 = vunpack.i.h.bf16 %v6717_v53  ;;  %v2299_v61 = vsel %vm2295_vm2, %v6794_v32, %v2290_v17  ;;  %v2696_v32 = vsel %vm1753_vm15, %v7033_v6, %v2676_v47  ;;  %v8249_v10 = vld [vmem:[#allocation51_spill] sm:$0xff] }
 0x480   : > { %v2694_v51 = vsel %vm1753_vm15, %v2676_v47, %v7046_v42  ;;  %v2335_v53 = vmul.f32 %v6744_v22, %v2299_v61  ;;  %v8209_v54 = vunpack.i.l.bf16 %v6701_v28 }
 0x481   : > { %v2297_v35 = vsel %vm2295_vm2, %v2290_v17, %v8207_v3  ;;  %v2288_v13 = vpop.permute.xlu0 %2287 }
 0x482   : > { %v2367_v39 = vpop.permute.xlu1 %2366  ;;  %v2296_v0 = vsel %vm2295_vm2, %v2288_v13, %v8208_v63  ;;  %v2298_v36 = vsel %vm2295_vm2, %v6791_v11, %v2288_v13  ;;  %v2336_v3 = vmul.f32 %v6744_v22, %v2297_v35  ;;  %v2347_v22 = vmul.f32 %v6754_v48, %v2299_v61 }
 0x483   : > { %v2311_v14 = vmul.f32 %v6739_v29, %v2298_v36  ;;  %v2312_v17 = vmul.f32 %v6739_v29, %v2296_v0  ;;  %v2375_v11 = vsel %vm2374_vm3, %v2367_v39, %v8209_v54  ;;  %v2377_v6 = vsel %vm2374_vm3, %v6862_v33, %v2367_v39 }
 0x484   : > { %v2323_v56 = vmul.f32 %v6741_v43, %v2298_v36  ;;  %v2324_v29 = vmul.f32 %v6741_v43, %v2296_v0  ;;  %v2348_v13 = vmul.f32 %v6754_v48, %v2297_v35  ;;  %v8210_v54 = vunpack.i.h.bf16 %v6701_v28 }
 0x485   : > { %v2316_v30 = vadd.f32 %v2311_v14, %v6746_v12  ;;  %v2317_v47 = vadd.f32 %v2312_v17, %v6746_v12  ;;  %v2369_v7 = vpop.permute.xlu0 %2368  ;;  %v2726_v61 = vmul.f32 %v7029_v18, %v2696_v32  ;;  %v2738_v48 = vmul.f32 %v7031_v59, %v2696_v32 }
 0x486   : > { %v7214_v63 = vpop.permute.xlu1 %2526  ;;  %v2376_v33 = vsel %vm2374_vm3, %v2369_v7, %v8210_v54  ;;  %v2378_v12 = vsel %vm2374_vm3, %v6859_v27, %v2369_v7  ;;  %v2328_v39 = vadd.f32 %v2323_v56, %v6748_v25  ;;  %v2329_v43 = vadd.f32 %v2324_v29, %v6748_v25 }
 0x487   : > { %v2340_v0 = vadd.f32 %v2335_v53, %v2316_v30  ;;  %v2341_v36 = vadd.f32 %v2336_v3, %v2317_v47  ;;  %v2390_v35 = vmul.f32 %v6812_v34, %v2377_v6  ;;  %v2391_v28 = vmul.f32 %v6812_v34, %v2375_v11 }
 0x488   : > { %v2402_v14 = vmul.f32 %v6818_v57, %v2377_v6  ;;  %v2403_v17 = vmul.f32 %v6818_v57, %v2375_v11  ;;  %v2352_v54 = vadd.f32 %v2347_v22, %v2328_v39  ;;  %v2353_v27 = vadd.f32 %v2348_v13, %v2329_v43 }
 0x489   : > { %v2446_v7 = vpop.permute.xlu0 %2445  ;;  %v2395_v56 = vadd.f32 %v2390_v35, %v2340_v0  ;;  %v2396_v21 = vadd.f32 %v2391_v28, %v2341_v36  ;;  %v2414_v25 = vmul.f32 %v6822_v5, %v2378_v12  ;;  %v2415_v53 = vmul.f32 %v6822_v5, %v2376_v33 }
 0x48a   : > { %v2604_v3 = vpop.permute.xlu1 %2603  ;;  %v2407_v30 = vadd.f32 %v2402_v14, %v2352_v54  ;;  %v2408_v32 = vadd.f32 %v2403_v17, %v2353_v27  ;;  %v2426_v47 = vmul.f32 %v6833_v1, %v2378_v12  ;;  %v2427_v34 = vmul.f32 %v6833_v1, %v2376_v33 }
 0x48b   : > { %v2727_v6 = vmul.f32 %v7029_v18, %v2694_v51  ;;  %v2739_v57 = vmul.f32 %v7031_v59, %v2694_v51  ;;  %v2419_v11 = vadd.f32 %v2414_v25, %v2395_v56  ;;  %v2420_v29 = vadd.f32 %v2415_v53, %v2396_v21  ;;  %v8213_v25 = vld [vmem:[#allocation107_spill] sm:$0xff] }
 0x48c   : > { %v7237_v22 = vadd.f32 %v2726_v61, %v2707_v46  ;;  %v7239_v13 = vadd.f32 %v2738_v48, %v2719_v24  ;;  %v2431_v39 = vadd.f32 %v2426_v47, %v2407_v30  ;;  %v2432_v43 = vadd.f32 %v2427_v34, %v2408_v32  ;;  %v8214_v47 = vld [vmem:[#allocation93_spill] sm:$0xff] }
 0x48d   : > { %v2448_v5 = vpop.permute.xlu0 %2447  ;;  %v2773_v12 = vsel %vm895_vm9, %v7086_v4, %v7103_v19  ;;  %v2771_v1 = vsel %vm895_vm9, %v7103_v19, %v7141_v62  ;;  %v8211_v51 = vunpack.i.l.bf16 %v6711_v16  ;;  %v2456_v24 = vsel %vm2453_vm4, %v6909_v41, %v2446_v7 }
 0x48e   : > { %v7256_v46 = vpop.permute.xlu1 %2683  ;;  %v2469_v33 = vmul.f32 %v6874_v23, %v2456_v24  ;;  %v2481_v36 = vmul.f32 %v6877_v52, %v2456_v24  ;;  %v7263_v19 = vadd.f32 %v2727_v6, %v7179_v38  ;;  %v7266_v48 = vadd.f32 %v2739_v57, %v7182_v2  ;;  %v8220_v24 = vld [vmem:[#allocation87_spill] sm:$0xff] }
 0x48f   : > { %v2454_v21 = vsel %vm2453_vm4, %v2446_v7, %v8211_v51  ;;  %v8212_v35 = vunpack.i.h.bf16 %v6711_v16  ;;  %v2457_v28 = vsel %vm2453_vm4, %v6913_v31, %v2448_v5  ;;  %v7276_v38 = vmul.f32 %v7123_v40, %v2773_v12 }
 0x490   : > { %v2470_v0 = vmul.f32 %v6874_v23, %v2454_v21  ;;  %v2482_v61 = vmul.f32 %v6877_v52, %v2454_v21  ;;  %v2474_v23 = vadd.f32 %v2469_v33, %v2419_v11  ;;  %v2486_v17 = vadd.f32 %v2481_v36, %v2431_v39  ;;  %v8217_v11 = vld [vmem:[#allocation88_spill] sm:$0xff]  ;;  %v8219_v21 = vld [vmem:[#allocation89_spill] sm:$0xff] }
 0x491   : > { %v2455_v41 = vsel %vm2453_vm4, %v2448_v5, %v8212_v35  ;;  %v2525_v52 = vpop.permute.xlu0 %2524  ;;  %v7279_v2 = vmul.f32 %v7139_v15, %v2773_v12  ;;  %v7282_v16 = vmul.f32 %v7123_v40, %v2771_v1  ;;  %v2536_v27 = vsel %vm2532_vm5, %v6958_v26, %v7214_v63  ;;  %v8221_v35 = vld [vmem:[#allocation85_spill] sm:$0xff] }
 0x492   : > { %v2475_v14 = vadd.f32 %v2470_v0, %v2420_v29  ;;  %v2487_v54 = vadd.f32 %v2482_v61, %v2432_v43  ;;  %v7288_v31 = vpop.permute.xlu1 %2759  ;;  %v2493_v7 = vmul.f32 %v6884_v58, %v2457_v28  ;;  %v2494_v56 = vmul.f32 %v6884_v58, %v2455_v41 }
 0x493   : > { %v2505_v53 = vmul.f32 %v8213_v25, %v2457_v28  ;;  %v2506_v30 = vmul.f32 %v8213_v25, %v2455_v41  ;;  %v7295_v32 = vmul.f32 %v7139_v15, %v2771_v1  ;;  %v8215_v34 = vunpack.i.h.bf16 %v8214_v47  ;;  %v8218_v1 = vld [vmem:[#allocation110_spill] sm:$0xff] }
 0x494   : > { %v8216_v26 = vunpack.i.l.bf16 %v8214_v47  ;;  %v2535_v58 = vsel %vm2532_vm5, %v8217_v11, %v2525_v52  ;;  %v2498_v29 = vadd.f32 %v2493_v7, %v2474_v23  ;;  %v2499_v39 = vadd.f32 %v2494_v56, %v2475_v14  ;;  %v8223_v23 = vld [vmem:[#allocation92_spill] sm:$0xff] }
 0x495   : > { %v2534_v6 = vsel %vm2532_vm5, %v7214_v63, %v8215_v34  ;;  %v2510_v43 = vadd.f32 %v2505_v53, %v2486_v17  ;;  %v2511_v5 = vadd.f32 %v2506_v30, %v2487_v54  ;;  %v2606_v12 = vpop.permute.xlu0 %2605  ;;  %v2572_v51 = vmul.f32 %v8218_v1, %v2536_v27  ;;  %v8224_v54 = vld [vmem:[#allocation108_spill] sm:$0xff]  ;;  %v8225_v53 = vld [vmem:[#allocation94_spill] sm:$0xff] }
 0x496   : > { %v2533_v57 = vsel %vm2532_vm5, %v2525_v52, %v8216_v26  ;;  %v2613_v63 = vsel %vm1595_vm13, %v8219_v21, %v2604_v3  ;;  %v2548_v33 = vmul.f32 %v8220_v24, %v2535_v58  ;;  %v7315_v36 = vpop.permute.xlu1 %2749  ;;  %v2573_v61 = vmul.f32 %v8218_v1, %v2534_v6  ;;  %v8226_v26 = vld [vmem:[#allocation68_spill] sm:$0xff] }
 0x497   : > { %v2549_v0 = vmul.f32 %v8220_v24, %v2533_v57  ;;  %v8222_v41 = vunpack.i.l.bf16 %v8221_v35  ;;  %v2560_v14 = vmul.f32 %v8223_v23, %v2535_v58  ;;  %v2561_v17 = vmul.f32 %v8223_v23, %v2533_v57  ;;  %v8229_v23 = vld [vmem:[#allocation109_spill] sm:$0xff] }
 0x498   : > { %v2584_v52 = vmul.f32 %v8224_v54, %v2536_v27  ;;  %v2585_v7 = vmul.f32 %v8224_v54, %v2534_v6  ;;  %v2553_v56 = vadd.f32 %v2548_v33, %v2498_v29  ;;  %v2626_v30 = vmul.f32 %v8225_v53, %v2613_v63  ;;  %v8228_v29 = vld [vmem:[#allocation73_spill] sm:$0xff] }
 0x499   : > { %v2611_v28 = vsel %vm1595_vm13, %v2604_v3, %v8222_v41  ;;  %v2554_v25 = vadd.f32 %v2549_v0, %v2499_v39  ;;  %v2565_v47 = vadd.f32 %v2560_v14, %v2510_v43  ;;  %v2566_v34 = vadd.f32 %v2561_v17, %v2511_v5  ;;  %v2682_v1 = vpop.permute.xlu0 %2681 }
 0x49a   : > { %v2614_v11 = vsel %vm1595_vm13, %v8226_v26, %v2606_v12  ;;  %v2627_v3 = vmul.f32 %v8225_v53, %v2611_v28  ;;  %v2577_v58 = vadd.f32 %v2572_v51, %v2553_v56  ;;  %v8227_v57 = vunpack.i.h.bf16 %v8221_v35  ;;  %v7335_v6 = vpop.permute.xlu1 %2757 }
 0x49b   : > { %v2578_v21 = vadd.f32 %v2573_v61, %v2554_v25  ;;  %v2638_v39 = vmul.f32 %v8228_v29, %v2613_v63  ;;  %v2589_v43 = vadd.f32 %v2584_v52, %v2565_v47  ;;  %v2590_v5 = vadd.f32 %v2585_v7, %v2566_v34 }
 0x49c   : > { %v2612_v27 = vsel %vm1595_vm13, %v2606_v12, %v8227_v57  ;;  %v2691_v24 = vsel %vm1753_vm15, %v7035_v37, %v2682_v1  ;;  %v2639_v33 = vmul.f32 %v8228_v29, %v2611_v28  ;;  %v2631_v0 = vadd.f32 %v2626_v30, %v2577_v58 }
 0x49d   : > { %v2632_v51 = vadd.f32 %v2627_v3, %v2578_v21  ;;  %v2650_v61 = vmul.f32 %v6985_v9, %v2614_v11  ;;  %v2643_v35 = vadd.f32 %v2638_v39, %v2589_v43  ;;  %v2651_v41 = vmul.f32 %v6985_v9, %v2612_v27  ;;  %v7349_v17 = vpop.permute.xlu0 %3623 }
 0x49e   : > { %v2662_v12 = vmul.f32 %v6987_v8, %v2614_v11  ;;  %v8230_v14 = vunpack.i.l.bf16 %v8229_v23  ;;  %v2644_v54 = vadd.f32 %v2639_v33, %v2590_v5  ;;  %v2704_v28 = vmul.f32 %v7014_v45, %v2691_v24  ;;  %v7352_v52 = vpop.permute.xlu1 %2825 }
 0x49f   : > { %v2655_v37 = vadd.f32 %v2650_v61, %v2631_v0  ;;  %v3625_v7 = vunpack.i.l.bf16 %v7349_v17  ;;  %v8231_v56 = vunpack.i.h.bf16 %v8229_v23  ;;  %v2692_v25 = vsel %vm1753_vm15, %v7046_v42, %v7256_v46  ;;  %v8232_v0 = vld [vmem:[#allocation55_spill] sm:$0xff] }
 0x4a0   : > { %v2689_v63 = vsel %vm1753_vm15, %v2682_v1, %v8230_v14  ;;  %v2667_v53 = vadd.f32 %v2662_v12, %v2643_v35  ;;  %v2716_v30 = vmul.f32 %v7016_v55, %v2691_v24  ;;  %v2656_v47 = vadd.f32 %v2651_v41, %v2632_v51  ;;  %v8233_v41 = vld [vmem:[#allocation42_spill] sm:$0xff] }
 0x4a1   : > { %v2690_v9 = vsel %vm1753_vm15, %v7256_v46, %v8231_v56  ;;  %v2663_v34 = vmul.f32 %v6987_v8, %v2612_v27  ;;  %v2705_v26 = vmul.f32 %v7014_v45, %v2689_v63  ;;  %v3626_v11 = vunpack.i.h.bf16 %v7349_v17  ;;  %v2754_v46 = vpop.permute.xlu0 %2753  ;;  %v8234_v17 = vld [vmem:[#allocation99_spill] sm:$0xff] }
 0x4a2   : > { %v2785_v1 = vadd.f32 %v7276_v38, %v7237_v22  ;;  %v2797_v3 = vadd.f32 %v7279_v2, %v7239_v13  ;;  %v2786_v58 = vadd.f32 %v7282_v16, %v7263_v19  ;;  %v2769_v42 = vsel %vm895_vm9, %v7141_v62, %v7288_v31  ;;  %v2834_v38 = vpop.permute.xlu1 %2833 }
 0x4a3   : > { %v2668_v8 = vadd.f32 %v2663_v34, %v2644_v54  ;;  %v2709_v21 = vadd.f32 %v2704_v28, %v2655_v37  ;;  %v2717_v45 = vmul.f32 %v7016_v55, %v2689_v63  ;;  %v2775_v22 = vsel %vm895_vm9, %v3625_v7, %v7086_v4 }
 0x4a4   : > { %v2798_v13 = vadd.f32 %v7295_v32, %v7266_v48  ;;  %v2728_v19 = vmul.f32 %v7029_v18, %v2692_v25  ;;  %v2729_v2 = vmul.f32 %v7029_v18, %v2690_v9  ;;  %v2721_v16 = vadd.f32 %v2716_v30, %v2667_v53 }
 0x4a5   : > { %v2740_v62 = vmul.f32 %v7031_v59, %v2692_v25  ;;  %v2710_v57 = vadd.f32 %v2705_v26, %v2656_v47  ;;  %v2776_v55 = vsel %vm895_vm9, %v3626_v11, %v7315_v36  ;;  %v2774_v4 = vsel %vm895_vm9, %v7315_v36, %v2754_v46  ;;  %v2762_v29 = vpop.permute.xlu0 %2761 }
 0x4a6   : > { %v2741_v27 = vmul.f32 %v7031_v59, %v2690_v9  ;;  %v2782_v48 = vmul.f32 %v7123_v40, %v2769_v42  ;;  %v2779_v32 = vmul.f32 %v7123_v40, %v2775_v22  ;;  %v2772_v18 = vsel %vm895_vm9, %v2754_v46, %v7335_v6  ;;  %v2842_v36 = vpop.permute.xlu1 %2841  ;;  %v8235_v9 = vld [vmem:[#allocation104_spill] sm:$0xff]  ;;  %v8236_v46 = vld [vmem:[#allocation77_spill] sm:$0xff] }
 0x4a7   : > { %v2722_v39 = vadd.f32 %v2717_v45, %v2668_v8  ;;  %v2733_v43 = vadd.f32 %v2728_v19, %v2709_v21  ;;  %v2767_v5 = vsel %vm895_vm9, %v7288_v31, %v3625_v7  ;;  %v2791_v24 = vmul.f32 %v7139_v15, %v2775_v22 }
 0x4a8   : > { %v2794_v59 = vmul.f32 %v7139_v15, %v2769_v42  ;;  %v2745_v33 = vadd.f32 %v2740_v62, %v2721_v16  ;;  %v2803_v51 = vmul.f32 %v8232_v0, %v2776_v55  ;;  %v2804_v61 = vmul.f32 %v8232_v0, %v2774_v4 }
 0x4a9   : > { %v2734_v35 = vadd.f32 %v2729_v2, %v2710_v57  ;;  %v2815_v12 = vmul.f32 %v8233_v41, %v2776_v55  ;;  %v2805_v23 = vmul.f32 %v8232_v0, %v2772_v18  ;;  %v2816_v14 = vmul.f32 %v8233_v41, %v2774_v4  ;;  %v2830_v28 = vpop.permute.xlu0 %2829 }
 0x4aa   : > { %v2783_v63 = vmul.f32 %v7123_v40, %v2767_v5  ;;  %v2817_v31 = vmul.f32 %v8233_v41, %v2772_v18  ;;  %v2784_v54 = vadd.f32 %v2779_v32, %v8234_v17  ;;  %v2853_v37 = vsel %vm517_vm0, %v2842_v36, %v7352_v52 }
 0x4ab   : > { %v2746_v7 = vadd.f32 %v2741_v27, %v2722_v39  ;;  %v2795_v56 = vmul.f32 %v7139_v15, %v2767_v5  ;;  %v2796_v25 = vadd.f32 %v2791_v24, %v8235_v9  ;;  %v2787_v53 = vadd.f32 %v2782_v48, %v2733_v43 }
 0x4ac   : > { %v2809_v30 = vadd.f32 %v2804_v61, %v2785_v1  ;;  %v2799_v47 = vadd.f32 %v2794_v59, %v2745_v33  ;;  %v2768_v40 = vsel %vm895_vm9, %v2762_v29, %v3626_v11  ;;  %v2770_v34 = vsel %vm895_vm9, %v7335_v6, %v2762_v29 }
 0x4ad   : > { %v2810_v26 = vadd.f32 %v2805_v23, %v2786_v58  ;;  %v2821_v42 = vadd.f32 %v2816_v14, %v2797_v3  ;;  %v2857_v8 = vmul.f32 %v8236_v46, %v2853_v37  ;;  %v2851_v15 = vsel %vm517_vm0, %v7352_v52, %v2830_v28  ;;  %v2838_v11 = vpop.permute.xlu0 %2837 }
 0x4ae   : > { %v2822_v21 = vadd.f32 %v2817_v31, %v2798_v13  ;;  %v2808_v45 = vadd.f32 %v2803_v51, %v2784_v54  ;;  %v2869_v1 = vmul.f32 %v7157_v44, %v2853_v37  ;;  %v2849_v22 = vsel %vm517_vm0, %v2830_v28, %v2834_v38  ;;  %v2832_v13 = vpop.permute.xlu1 %2831 }
 0x4af   : > { %v2806_v19 = vmul.f32 %v8232_v0, %v2770_v34  ;;  %v2807_v6 = vmul.f32 %v8232_v0, %v2768_v40  ;;  %v2818_v3 = vmul.f32 %v8233_v41, %v2770_v34  ;;  %v2847_v58 = vsel %vm517_vm0, %v2834_v38, %v2838_v11  ;;  %v8238_v34 = vld [vmem:[#allocation100_spill] sm:$0xff] }
 0x4b0   : > { %v2820_v2 = vadd.f32 %v2815_v12, %v2796_v25  ;;  %v2819_v52 = vmul.f32 %v8233_v41, %v2768_v40  ;;  %v2858_v16 = vmul.f32 %v8236_v46, %v2851_v15  ;;  %v2870_v62 = vmul.f32 %v7157_v44, %v2851_v15 }
 0x4b1   : > { %v7437_v57 = vadd.f32 %v2857_v8, %v2808_v45  ;;  %v2788_v55 = vadd.f32 %v2783_v63, %v2734_v35  ;;  %v2800_v4 = vadd.f32 %v2795_v56, %v2746_v7  ;;  %v2859_v27 = vmul.f32 %v8236_v46, %v2849_v22  ;;  %v2828_v29 = vpop.permute.xlu0 %2827  ;;  %v8239_v45 = vld [vmem:[#allocation67_spill] sm:$0xff] }
 0x4b2   : > { %v2871_v48 = vmul.f32 %v7157_v44, %v2849_v22  ;;  %v2845_v32 = vsel %vm517_vm0, %v2838_v11, %v2842_v36  ;;  %v2860_v38 = vmul.f32 %v8236_v46, %v2847_v58  ;;  %v2872_v18 = vmul.f32 %v7157_v44, %v2847_v58  ;;  %v2840_v14 = vpop.permute.xlu1 %2839  ;;  %v8240_v22 = vld [vmem:[#allocation78_spill] sm:$0xff] }
 0x4b3   : > { %v7445_v39 = vadd.f32 %v2869_v1, %v2820_v2  ;;  %v2811_v43 = vadd.f32 %v2806_v19, %v2787_v53  ;;  %v2812_v5 = vadd.f32 %v2807_v6, %v2788_v55  ;;  %v2823_v24 = vadd.f32 %v2818_v3, %v2799_v47  ;;  %v8237_v47 = vld [vmem:[#allocation74_spill] sm:$0xff]  ;;  %v8242_v3 = vld [vmem:[#allocation75_spill] sm:$0xff] }
 0x4b4   : > { %v2824_v59 = vadd.f32 %v2819_v52, %v2800_v4  ;;  %v2863_v33 = vadd.f32 %v2858_v16, %v2809_v30  ;;  %v2875_v0 = vadd.f32 %v2870_v62, %v2821_v42  ;;  %v2852_v51 = vsel %vm517_vm0, %v2828_v29, %v2832_v13  ;;  %v8243_v2 = vld [vmem:[#allocation106_spill] sm:$0xff]  ;;  %v8245_v62 = vld [vmem:[#allocation44_spill] sm:$0xff] }
 0x4b5   : > { %v2861_v61 = vmul.f32 %v8236_v46, %v2845_v32  ;;  %v2873_v36 = vmul.f32 %v7157_v44, %v2845_v32  ;;  %v2882_v35 = vmul.f32 %v7160_v49, %v2852_v51  ;;  %v2894_v41 = vmul.f32 %v7163_v20, %v2852_v51  ;;  %v2836_v17 = vpop.permute.xlu0 %2835  ;;  %v8246_v4 = vld [vmem:[#allocation62_spill] sm:$0xff] }
 0x4b6   : > { %v2864_v12 = vadd.f32 %v2859_v27, %v2810_v26  ;;  %v2876_v23 = vadd.f32 %v2871_v48, %v2822_v21  ;;  %v2865_v63 = vadd.f32 %v2860_v38, %v2811_v43  ;;  %v2877_v31 = vadd.f32 %v2872_v18, %v2823_v24  ;;  %v8247_v48 = vld [vmem:[#allocation63_spill] sm:$0xff]  ;;  %v8248_v43 = vld [vmem:[#allocation70_spill] sm:$0xff] }
 0x4b7   : > { %v2887_v54 = vadd.f32 %v2882_v35, %v2863_v33  ;;  %v2899_v37 = vadd.f32 %v2894_v41, %v2875_v0  ;;  %v2848_v28 = vsel %vm517_vm0, %v2836_v17, %v2840_v14  ;;  %v2850_v7 = vsel %vm517_vm0, %v2832_v13, %v2836_v17  ;;  %v8244_v13 = vld [vmem:[#allocation41_spill] sm:$0xff]  ;;  %v8250_v24 = vld [vmem:[#allocation82_spill] sm:$0xff]  ;;  %v8253_v35 = vld [vmem:[#allocation64_spill] sm:$0xff] }
 0x4b8   : > { %v2883_v44 = vmul.f32 %v7160_v49, %v2850_v7  ;;  %v2884_v56 = vmul.f32 %v7160_v49, %v2848_v28  ;;  %v2895_v9 = vmul.f32 %v7163_v20, %v2850_v7  ;;  %v2896_v25 = vmul.f32 %v7163_v20, %v2848_v28  ;;  %v8251_v33 = vld [vmem:[#allocation97_spill] sm:$0xff]  ;;  %v8257_v7 = vld [vmem:[#allocation95_spill] sm:$0xff] }
 0x4b9   : > { %v2866_v53 = vadd.f32 %v2861_v61, %v2812_v5  ;;  %v2878_v30 = vadd.f32 %v2873_v36, %v2824_v59  ;;  %v2911_v40 = vadd.f32 %v8237_v47, %v2887_v54  ;;  %v2923_v26 = vadd.f32 %v8238_v34, %v2899_v37  ;;  %v2844_v21 = vpop.permute.xlu0 %2843 }
 0x4ba   : > { %v2888_v42 = vadd.f32 %v2883_v44, %v2864_v12  ;;  %v2889_v46 = vadd.f32 %v2884_v56, %v2865_v63  ;;  %v2900_v8 = vadd.f32 %v2895_v9, %v2876_v23  ;;  %v2901_v15 = vadd.f32 %v2896_v25, %v2877_v31  ;;  %v8254_v12 = vld [vmem:[#allocation48_spill] sm:$0xff]  ;;  %v8256_v31 = vld [vmem:[#allocation47_spill] sm:$0xff]  ;;  %v8258_v9 = vld [vmem:[#allocation105_spill] sm:$0xff] }
 0x4bb   : > { %v2935_v1 = vadd.f32 %v8239_v45, %v2911_v40  ;;  %v2947_v11 = vadd.f32 %v8240_v22, %v2923_v26  ;;  %v2846_v19 = vsel %vm517_vm0, %v2840_v14, %v2844_v21  ;;  %v2854_v6 = vsel %vm517_vm0, %v2844_v21, %v2828_v29  ;;  %v8255_v14 = vld [vmem:[#allocation65_spill] sm:$0xff]  ;;  %v8259_v40 = vld [vmem:[#allocation46_spill] sm:$0xff] }
 0x4bc   : > { %v2912_v58 = vadd.f32 %v8242_v3, %v2888_v42  ;;  %v2913_v52 = vadd.f32 %v8243_v2, %v2889_v46  ;;  %v2924_v16 = vadd.f32 %v8244_v13, %v2900_v8  ;;  %v2925_v55 = vadd.f32 %v8245_v62, %v2901_v15  ;;  %v8262_v8 = vld [vmem:[#allocation52_spill] sm:$0xff]  ;;  %v8263_v21 = vld [vmem:[#allocation98_spill] sm:$0xff] }
 0x4bd   : > { %v2952_v27 = vadd.f32 %v2935_v1, %v8246_v4  ;;  %v2962_v32 = vadd.f32 %v2947_v11, %v8247_v48  ;;  %v2881_v38 = vmul.f32 %v7160_v49, %v2854_v6  ;;  %v2885_v18 = vmul.f32 %v7160_v49, %v2846_v19  ;;  %v8269_v11 = vld [vmem:[#allocation59_spill] sm:$0xff] }
 0x4be   : > { %v2936_v5 = vadd.f32 %v8248_v43, %v2912_v58  ;;  %v2937_v29 = vadd.f32 %v8249_v10, %v2913_v52  ;;  %v2948_v59 = vadd.f32 %v8250_v24, %v2924_v16  ;;  %v2949_v0 = vadd.f32 %v8251_v33, %v2925_v55 }
 0x4bf   : > { %2957 = vst [vmem:[%s7482_s10 + $0x8] sm:$0xff] %v2952_v27  ;;  %v2967_v51 = vmul.f32 0.5, %v2962_v32  ;;  %v2886_v61 = vadd.f32 %v2881_v38, %v7437_v57  ;;  %v2890_v36 = vadd.f32 %v2885_v18, %v2866_v53  ;;  %v2893_v49 = vmul.f32 %v7163_v20, %v2854_v6  ;;  %v8270_v6 = vld [vmem:[#allocation61_spill] sm:$0xff] }
 0x4c0   : > { %v2953_v41 = vadd.f32 %v2936_v5, %v8253_v35  ;;  %v2954_v23 = vadd.f32 %v2937_v29, %v8254_v12  ;;  %v2963_v63 = vadd.f32 %v2948_v59, %v8255_v14  ;;  %v2964_v17 = vadd.f32 %v2949_v0, %v8256_v31 }
 0x4c1   : > { %v2973_v54 = vmul.f32 1.442695, %v2967_v51  ;;  %v2897_v37 = vmul.f32 %v7163_v20, %v2846_v19  ;;  %v2898_v28 = vadd.f32 %v2893_v49, %v7445_v39  ;;  %v2910_v57 = vadd.f32 %v8257_v7, %v2886_v61  ;;  %v8260_v20 = vld [vmem:[#allocation96_spill] sm:$0xff] }
 0x4c2   : > { %2958 = vst [vmem:[%s7482_s10 + $0x10] sm:$0xff] %v2953_v41  ;;  %2959 = vst [vmem:[%s7482_s10 + $0x18] sm:$0xff] %v2954_v23  ;;  %v2968_v44 = vmul.f32 0.5, %v2963_v63  ;;  %v2969_v56 = vmul.f32 0.5, %v2964_v17  ;;  %v2945_v25 = vmul.f32 0.0, %v8258_v9  ;;  %v2914_v53 = vadd.f32 %v7165_v50, %v2890_v36  ;;  %v8264_v50 = vld [vmem:[#allocation58_spill] sm:$0xff] }
 0x4c3   : > { %3675 = vpow2.f32 %v2973_v54  ;;  %v2902_v47 = vadd.f32 %v2897_v37, %v2878_v30  ;;  %v2922_v34 = vadd.f32 %v8259_v40, %v2898_v28  ;;  %v2934_v26 = vadd.f32 %v8260_v20, %v2910_v57  ;;  %v8266_v30 = vld [vmem:[#allocation60_spill] sm:$0xff] }
 0x4c4   : > { %v2975_v39 = vmul.f32 1.442695, %v2968_v44  ;;  %v2977_v42 = vmul.f32 1.442695, %v2969_v56  ;;  %v2938_v46 = vadd.f32 %v7169_v60, %v2914_v53 }
 0x4c5   : > { %v2926_v15 = vadd.f32 %v8262_v8, %v2902_v47  ;;  %v2946_v45 = vadd.f32 %v8263_v21, %v2922_v34  ;;  %v2951_v1 = vadd.f32 %v2934_v26, %v8264_v50 }
 0x4c6   : > { %3677 = vpow2.f32 %v2975_v39  ;;  %v2955_v22 = vadd.f32 %v2938_v46, %v8266_v30 }
 0x4c7   : > { %3679 = vpow2.f32 %v2977_v42  ;;  %v2950_v60 = vadd.f32 %v2945_v25, %v2926_v15  ;;  %2956 = vst [vmem:[%s7482_s10] sm:$0xff] %v2951_v1  ;;  %v2961_v19 = vadd.f32 %v2946_v45, %v8269_v11 }
 0x4c8   : > { %2960 = vst [vmem:[%s7482_s10 + $0x20] sm:$0xff] %v2955_v22 }
 0x4c9   : > { %v2965_v3 = vadd.f32 %v2950_v60, %v8270_v6  ;;  %v2966_v58 = vmul.f32 0.5, %v2961_v19 }
 0x4ca   : > { %3846 = shalt.err (!%p3843_p10)
}
 0x4cb   : > { %s3847_s3 = scalar_lea.hbm %s7512_s22, 640  ;;  %s3851_s23 = scalar_lea.hbm %s8268_s12, 1280 }
 0x4cc   : > { %p3848_p11 = scmp.ne.s32.totalorder %s7512_s22, %s3847_s3  ;;  %p3852_p13 = scmp.lt.u32.totalorder %s7512_s22, %s8268_s12 }
 0x4cd   : > { %p3853_p0 = scmp.lt.u32.totalorder %s3851_s23, %s3847_s3  ;;  %p3855_p5 = scmp.lt.u32.totalorder %s3847_s3, %s7512_s22 }
 0x4ce   : > { %p3849_p12 = pnand %p3848_p11, %p8271_p3 }
 0x4cf   : > { %p3854_p1 = por %p3853_p0, %p3852_p13 }
 0x4d0   : > { %p3850_p9 = pneg %p3849_p12 }
 0x4d1   : > { %p3856_p4 = por %p3855_p5, %p3854_p1 }
 0x4d3   : > { %p3857_p2 = pnand %p3856_p4, %p3850_p9 }
 0x4d5   : > { %3860 = shalt.err (!%p3857_p2)
}
 0x4d6   : > { %3393 = dma.vmem_to_hbm [thread:$0]  (%p8271_p3), %s7514_s26, 640, %s7512_s22, %s2987_s25   ;;  %v2970_v2 = vmul.f32 0.5, %v2965_v3  ;;  %v2971_v52 = vmul.f32 1.442695, %v2966_v58  ;;  %v3676_v13 = vpop.eup %3675 }
 0x4d7   : > { %s486_s20 = scalar_lea.vmem [#allocation19], %s8241_s28  ;;  %v3678_v62 = vpop.eup %3677  ;;  %s8272_s24 = sld [smem:[#allocation121_spill]] }
 0x4d8   : > { %3681 = vpow2.f32 %v2971_v52  ;;  %v2979_v16 = vmul.f32 1.442695, %v2970_v2  ;;  %2982 = vst [vmem:[%s486_s20 + $0x8] sm:$0xff] %v3676_v13  ;;  %v3680_v55 = vpop.eup %3679  ;;  %2983 = vst [vmem:[%s486_s20 + $0x10] sm:$0xff] %v3678_v62  ;;  %s3020_s13 = sshll.u32 %s486_s20, 4  ;;  %s2992_s6 = scalar_lea.sflag [#allocation20], %s8261_s5  ;;  %s7550_s13 = int_to_ptr.vmem [resolvable:$true] %s3020_s13 }
 0x4d9   : > { %2984 = vst [vmem:[%s486_s20 + $0x18] sm:$0xff] %v3680_v55  ;;  %s3861_s8 = scalar_lea.vmem %s7550_s13, 640  ;;  %s3984_s28 = smov [#allocation19]  }
 0x4da   : > { %3683 = vpow2.f32 %v2979_v16  ;;  %p3862_p8 = scmp.ne.s32.totalorder %s7550_s13, %s3861_s8  ;;  %s3865_s10 = sshll.u32 %s3984_s28, 4  ;;  %s3866_s10 = int_to_ptr.vmem [resolvable:$false] %s3865_s10 }
 0x4db   : > { %s3867_s18 = scalar_lea.vmem %s3866_s10, 1280  ;;  %p3868_p10 = scmp.lt.s32.totalorder %s7550_s13, %s3866_s10 }
 0x4dc   : > { %p3863_p6 = pnand %p3862_p8, %p8271_p3  ;;  %p3869_p11 = scmp.lt.s32.totalorder %s3867_s18, %s3861_s8 }
 0x4dd   : > { %s7548_s2 = scalar_lea.hbm %s8272_s24, %s3357_s4 }
 0x4de   : > { %p3864_p7 = pneg %p3863_p6  ;;  %p3870_p12 = por %p3869_p11, %p3868_p10 }
 0x4e0   : > { %p3871_p9 = pnand %p3870_p12, %p3864_p7 }
 0x4e2   : > { %v3682_v4 = vpop.eup %3681 }
 0x4e3   : > { %2981 = vst [vmem:[%s486_s20] sm:$0xff] %v3682_v4 }
 0x4e4   : > { %v3684_v27 = vpop.eup %3683 }
 0x4e5   : > { %2985 = vst [vmem:[%s486_s20 + $0x20] sm:$0xff] %v3684_v27 }
 0x4e6   : > { %3874 = shalt.err (!%p3871_p9)
}
 0x4e7   : > { %s3875_s4 = scalar_lea.hbm %s7548_s2, 640  ;;  %s3879_s19 = scalar_lea.hbm %s8272_s24, 1280 }
 0x4e8   : > { %p3876_p13 = scmp.ne.s32.totalorder %s7548_s2, %s3875_s4  ;;  %p3880_p5 = scmp.lt.u32.totalorder %s7548_s2, %s8272_s24 }
 0x4e9   : > { %p3881_p4 = scmp.lt.u32.totalorder %s3879_s19, %s3875_s4  ;;  %p3883_p8 = scmp.lt.u32.totalorder %s3875_s4, %s7548_s2 }
 0x4ea   : > { %p3877_p0 = pnand %p3876_p13, %p8271_p3 }
 0x4eb   : > { %p3882_p2 = por %p3881_p4, %p3880_p5 }
 0x4ec   : > { %p3878_p1 = pneg %p3877_p0 }
 0x4ed   : > { %p3884_p6 = por %p3883_p8, %p3882_p2 }
 0x4ef   : > { %p3885_p7 = pnand %p3884_p6, %p3878_p1 }
 0x4f1   : > { %3888 = shalt.err (!%p3885_p7)
}
 0x4f2   : > { %3394 = dma.vmem_to_hbm [thread:$0]  (%p8271_p3), %s7550_s13, 640, %s7548_s2, %s2992_s6  }
 0x4f3 PF: > { %s8273_s22 = sld [smem:[#allocation29_spill]]  ;;  %s8274_s25 = sld [smem:[#allocation37_spill]] }
 0x4f4   : > { %s8275_s27 = sld [smem:[#allocation32_spill]] }
 0x4f9   : > { %s3032_s0 = sand.u32 1, %s8273_s22   ;;  %p8276_p10 = scmp.ne.s32.totalorder %s8274_s25, 0 }
 0x4fa   : > { %p8277_p11 = scmp.ge.s32.totalorder %s8275_s27, 2  ;;  %s3033_s1 = scalar_lea.sflag [#allocation4], %s3032_s0 }
 0x4fc   : > { %p3427_p12 = pnand %p8277_p11, %p8276_p10 }
 0x4fe   : > { %3930 = dma.done.wait (!%p3427_p12), %s3033_s1, 640  }
 0x4ff   : > { %3932 = vsyncadd (!%p3427_p12), %s3033_s1, 4294966656  ;;  %s3042_s17 = scalar_lea.sflag [#allocation20], %s3032_s0 }
 0x500   : > { %3934 = dma.done.wait (!%p3427_p12), %s3042_s17, 640  }
 0x501   : > { %3936 = vsyncadd (!%p3427_p12), %s3042_s17, 4294966656  ;;  %s8278_s16 = sld [smem:[#allocation34_spill]]  ;;  %s8279_s13 = sld [smem:[#allocation30_spill]] }
 0x502   : > { %s8280_s14 = sld [smem:[#allocation31_spill]]  ;;  %s8281_s15 = sld [smem:[#allocation35_spill]] }
 0x507   : > { %p32_p3 = scmp.ge.s32.totalorder %s8278_s16, 4  }
 0x509   :  { %34 = sbr.rel (!%p32_p3) target bundleno = 24 (0x18), region = 152 }
 0x510   :  { %3047 = vsyncpa [#allocation3], 1 }
 0x511   :  { %3049 = vsyncpa [#allocation3 + $0x1], 1 }
 0x512   :  { %3050 = vsyncpa [#allocation4], 1 }
 0x513   :  { %3052 = vsyncpa [#allocation4 + $0x1], 1 }
 0x514   :  { %3053 = vsyncpa [#allocation20], 1 }
 0x515   :  { %3055 = vsyncpa [#allocation20 + $0x1], 1 }
 0x516   :  { %3056 = vsyncpa [#allocation5], 1 }
 0x517   :  { %3058 = vsyncpa [#allocation5 + $0x1], 1 }
 0x518   :  { %3059 = vsyncpa [#allocation6], 1 }
 0x519   :  { %3061 = vsyncpa [#allocation6 + $0x1], 1 }
 0x51a   :  { %3062 = vsyncpa [#allocation9], 1 }
 0x51b   :  { %3063 = vsyncpa [#allocation12], 1 }
 0x51c   :  { %3064 = vsyncpa [#allocation15], 1 }

</bundles_post_ra>
